<compile_context>
chip_gen: v6e
topology: v6e:2x2x1
jax: 0.10.0
libtpu: 0.0.40
codegen_flags: <defaults>
</compile_context>

<pallas_src>
import jax
import jax.numpy as jnp
from jax.experimental import pallas as pl
from jax.experimental.pallas import tpu as pltpu

# ----------------------------- hyper-parameters ------------------------------
N_NODES = 16
HIDDEN = 32          # GT_hidden_dim
OUT_DIM = 32         # GT_out_dim
N_HEADS = 2
N_LAYERS = 2         # L
POS_ENC_DIM = 8
NUM_ATOM_TYPE = 10
NUM_BOND_TYPE = 4
N_CLASSES = 4
INIT_GAMMA = 0.1
RESIDUAL = True
LAYER_NORM = True    # batch_norm=False

D_HEAD = OUT_DIM // N_HEADS
OUT_WIDTH = OUT_DIM + POS_ENC_DIM + N_CLASSES   # packed kernel output: [hp | p_final | logits]


# --------------------------- weight-slab layout -------------------------------
def _build_layout():
    """Static layout of every parameter inside ONE f32 slab; each tensor starts at an
    8-row-aligned sublane offset.  Computed once at import time (pure Python)."""
    layout = {}
    off = 0

    def add(name, r, c):
        nonlocal off
        layout[name] = (off, r, c)
        off += -(-r // 8) * 8      # round rows up to a multiple of 8

    add("emb_h", NUM_ATOM_TYPE, HIDDEN)
    add("emb_p_w", POS_ENC_DIM, HIDDEN)
    add("emb_p_b", 1, HIDDEN)
    add("emb_e_w", NUM_BOND_TYPE, HIDDEN)
    add("emb_e_b", 1, HIDDEN)
    for li in range(N_LAYERS):
        add(f"wq{li}", 2 * HIDDEN, OUT_DIM)
        add(f"bq{li}", 1, OUT_DIM)
        add(f"wk{li}", 2 * HIDDEN, OUT_DIM)
        add(f"bk{li}", 1, OUT_DIM)
        add(f"we{li}", HIDDEN, OUT_DIM)       # 1/sqrt(d_head) folded in at pack time
        add(f"be{li}", 1, OUT_DIM)
        add(f"wv{li}", HIDDEN, OUT_DIM)
        add(f"bv{li}", 1, OUT_DIM)
        add(f"wvp{li}", HIDDEN, OUT_DIM)
        add(f"bvp{li}", 1, OUT_DIM)
        add(f"wo{li}", OUT_DIM, OUT_DIM)
        add(f"bo{li}", 1, OUT_DIM)
        add(f"wop{li}", OUT_DIM, OUT_DIM)
        add(f"bop{li}", 1, OUT_DIM)
        add(f"ln1g{li}", 1, OUT_DIM)
        add(f"ln1b{li}", 1, OUT_DIM)
        add(f"w1{li}", OUT_DIM, 2 * OUT_DIM)
        add(f"b1{li}", 1, 2 * OUT_DIM)
        add(f"w2{li}", 2 * OUT_DIM, OUT_DIM)
        add(f"b2{li}", 1, OUT_DIM)
        add(f"ln2g{li}", 1, OUT_DIM)
        add(f"ln2b{li}", 1, OUT_DIM)
    add("pout_w", OUT_DIM, POS_ENC_DIM)
    add("pout_b", 1, POS_ENC_DIM)
    add("whp_w", OUT_DIM + POS_ENC_DIM, OUT_DIM)
    add("whp_b", 1, OUT_DIM)
    add("m0w", OUT_DIM, OUT_DIM // 2)
    add("m0b", 1, OUT_DIM // 2)
    add("m1w", OUT_DIM // 2, OUT_DIM // 4)
    add("m1b", 1, OUT_DIM // 4)
    add("m2w", OUT_DIM // 4, N_CLASSES)
    add("m2b", 1, N_CLASSES)
    return layout, off


_LAYOUT, _SLAB_ROWS = _build_layout()
_SLAB_WIDTH = 2 * OUT_DIM                       # widest parameter (W1 / Wq rows fit too)
assert all(c <= _SLAB_WIDTH for (_, _, c) in _LAYOUT.values())


# ------------------------------- Pallas kernel --------------------------------
def _san_forward_kernel(onehot_ref, p0_ref, adjw_ref, e_ref, w_ref, out_ref):
    """Entire SANNet forward (node + edge side) in a single gridless VMEM-resident kernel."""
    f32 = jnp.float32
    N = onehot_ref.shape[0]

    def W(name):
        off, r, c = _LAYOUT[name]
        return w_ref[off:off + r, :c]           # static slab slice -> free at runtime

    def layernorm(x, g, b):
        mu = jnp.mean(x, axis=-1, keepdims=True)
        var = jnp.mean((x - mu) ** 2, axis=-1, keepdims=True)
        return (x - mu) * jax.lax.rsqrt(var + 1e-5) * g + b

    adj_w = adjw_ref[...]                       # gamma-weighted real/fake edge mask (wrapper)

    # node embeddings: embedding_h (one-hot matmul, no bias), embedding_p (linear)
    h = jnp.dot(onehot_ref[...], W("emb_h"), preferred_element_type=f32)
    p = jnp.dot(p0_ref[...], W("emb_p_w"), preferred_element_type=f32) + W("emb_p_b")

    # embedding_e, hoisted out of the layer loop (identical weights & features every layer)
    e_emb = jnp.dot(e_ref[...], W("emb_e_w"), preferred_element_type=f32) + W("emb_e_b")

    for li in range(N_LAYERS):
        h_in, p_in = h, p

        # full-width Q/K (acting on [h || p] via a row-split of the weight), V, V_p -- one set
        # of dots per layer instead of per head
        wq = W(f"wq{li}")
        wk = W(f"wk{li}")
        q = (jnp.dot(h, wq[:HIDDEN], preferred_element_type=f32)
             + jnp.dot(p, wq[HIDDEN:], preferred_element_type=f32) + W(f"bq{li}"))
        k = (jnp.dot(h, wk[:HIDDEN], preferred_element_type=f32)
             + jnp.dot(p, wk[HIDDEN:], preferred_element_type=f32) + W(f"bk{li}"))
        v = jnp.dot(h, W(f"wv{li}"), preferred_element_type=f32) + W(f"bv{li}")
        vp = jnp.dot(p, W(f"wvp{li}"), preferred_element_type=f32) + W(f"bvp{li}")

        # per-layer E projection (attention scale folded into the packed weights)
        e_l = (jnp.dot(e_emb, W(f"we{li}"), preferred_element_type=f32)
               + W(f"be{li}")).reshape(N, N, OUT_DIM)

        # SAN implicit attention: one broadcast product for both heads, per-head lane reductions
        prod = q[:, None, :] * k[None, :, :] * e_l          # (N, N, OUT_DIM)

        wo = W(f"wo{li}")
        wop = W(f"wop{li}")
        h_att = jnp.zeros((N, OUT_DIM), f32) + W(f"bo{li}")    # O-projection bias
        p_att = jnp.zeros((N, OUT_DIM), f32) + W(f"bop{li}")   # O_p-projection bias
        for hd in range(N_HEADS):
            lo, hi = hd * D_HEAD, (hd + 1) * D_HEAD
            s = jnp.sum(prod[..., lo:hi], axis=-1)
            s = jnp.clip(s, -5.0, 5.0)
            wgt = jnp.exp(s) * adj_w
            inv_z = pl.reciprocal(jnp.sum(wgt, axis=-1, keepdims=True) + 1e-6, approx=True)
            # fold the per-head slice of the O / O_p projection into the head loop:
            #   concat_h(att_h) @ WO == sum_h (att_h @ WO[h*dh:(h+1)*dh, :])
            h_att = h_att + jnp.dot(
                jnp.dot(wgt, v[:, lo:hi], preferred_element_type=f32) * inv_z,
                wo[lo:hi], preferred_element_type=f32)
            p_att = p_att + jnp.dot(
                jnp.dot(wgt, vp[:, lo:hi], preferred_element_type=f32) * inv_z,
                wop[lo:hi], preferred_element_type=f32)

        h_new = h_att
        p_new = jnp.tanh(p_att)
        if RESIDUAL:
            h_new = h_in + h_new
            p_new = p_in + p_new
        if LAYER_NORM:
            h_new = layernorm(h_new, W(f"ln1g{li}"), W(f"ln1b{li}"))

        # FFN (+ residual + layernorm)
        y = jnp.dot(h_new, W(f"w1{li}"), preferred_element_type=f32) + W(f"b1{li}")
        y = jnp.maximum(y, 0.0)
        y = jnp.dot(y, W(f"w2{li}"), preferred_element_type=f32) + W(f"b2{li}")
        if RESIDUAL:
            y = h_new + y
        if LAYER_NORM:
            y = layernorm(y, W(f"ln2g{li}"), W(f"ln2b{li}"))
        h, p = y, p_new

    # p_out + single-graph centering / L2 normalization
    p = jnp.dot(p, W("pout_w"), preferred_element_type=f32) + W("pout_b")
    p = p - jnp.mean(p, axis=0, keepdims=True)
    p = p * jax.lax.rsqrt(jnp.sum(p * p, axis=0, keepdims=True) + 1e-6)

    # hp = Whp([h || p]) -- row-split of the weight instead of an in-kernel concat
    whp_w = W("whp_w")
    hp = (jnp.dot(h, whp_w[:OUT_DIM], preferred_element_type=f32)
          + jnp.dot(p, whp_w[OUT_DIM:], preferred_element_type=f32) + W("whp_b"))

    # MLP readout on hg = h (the reference uses h, not hp, for the prediction)
    y = jnp.maximum(jnp.dot(h, W("m0w"), preferred_element_type=f32) + W("m0b"), 0.0)
    y = jnp.maximum(jnp.dot(y, W("m1w"), preferred_element_type=f32) + W("m1b"), 0.0)
    logits = jnp.dot(y, W("m2w"), preferred_element_type=f32) + W("m2b")

    # single lane-packed output: [hp | p_final | logits]
    out_ref[:, 0:OUT_DIM] = hp.astype(out_ref.dtype)
    out_ref[:, OUT_DIM:OUT_DIM + POS_ENC_DIM] = p.astype(out_ref.dtype)
    out_ref[:, OUT_DIM + POS_ENC_DIM:OUT_WIDTH] = logits.astype(out_ref.dtype)


# -------------------------------- parameters ----------------------------------
def _lin_init(key, fan_in, fan_out):
    kw, kb = jax.random.split(key)
    s = 1.0 / float(fan_in) ** 0.5
    w = jax.random.uniform(kw, (fan_in, fan_out), jnp.float32, -s, s)
    b = jax.random.uniform(kb, (fan_out,), jnp.float32, -s, s)
    return w, b


def init_params(key):
    assert HIDDEN == OUT_DIM and OUT_DIM % N_HEADS == 0
    keys = list(jax.random.split(key, 64))
    ki = iter(keys)
    p = {}
    p["gamma"] = jnp.array([INIT_GAMMA], dtype=jnp.float32)
    p["emb_h"] = jax.random.normal(next(ki), (NUM_ATOM_TYPE, HIDDEN), jnp.float32)
    p["emb_p_w"], p["emb_p_b"] = _lin_init(next(ki), POS_ENC_DIM, HIDDEN)
    p["emb_e_w"], p["emb_e_b"] = _lin_init(next(ki), NUM_BOND_TYPE, HIDDEN)

    layers = []
    for li in range(N_LAYERS):
        dout = OUT_DIM if li == N_LAYERS - 1 else HIDDEN
        lp = {}
        lp["Wq"], lp["bq"] = _lin_init(next(ki), 2 * HIDDEN, dout)
        lp["Wk"], lp["bk"] = _lin_init(next(ki), 2 * HIDDEN, dout)
        lp["WE"], lp["bE"] = _lin_init(next(ki), HIDDEN, dout)
        lp["Wv"], lp["bv"] = _lin_init(next(ki), HIDDEN, dout)
        lp["Wvp"], lp["bvp"] = _lin_init(next(ki), HIDDEN, dout)
        lp["WO"], lp["bO"] = _lin_init(next(ki), dout, dout)
        lp["WOp"], lp["bOp"] = _lin_init(next(ki), dout, dout)
        lp["ln1_g"] = jnp.ones((dout,), jnp.float32)
        lp["ln1_b"] = jnp.zeros((dout,), jnp.float32)
        lp["W1"], lp["b1"] = _lin_init(next(ki), dout, 2 * dout)
        lp["W2"], lp["b2"] = _lin_init(next(ki), 2 * dout, dout)
        lp["ln2_g"] = jnp.ones((dout,), jnp.float32)
        lp["ln2_b"] = jnp.zeros((dout,), jnp.float32)
        layers.append(lp)
    p["layers"] = layers

    p["p_out_w"], p["p_out_b"] = _lin_init(next(ki), OUT_DIM, POS_ENC_DIM)
    p["whp_w"], p["whp_b"] = _lin_init(next(ki), OUT_DIM + POS_ENC_DIM, OUT_DIM)

    # MLPReadout with L=2: 32 -> 16 -> 8 -> n_classes
    mlp = []
    dims = [OUT_DIM, OUT_DIM // 2, OUT_DIM // 4, N_CLASSES]
    for a, b in zip(dims[:-1], dims[1:]):
        mlp.append(_lin_init(next(ki), a, b))
    p["mlp"] = mlp
    return p


def pack_params(params):
    """One-time (init-time, NOT per-call) re-layout of the reference parameterization into a
    single tile-aligned f32 slab.  The 1/sqrt(d_head) attention scale is folded into the
    E-projection weights/biases here."""
    scale = 1.0 / float(D_HEAD) ** 0.5
    entries = {
        "emb_h": params["emb_h"],
        "emb_p_w": params["emb_p_w"], "emb_p_b": params["emb_p_b"],
        "emb_e_w": params["emb_e_w"], "emb_e_b": params["emb_e_b"],
        "pout_w": params["p_out_w"], "pout_b": params["p_out_b"],
        "whp_w": params["whp_w"], "whp_b": params["whp_b"],
        "m0w": params["mlp"][0][0], "m0b": params["mlp"][0][1],
        "m1w": params["mlp"][1][0], "m1b": params["mlp"][1][1],
        "m2w": params["mlp"][2][0], "m2b": params["mlp"][2][1],
    }
    for li, lp in enumerate(params["layers"]):
        entries.update({
            f"wq{li}": lp["Wq"], f"bq{li}": lp["bq"],
            f"wk{li}": lp["Wk"], f"bk{li}": lp["bk"],
            f"we{li}": lp["WE"] * scale, f"be{li}": lp["bE"] * scale,
            f"wv{li}": lp["Wv"], f"bv{li}": lp["bv"],
            f"wvp{li}": lp["Wvp"], f"bvp{li}": lp["bvp"],
            f"wo{li}": lp["WO"], f"bo{li}": lp["bO"],
            f"wop{li}": lp["WOp"], f"bop{li}": lp["bOp"],
            f"ln1g{li}": lp["ln1_g"], f"ln1b{li}": lp["ln1_b"],
            f"w1{li}": lp["W1"], f"b1{li}": lp["b1"],
            f"w2{li}": lp["W2"], f"b2{li}": lp["b2"],
            f"ln2g{li}": lp["ln2_g"], f"ln2b{li}": lp["ln2_b"],
        })
    slab = jnp.zeros((_SLAB_ROWS, _SLAB_WIDTH), jnp.float32)
    for name, (off, r, c) in _LAYOUT.items():
        arr = jnp.asarray(entries[name], jnp.float32)
        if arr.ndim == 1:
            arr = arr.reshape(1, -1)
        assert arr.shape == (r, c), (name, arr.shape, (r, c))
        slab = slab.at[off:off + r, :c].set(arr)
    return {"slab": slab, "gamma": params["gamma"]}


# ---------------------------------- forward ------------------------------------
def san_net_forward(packed, atom_ids, p_init, edge_feat, adj):
    N = atom_ids.shape[0]

    # cheap wrapper-side prep (plain XLA): one-hot ids, gamma-weighted full-graph edge mask
    onehot = jax.nn.one_hot(atom_ids, NUM_ATOM_TYPE, dtype=jnp.float32)
    gamma = packed["gamma"][0]
    adj_w = adj * (1.0 / (1.0 + gamma)) + (1.0 - adj) * (gamma / (1.0 + gamma))
    e_flat = edge_feat.reshape(N * N, NUM_BOND_TYPE)

    vmem = lambda: pl.BlockSpec(memory_space=pltpu.MemorySpace.VMEM)

    out = pl.pallas_call(
        _san_forward_kernel,
        out_shape=jax.ShapeDtypeStruct((N, OUT_WIDTH), jnp.float32),
        in_specs=[vmem() for _ in range(5)],
        out_specs=vmem(),
    )(onehot, p_init, adj_w, e_flat, packed["slab"])

    hp = out[:, :OUT_DIM]
    p_fin = out[:, OUT_DIM:OUT_DIM + POS_ENC_DIM]
    logits = out[:, OUT_DIM + POS_ENC_DIM:OUT_WIDTH]
    return logits, hp, p_fin


if __name__ == "__main__":
    key = jax.random.PRNGKey(0)
    k_par, k_id, k_p, k_e, k_adj = jax.random.split(key, 5)

    params = init_params(k_par)
    packed = pack_params(params)        # one-time packing, outside the jitted per-call path

    atom_ids = jax.random.randint(k_id, (N_NODES,), 0, NUM_ATOM_TYPE)
    p_init = jax.random.normal(k_p, (N_NODES, POS_ENC_DIM), jnp.float32)
    edge_feat = jax.random.normal(k_e, (N_NODES, N_NODES, NUM_BOND_TYPE), jnp.float32)
    adj = (jax.random.uniform(k_adj, (N_NODES, N_NODES)) < 0.3).astype(jnp.float32)

    fwd = jax.jit(san_net_forward)
    logits, hp, p_final = fwd(packed, atom_ids, p_init, edge_feat, adj)
    jax.block_until_ready((logits, hp, p_final))

    assert logits.shape == (N_NODES, N_CLASSES)
    assert hp.shape == (N_NODES, OUT_DIM)
    assert p_final.shape == (N_NODES, POS_ENC_DIM)
    assert bool(jnp.all(jnp.isfinite(logits)))
    print("KERNEL_OK")
</pallas_src>

<mosaic_0001>
module attributes {stable_mosaic.version = 11 : i64} {
  func.func @_san_forward_kernel(%arg0: memref<16x10xf32, #tpu.memory_space<vmem>>, %arg1: memref<16x8xf32, #tpu.memory_space<vmem>>, %arg2: memref<16x16xf32, #tpu.memory_space<vmem>>, %arg3: memref<256x4xf32, #tpu.memory_space<vmem>>, %arg4: memref<1192x64xf32, #tpu.memory_space<vmem>>, %arg5: memref<16x44xf32, #tpu.memory_space<vmem>>) attributes {dimension_semantics = [], scalar_prefetch = 0 : i64, scratch_operands = 0 : i64, tpu.core_type = #tpu.core_type<tc>} {
    %c0 = arith.constant 0 : index
    %c0_0 = arith.constant 0 : index
    %0 = vector.load %arg2[%c0, %c0_0] : memref<16x16xf32, #tpu.memory_space<vmem>>, vector<16x16xf32>
    %c0_1 = arith.constant 0 : index
    %c0_2 = arith.constant 0 : index
    %1 = vector.load %arg0[%c0_1, %c0_2] : memref<16x10xf32, #tpu.memory_space<vmem>>, vector<16x10xf32>
    %c0_3 = arith.constant 0 : index
    %c0_4 = arith.constant 0 : index
    %2 = vector.load %arg4[%c0_3, %c0_4] : memref<1192x64xf32, #tpu.memory_space<vmem>>, vector<10x32xf32>
    %cst = arith.constant dense<0.000000e+00> : vector<16x32xf32>
    %3 = tpu.matmul %1, %2, %cst {dimension_numbers = #tpu.dot_dimension_numbers<[1], [0], [0], [1], [0, 0, 1, 1], [], []>} : vector<16x10xf32>, vector<10x32xf32>, vector<16x32xf32> -> vector<16x32xf32>
    %c0_5 = arith.constant 0 : index
    %c0_6 = arith.constant 0 : index
    %4 = vector.load %arg1[%c0_5, %c0_6] : memref<16x8xf32, #tpu.memory_space<vmem>>, vector<16x8xf32>
    %c16 = arith.constant 16 : index
    %c0_7 = arith.constant 0 : index
    %5 = vector.load %arg4[%c16, %c0_7] : memref<1192x64xf32, #tpu.memory_space<vmem>>, vector<8x32xf32>
    %cst_8 = arith.constant dense<0.000000e+00> : vector<16x32xf32>
    %6 = tpu.matmul %4, %5, %cst_8 {dimension_numbers = #tpu.dot_dimension_numbers<[1], [0], [0], [1], [0, 0, 1, 1], [], []>} : vector<16x8xf32>, vector<8x32xf32>, vector<16x32xf32> -> vector<16x32xf32>
    %c24 = arith.constant 24 : index
    %c0_9 = arith.constant 0 : index
    %7 = vector.load %arg4[%c24, %c0_9] : memref<1192x64xf32, #tpu.memory_space<vmem>>, vector<1x32xf32>
    %8 = vector.broadcast %7 : vector<1x32xf32> to vector<16x32xf32>
    %9 = arith.addf %6, %8 : vector<16x32xf32>
    %c0_10 = arith.constant 0 : index
    %c0_11 = arith.constant 0 : index
    %10 = vector.load %arg3[%c0_10, %c0_11] : memref<256x4xf32, #tpu.memory_space<vmem>>, vector<256x4xf32>
    %c32 = arith.constant 32 : index
    %c0_12 = arith.constant 0 : index
    %11 = vector.load %arg4[%c32, %c0_12] : memref<1192x64xf32, #tpu.memory_space<vmem>>, vector<4x32xf32>
    %cst_13 = arith.constant dense<0.000000e+00> : vector<256x32xf32>
    %12 = tpu.matmul %10, %11, %cst_13 {dimension_numbers = #tpu.dot_dimension_numbers<[1], [0], [0], [1], [0, 0, 1, 1], [], []>} : vector<256x4xf32>, vector<4x32xf32>, vector<256x32xf32> -> vector<256x32xf32>
    %c40 = arith.constant 40 : index
    %c0_14 = arith.constant 0 : index
    %13 = vector.load %arg4[%c40, %c0_14] : memref<1192x64xf32, #tpu.memory_space<vmem>>, vector<1x32xf32>
    %14 = vector.broadcast %13 : vector<1x32xf32> to vector<256x32xf32>
    %15 = arith.addf %12, %14 : vector<256x32xf32>
    %c48 = arith.constant 48 : index
    %c0_15 = arith.constant 0 : index
    %16 = vector.load %arg4[%c48, %c0_15] : memref<1192x64xf32, #tpu.memory_space<vmem>>, vector<64x32xf32>
    %c120 = arith.constant 120 : index
    %c0_16 = arith.constant 0 : index
    %17 = vector.load %arg4[%c120, %c0_16] : memref<1192x64xf32, #tpu.memory_space<vmem>>, vector<64x32xf32>
    %18 = vector.extract_strided_slice %16 {offsets = [0, 0], sizes = [32, 32], strides = [1, 1]} : vector<64x32xf32> to vector<32x32xf32>
    %cst_17 = arith.constant dense<0.000000e+00> : vector<16x32xf32>
    %19 = tpu.matmul %3, %18, %cst_17 {dimension_numbers = #tpu.dot_dimension_numbers<[1], [0], [0], [1], [0, 0, 1, 1], [], []>} : vector<16x32xf32>, vector<32x32xf32>, vector<16x32xf32> -> vector<16x32xf32>
    %20 = vector.extract_strided_slice %16 {offsets = [32, 0], sizes = [32, 32], strides = [1, 1]} : vector<64x32xf32> to vector<32x32xf32>
    %cst_18 = arith.constant dense<0.000000e+00> : vector<16x32xf32>
    %21 = tpu.matmul %9, %20, %cst_18 {dimension_numbers = #tpu.dot_dimension_numbers<[1], [0], [0], [1], [0, 0, 1, 1], [], []>} : vector<16x32xf32>, vector<32x32xf32>, vector<16x32xf32> -> vector<16x32xf32>
    %22 = arith.addf %19, %21 : vector<16x32xf32>
    %c112 = arith.constant 112 : index
    %c0_19 = arith.constant 0 : index
    %23 = vector.load %arg4[%c112, %c0_19] : memref<1192x64xf32, #tpu.memory_space<vmem>>, vector<1x32xf32>
    %24 = vector.broadcast %23 : vector<1x32xf32> to vector<16x32xf32>
    %25 = arith.addf %22, %24 : vector<16x32xf32>
    %26 = vector.extract_strided_slice %17 {offsets = [0, 0], sizes = [32, 32], strides = [1, 1]} : vector<64x32xf32> to vector<32x32xf32>
    %cst_20 = arith.constant dense<0.000000e+00> : vector<16x32xf32>
    %27 = tpu.matmul %3, %26, %cst_20 {dimension_numbers = #tpu.dot_dimension_numbers<[1], [0], [0], [1], [0, 0, 1, 1], [], []>} : vector<16x32xf32>, vector<32x32xf32>, vector<16x32xf32> -> vector<16x32xf32>
    %28 = vector.extract_strided_slice %17 {offsets = [32, 0], sizes = [32, 32], strides = [1, 1]} : vector<64x32xf32> to vector<32x32xf32>
    %cst_21 = arith.constant dense<0.000000e+00> : vector<16x32xf32>
    %29 = tpu.matmul %9, %28, %cst_21 {dimension_numbers = #tpu.dot_dimension_numbers<[1], [0], [0], [1], [0, 0, 1, 1], [], []>} : vector<16x32xf32>, vector<32x32xf32>, vector<16x32xf32> -> vector<16x32xf32>
    %30 = arith.addf %27, %29 : vector<16x32xf32>
    %c184 = arith.constant 184 : index
    %c0_22 = arith.constant 0 : index
    %31 = vector.load %arg4[%c184, %c0_22] : memref<1192x64xf32, #tpu.memory_space<vmem>>, vector<1x32xf32>
    %32 = vector.broadcast %31 : vector<1x32xf32> to vector<16x32xf32>
    %33 = arith.addf %30, %32 : vector<16x32xf32>
    %c232 = arith.constant 232 : index
    %c0_23 = arith.constant 0 : index
    %34 = vector.load %arg4[%c232, %c0_23] : memref<1192x64xf32, #tpu.memory_space<vmem>>, vector<32x32xf32>
    %cst_24 = arith.constant dense<0.000000e+00> : vector<16x32xf32>
    %35 = tpu.matmul %3, %34, %cst_24 {dimension_numbers = #tpu.dot_dimension_numbers<[1], [0], [0], [1], [0, 0, 1, 1], [], []>} : vector<16x32xf32>, vector<32x32xf32>, vector<16x32xf32> -> vector<16x32xf32>
    %c264 = arith.constant 264 : index
    %c0_25 = arith.constant 0 : index
    %36 = vector.load %arg4[%c264, %c0_25] : memref<1192x64xf32, #tpu.memory_space<vmem>>, vector<1x32xf32>
    %37 = vector.broadcast %36 : vector<1x32xf32> to vector<16x32xf32>
    %38 = arith.addf %35, %37 : vector<16x32xf32>
    %c272 = arith.constant 272 : index
    %c0_26 = arith.constant 0 : index
    %39 = vector.load %arg4[%c272, %c0_26] : memref<1192x64xf32, #tpu.memory_space<vmem>>, vector<32x32xf32>
    %cst_27 = arith.constant dense<0.000000e+00> : vector<16x32xf32>
    %40 = tpu.matmul %9, %39, %cst_27 {dimension_numbers = #tpu.dot_dimension_numbers<[1], [0], [0], [1], [0, 0, 1, 1], [], []>} : vector<16x32xf32>, vector<32x32xf32>, vector<16x32xf32> -> vector<16x32xf32>
    %c304 = arith.constant 304 : index
    %c0_28 = arith.constant 0 : index
    %41 = vector.load %arg4[%c304, %c0_28] : memref<1192x64xf32, #tpu.memory_space<vmem>>, vector<1x32xf32>
    %42 = vector.broadcast %41 : vector<1x32xf32> to vector<16x32xf32>
    %43 = arith.addf %40, %42 : vector<16x32xf32>
    %c192 = arith.constant 192 : index
    %c0_29 = arith.constant 0 : index
    %44 = vector.load %arg4[%c192, %c0_29] : memref<1192x64xf32, #tpu.memory_space<vmem>>, vector<32x32xf32>
    %cst_30 = arith.constant dense<0.000000e+00> : vector<256x32xf32>
    %45 = tpu.matmul %15, %44, %cst_30 {dimension_numbers = #tpu.dot_dimension_numbers<[1], [0], [0], [1], [0, 0, 1, 1], [], []>} : vector<256x32xf32>, vector<32x32xf32>, vector<256x32xf32> -> vector<256x32xf32>
    %c224 = arith.constant 224 : index
    %c0_31 = arith.constant 0 : index
    %46 = vector.load %arg4[%c224, %c0_31] : memref<1192x64xf32, #tpu.memory_space<vmem>>, vector<1x32xf32>
    %47 = vector.broadcast %46 : vector<1x32xf32> to vector<256x32xf32>
    %48 = arith.addf %45, %47 : vector<256x32xf32>
    %49 = vector.shape_cast %48 : vector<256x32xf32> to vector<16x16x32xf32>
    %50 = vector.shape_cast %25 : vector<16x32xf32> to vector<16x1x32xf32>
    %51 = vector.shape_cast %33 : vector<16x32xf32> to vector<1x16x32xf32>
    %52 = vector.broadcast %50 : vector<16x1x32xf32> to vector<16x16x32xf32>
    %53 = vector.broadcast %51 : vector<1x16x32xf32> to vector<16x16x32xf32>
    %54 = arith.mulf %52, %53 : vector<16x16x32xf32>
    %55 = arith.mulf %54, %49 : vector<16x16x32xf32>
    %c312 = arith.constant 312 : index
    %c0_32 = arith.constant 0 : index
    %56 = vector.load %arg4[%c312, %c0_32] : memref<1192x64xf32, #tpu.memory_space<vmem>>, vector<32x32xf32>
    %c352 = arith.constant 352 : index
    %c0_33 = arith.constant 0 : index
    %57 = vector.load %arg4[%c352, %c0_33] : memref<1192x64xf32, #tpu.memory_space<vmem>>, vector<32x32xf32>
    %cst_34 = arith.constant 0.000000e+00 : f32
    %58 = vector.broadcast %cst_34 : f32 to vector<16x32xf32>
    %c344 = arith.constant 344 : index
    %c0_35 = arith.constant 0 : index
    %59 = vector.load %arg4[%c344, %c0_35] : memref<1192x64xf32, #tpu.memory_space<vmem>>, vector<1x32xf32>
    %60 = vector.broadcast %59 : vector<1x32xf32> to vector<16x32xf32>
    %61 = arith.addf %58, %60 : vector<16x32xf32>
    %cst_36 = arith.constant 0.000000e+00 : f32
    %62 = vector.broadcast %cst_36 : f32 to vector<16x32xf32>
    %c384 = arith.constant 384 : index
    %c0_37 = arith.constant 0 : index
    %63 = vector.load %arg4[%c384, %c0_37] : memref<1192x64xf32, #tpu.memory_space<vmem>>, vector<1x32xf32>
    %64 = vector.broadcast %63 : vector<1x32xf32> to vector<16x32xf32>
    %65 = arith.addf %62, %64 : vector<16x32xf32>
    %66 = vector.extract_strided_slice %55 {offsets = [0, 0, 0], sizes = [16, 16, 16], strides = [1, 1, 1]} : vector<16x16x32xf32> to vector<16x16x16xf32>
    %cst_38 = arith.constant dense<0.000000e+00> : vector<16x16xf32>
    %67 = vector.multi_reduction <add>, %66, %cst_38 [2] : vector<16x16x16xf32> to vector<16x16xf32>
    %cst_39 = arith.constant -5.000000e+00 : f32
    %cst_40 = arith.constant 5.000000e+00 : f32
    %68 = vector.broadcast %cst_39 : f32 to vector<16x16xf32>
    %69 = arith.maximumf %68, %67 : vector<16x16xf32>
    %70 = vector.broadcast %cst_40 : f32 to vector<16x16xf32>
    %71 = arith.minimumf %70, %69 : vector<16x16xf32>
    %72 = math.exp %71 : vector<16x16xf32>
    %73 = arith.mulf %72, %0 : vector<16x16xf32>
    %cst_41 = arith.constant dense<0.000000e+00> : vector<16xf32>
    %74 = vector.multi_reduction <add>, %73, %cst_41 [1] : vector<16x16xf32> to vector<16xf32>
    %75 = vector.shape_cast %74 : vector<16xf32> to vector<16x1xf32>
    %cst_42 = arith.constant 9.99999997E-7 : f32
    %76 = vector.broadcast %cst_42 : f32 to vector<16x1xf32>
    %77 = arith.addf %75, %76 : vector<16x1xf32>
    %78 = tpu.reciprocal %77 {approx = true} : vector<16x1xf32> -> vector<16x1xf32>
    %79 = vector.extract_strided_slice %38 {offsets = [0, 0], sizes = [16, 16], strides = [1, 1]} : vector<16x32xf32> to vector<16x16xf32>
    %cst_43 = arith.constant dense<0.000000e+00> : vector<16x16xf32>
    %80 = tpu.matmul %73, %79, %cst_43 {dimension_numbers = #tpu.dot_dimension_numbers<[1], [0], [0], [1], [0, 0, 1, 1], [], []>} : vector<16x16xf32>, vector<16x16xf32>, vector<16x16xf32> -> vector<16x16xf32>
    %81 = vector.broadcast %78 : vector<16x1xf32> to vector<16x16xf32>
    %82 = arith.mulf %80, %81 : vector<16x16xf32>
    %83 = vector.extract_strided_slice %56 {offsets = [0, 0], sizes = [16, 32], strides = [1, 1]} : vector<32x32xf32> to vector<16x32xf32>
    %cst_44 = arith.constant dense<0.000000e+00> : vector<16x32xf32>
    %84 = tpu.matmul %82, %83, %cst_44 {dimension_numbers = #tpu.dot_dimension_numbers<[1], [0], [0], [1], [0, 0, 1, 1], [], []>} : vector<16x16xf32>, vector<16x32xf32>, vector<16x32xf32> -> vector<16x32xf32>
    %85 = arith.addf %61, %84 : vector<16x32xf32>
    %86 = vector.extract_strided_slice %43 {offsets = [0, 0], sizes = [16, 16], strides = [1, 1]} : vector<16x32xf32> to vector<16x16xf32>
    %cst_45 = arith.constant dense<0.000000e+00> : vector<16x16xf32>
    %87 = tpu.matmul %73, %86, %cst_45 {dimension_numbers = #tpu.dot_dimension_numbers<[1], [0], [0], [1], [0, 0, 1, 1], [], []>} : vector<16x16xf32>, vector<16x16xf32>, vector<16x16xf32> -> vector<16x16xf32>
    %88 = vector.broadcast %78 : vector<16x1xf32> to vector<16x16xf32>
    %89 = arith.mulf %87, %88 : vector<16x16xf32>
    %90 = vector.extract_strided_slice %57 {offsets = [0, 0], sizes = [16, 32], strides = [1, 1]} : vector<32x32xf32> to vector<16x32xf32>
    %cst_46 = arith.constant dense<0.000000e+00> : vector<16x32xf32>
    %91 = tpu.matmul %89, %90, %cst_46 {dimension_numbers = #tpu.dot_dimension_numbers<[1], [0], [0], [1], [0, 0, 1, 1], [], []>} : vector<16x16xf32>, vector<16x32xf32>, vector<16x32xf32> -> vector<16x32xf32>
    %92 = arith.addf %65, %91 : vector<16x32xf32>
    %93 = vector.extract_strided_slice %55 {offsets = [0, 0, 16], sizes = [16, 16, 16], strides = [1, 1, 1]} : vector<16x16x32xf32> to vector<16x16x16xf32>
    %cst_47 = arith.constant dense<0.000000e+00> : vector<16x16xf32>
    %94 = vector.multi_reduction <add>, %93, %cst_47 [2] : vector<16x16x16xf32> to vector<16x16xf32>
    %cst_48 = arith.constant -5.000000e+00 : f32
    %cst_49 = arith.constant 5.000000e+00 : f32
    %95 = vector.broadcast %cst_48 : f32 to vector<16x16xf32>
    %96 = arith.maximumf %95, %94 : vector<16x16xf32>
    %97 = vector.broadcast %cst_49 : f32 to vector<16x16xf32>
    %98 = arith.minimumf %97, %96 : vector<16x16xf32>
    %99 = math.exp %98 : vector<16x16xf32>
    %100 = arith.mulf %99, %0 : vector<16x16xf32>
    %cst_50 = arith.constant dense<0.000000e+00> : vector<16xf32>
    %101 = vector.multi_reduction <add>, %100, %cst_50 [1] : vector<16x16xf32> to vector<16xf32>
    %102 = vector.shape_cast %101 : vector<16xf32> to vector<16x1xf32>
    %cst_51 = arith.constant 9.99999997E-7 : f32
    %103 = vector.broadcast %cst_51 : f32 to vector<16x1xf32>
    %104 = arith.addf %102, %103 : vector<16x1xf32>
    %105 = tpu.reciprocal %104 {approx = true} : vector<16x1xf32> -> vector<16x1xf32>
    %106 = vector.extract_strided_slice %38 {offsets = [0, 16], sizes = [16, 16], strides = [1, 1]} : vector<16x32xf32> to vector<16x16xf32>
    %cst_52 = arith.constant dense<0.000000e+00> : vector<16x16xf32>
    %107 = tpu.matmul %100, %106, %cst_52 {dimension_numbers = #tpu.dot_dimension_numbers<[1], [0], [0], [1], [0, 0, 1, 1], [], []>} : vector<16x16xf32>, vector<16x16xf32>, vector<16x16xf32> -> vector<16x16xf32>
    %108 = vector.broadcast %105 : vector<16x1xf32> to vector<16x16xf32>
    %109 = arith.mulf %107, %108 : vector<16x16xf32>
    %110 = vector.extract_strided_slice %56 {offsets = [16, 0], sizes = [16, 32], strides = [1, 1]} : vector<32x32xf32> to vector<16x32xf32>
    %cst_53 = arith.constant dense<0.000000e+00> : vector<16x32xf32>
    %111 = tpu.matmul %109, %110, %cst_53 {dimension_numbers = #tpu.dot_dimension_numbers<[1], [0], [0], [1], [0, 0, 1, 1], [], []>} : vector<16x16xf32>, vector<16x32xf32>, vector<16x32xf32> -> vector<16x32xf32>
    %112 = arith.addf %85, %111 : vector<16x32xf32>
    %113 = vector.extract_strided_slice %43 {offsets = [0, 16], sizes = [16, 16], strides = [1, 1]} : vector<16x32xf32> to vector<16x16xf32>
    %cst_54 = arith.constant dense<0.000000e+00> : vector<16x16xf32>
    %114 = tpu.matmul %100, %113, %cst_54 {dimension_numbers = #tpu.dot_dimension_numbers<[1], [0], [0], [1], [0, 0, 1, 1], [], []>} : vector<16x16xf32>, vector<16x16xf32>, vector<16x16xf32> -> vector<16x16xf32>
    %115 = vector.broadcast %105 : vector<16x1xf32> to vector<16x16xf32>
    %116 = arith.mulf %114, %115 : vector<16x16xf32>
    %117 = vector.extract_strided_slice %57 {offsets = [16, 0], sizes = [16, 32], strides = [1, 1]} : vector<32x32xf32> to vector<16x32xf32>
    %cst_55 = arith.constant dense<0.000000e+00> : vector<16x32xf32>
    %118 = tpu.matmul %116, %117, %cst_55 {dimension_numbers = #tpu.dot_dimension_numbers<[1], [0], [0], [1], [0, 0, 1, 1], [], []>} : vector<16x16xf32>, vector<16x32xf32>, vector<16x32xf32> -> vector<16x32xf32>
    %119 = arith.addf %92, %118 : vector<16x32xf32>
    %120 = math.tanh %119 : vector<16x32xf32>
    %121 = arith.addf %3, %112 : vector<16x32xf32>
    %122 = arith.addf %9, %120 : vector<16x32xf32>
    %c392 = arith.constant 392 : index
    %c0_56 = arith.constant 0 : index
    %123 = vector.load %arg4[%c392, %c0_56] : memref<1192x64xf32, #tpu.memory_space<vmem>>, vector<1x32xf32>
    %c400 = arith.constant 400 : index
    %c0_57 = arith.constant 0 : index
    %124 = vector.load %arg4[%c400, %c0_57] : memref<1192x64xf32, #tpu.memory_space<vmem>>, vector<1x32xf32>
    %cst_58 = arith.constant dense<0.000000e+00> : vector<16xf32>
    %125 = vector.multi_reduction <add>, %121, %cst_58 [1] : vector<16x32xf32> to vector<16xf32>
    %126 = vector.shape_cast %125 : vector<16xf32> to vector<16x1xf32>
    %cst_59 = arith.constant 3.200000e+01 : f32
    %127 = vector.broadcast %cst_59 : f32 to vector<16x1xf32>
    %128 = arith.divf %126, %127 : vector<16x1xf32>
    %129 = vector.broadcast %128 : vector<16x1xf32> to vector<16x32xf32>
    %130 = arith.subf %121, %129 : vector<16x32xf32>
    %131 = arith.mulf %130, %130 : vector<16x32xf32>
    %cst_60 = arith.constant dense<0.000000e+00> : vector<16xf32>
    %132 = vector.multi_reduction <add>, %131, %cst_60 [1] : vector<16x32xf32> to vector<16xf32>
    %133 = vector.shape_cast %132 : vector<16xf32> to vector<16x1xf32>
    %cst_61 = arith.constant 3.200000e+01 : f32
    %134 = vector.broadcast %cst_61 : f32 to vector<16x1xf32>
    %135 = arith.divf %133, %134 : vector<16x1xf32>
    %136 = vector.broadcast %128 : vector<16x1xf32> to vector<16x32xf32>
    %137 = arith.subf %121, %136 : vector<16x32xf32>
    %cst_62 = arith.constant 9.99999974E-6 : f32
    %138 = vector.broadcast %cst_62 : f32 to vector<16x1xf32>
    %139 = arith.addf %135, %138 : vector<16x1xf32>
    %140 = math.rsqrt %139 : vector<16x1xf32>
    %141 = vector.broadcast %140 : vector<16x1xf32> to vector<16x32xf32>
    %142 = arith.mulf %137, %141 : vector<16x32xf32>
    %143 = vector.broadcast %123 : vector<1x32xf32> to vector<16x32xf32>
    %144 = arith.mulf %142, %143 : vector<16x32xf32>
    %145 = vector.broadcast %124 : vector<1x32xf32> to vector<16x32xf32>
    %146 = arith.addf %144, %145 : vector<16x32xf32>
    %c408 = arith.constant 408 : index
    %c0_63 = arith.constant 0 : index
    %147 = vector.load %arg4[%c408, %c0_63] : memref<1192x64xf32, #tpu.memory_space<vmem>>, vector<32x64xf32>
    %cst_64 = arith.constant dense<0.000000e+00> : vector<16x64xf32>
    %148 = tpu.matmul %146, %147, %cst_64 {dimension_numbers = #tpu.dot_dimension_numbers<[1], [0], [0], [1], [0, 0, 1, 1], [], []>} : vector<16x32xf32>, vector<32x64xf32>, vector<16x64xf32> -> vector<16x64xf32>
    %c440 = arith.constant 440 : index
    %c0_65 = arith.constant 0 : index
    %149 = vector.load %arg4[%c440, %c0_65] : memref<1192x64xf32, #tpu.memory_space<vmem>>, vector<1x64xf32>
    %150 = vector.broadcast %149 : vector<1x64xf32> to vector<16x64xf32>
    %151 = arith.addf %148, %150 : vector<16x64xf32>
    %cst_66 = arith.constant 0.000000e+00 : f32
    %152 = vector.broadcast %cst_66 : f32 to vector<16x64xf32>
    %153 = arith.maximumf %151, %152 : vector<16x64xf32>
    %c448 = arith.constant 448 : index
    %c0_67 = arith.constant 0 : index
    %154 = vector.load %arg4[%c448, %c0_67] : memref<1192x64xf32, #tpu.memory_space<vmem>>, vector<64x32xf32>
    %cst_68 = arith.constant dense<0.000000e+00> : vector<16x32xf32>
    %155 = tpu.matmul %153, %154, %cst_68 {dimension_numbers = #tpu.dot_dimension_numbers<[1], [0], [0], [1], [0, 0, 1, 1], [], []>} : vector<16x64xf32>, vector<64x32xf32>, vector<16x32xf32> -> vector<16x32xf32>
    %c512 = arith.constant 512 : index
    %c0_69 = arith.constant 0 : index
    %156 = vector.load %arg4[%c512, %c0_69] : memref<1192x64xf32, #tpu.memory_space<vmem>>, vector<1x32xf32>
    %157 = vector.broadcast %156 : vector<1x32xf32> to vector<16x32xf32>
    %158 = arith.addf %155, %157 : vector<16x32xf32>
    %159 = arith.addf %146, %158 : vector<16x32xf32>
    %c520 = arith.constant 520 : index
    %c0_70 = arith.constant 0 : index
    %160 = vector.load %arg4[%c520, %c0_70] : memref<1192x64xf32, #tpu.memory_space<vmem>>, vector<1x32xf32>
    %c528 = arith.constant 528 : index
    %c0_71 = arith.constant 0 : index
    %161 = vector.load %arg4[%c528, %c0_71] : memref<1192x64xf32, #tpu.memory_space<vmem>>, vector<1x32xf32>
    %cst_72 = arith.constant dense<0.000000e+00> : vector<16xf32>
    %162 = vector.multi_reduction <add>, %159, %cst_72 [1] : vector<16x32xf32> to vector<16xf32>
    %163 = vector.shape_cast %162 : vector<16xf32> to vector<16x1xf32>
    %cst_73 = arith.constant 3.200000e+01 : f32
    %164 = vector.broadcast %cst_73 : f32 to vector<16x1xf32>
    %165 = arith.divf %163, %164 : vector<16x1xf32>
    %166 = vector.broadcast %165 : vector<16x1xf32> to vector<16x32xf32>
    %167 = arith.subf %159, %166 : vector<16x32xf32>
    %168 = arith.mulf %167, %167 : vector<16x32xf32>
    %cst_74 = arith.constant dense<0.000000e+00> : vector<16xf32>
    %169 = vector.multi_reduction <add>, %168, %cst_74 [1] : vector<16x32xf32> to vector<16xf32>
    %170 = vector.shape_cast %169 : vector<16xf32> to vector<16x1xf32>
    %cst_75 = arith.constant 3.200000e+01 : f32
    %171 = vector.broadcast %cst_75 : f32 to vector<16x1xf32>
    %172 = arith.divf %170, %171 : vector<16x1xf32>
    %173 = vector.broadcast %165 : vector<16x1xf32> to vector<16x32xf32>
    %174 = arith.subf %159, %173 : vector<16x32xf32>
    %cst_76 = arith.constant 9.99999974E-6 : f32
    %175 = vector.broadcast %cst_76 : f32 to vector<16x1xf32>
    %176 = arith.addf %172, %175 : vector<16x1xf32>
    %177 = math.rsqrt %176 : vector<16x1xf32>
    %178 = vector.broadcast %177 : vector<16x1xf32> to vector<16x32xf32>
    %179 = arith.mulf %174, %178 : vector<16x32xf32>
    %180 = vector.broadcast %160 : vector<1x32xf32> to vector<16x32xf32>
    %181 = arith.mulf %179, %180 : vector<16x32xf32>
    %182 = vector.broadcast %161 : vector<1x32xf32> to vector<16x32xf32>
    %183 = arith.addf %181, %182 : vector<16x32xf32>
    %c536 = arith.constant 536 : index
    %c0_77 = arith.constant 0 : index
    %184 = vector.load %arg4[%c536, %c0_77] : memref<1192x64xf32, #tpu.memory_space<vmem>>, vector<64x32xf32>
    %c608 = arith.constant 608 : index
    %c0_78 = arith.constant 0 : index
    %185 = vector.load %arg4[%c608, %c0_78] : memref<1192x64xf32, #tpu.memory_space<vmem>>, vector<64x32xf32>
    %186 = vector.extract_strided_slice %184 {offsets = [0, 0], sizes = [32, 32], strides = [1, 1]} : vector<64x32xf32> to vector<32x32xf32>
    %cst_79 = arith.constant dense<0.000000e+00> : vector<16x32xf32>
    %187 = tpu.matmul %183, %186, %cst_79 {dimension_numbers = #tpu.dot_dimension_numbers<[1], [0], [0], [1], [0, 0, 1, 1], [], []>} : vector<16x32xf32>, vector<32x32xf32>, vector<16x32xf32> -> vector<16x32xf32>
    %188 = vector.extract_strided_slice %184 {offsets = [32, 0], sizes = [32, 32], strides = [1, 1]} : vector<64x32xf32> to vector<32x32xf32>
    %cst_80 = arith.constant dense<0.000000e+00> : vector<16x32xf32>
    %189 = tpu.matmul %122, %188, %cst_80 {dimension_numbers = #tpu.dot_dimension_numbers<[1], [0], [0], [1], [0, 0, 1, 1], [], []>} : vector<16x32xf32>, vector<32x32xf32>, vector<16x32xf32> -> vector<16x32xf32>
    %190 = arith.addf %187, %189 : vector<16x32xf32>
    %c600 = arith.constant 600 : index
    %c0_81 = arith.constant 0 : index
    %191 = vector.load %arg4[%c600, %c0_81] : memref<1192x64xf32, #tpu.memory_space<vmem>>, vector<1x32xf32>
    %192 = vector.broadcast %191 : vector<1x32xf32> to vector<16x32xf32>
    %193 = arith.addf %190, %192 : vector<16x32xf32>
    %194 = vector.extract_strided_slice %185 {offsets = [0, 0], sizes = [32, 32], strides = [1, 1]} : vector<64x32xf32> to vector<32x32xf32>
    %cst_82 = arith.constant dense<0.000000e+00> : vector<16x32xf32>
    %195 = tpu.matmul %183, %194, %cst_82 {dimension_numbers = #tpu.dot_dimension_numbers<[1], [0], [0], [1], [0, 0, 1, 1], [], []>} : vector<16x32xf32>, vector<32x32xf32>, vector<16x32xf32> -> vector<16x32xf32>
    %196 = vector.extract_strided_slice %185 {offsets = [32, 0], sizes = [32, 32], strides = [1, 1]} : vector<64x32xf32> to vector<32x32xf32>
    %cst_83 = arith.constant dense<0.000000e+00> : vector<16x32xf32>
    %197 = tpu.matmul %122, %196, %cst_83 {dimension_numbers = #tpu.dot_dimension_numbers<[1], [0], [0], [1], [0, 0, 1, 1], [], []>} : vector<16x32xf32>, vector<32x32xf32>, vector<16x32xf32> -> vector<16x32xf32>
    %198 = arith.addf %195, %197 : vector<16x32xf32>
    %c672 = arith.constant 672 : index
    %c0_84 = arith.constant 0 : index
    %199 = vector.load %arg4[%c672, %c0_84] : memref<1192x64xf32, #tpu.memory_space<vmem>>, vector<1x32xf32>
    %200 = vector.broadcast %199 : vector<1x32xf32> to vector<16x32xf32>
    %201 = arith.addf %198, %200 : vector<16x32xf32>
    %c720 = arith.constant 720 : index
    %c0_85 = arith.constant 0 : index
    %202 = vector.load %arg4[%c720, %c0_85] : memref<1192x64xf32, #tpu.memory_space<vmem>>, vector<32x32xf32>
    %cst_86 = arith.constant dense<0.000000e+00> : vector<16x32xf32>
    %203 = tpu.matmul %183, %202, %cst_86 {dimension_numbers = #tpu.dot_dimension_numbers<[1], [0], [0], [1], [0, 0, 1, 1], [], []>} : vector<16x32xf32>, vector<32x32xf32>, vector<16x32xf32> -> vector<16x32xf32>
    %c752 = arith.constant 752 : index
    %c0_87 = arith.constant 0 : index
    %204 = vector.load %arg4[%c752, %c0_87] : memref<1192x64xf32, #tpu.memory_space<vmem>>, vector<1x32xf32>
    %205 = vector.broadcast %204 : vector<1x32xf32> to vector<16x32xf32>
    %206 = arith.addf %203, %205 : vector<16x32xf32>
    %c760 = arith.constant 760 : index
    %c0_88 = arith.constant 0 : index
    %207 = vector.load %arg4[%c760, %c0_88] : memref<1192x64xf32, #tpu.memory_space<vmem>>, vector<32x32xf32>
    %cst_89 = arith.constant dense<0.000000e+00> : vector<16x32xf32>
    %208 = tpu.matmul %122, %207, %cst_89 {dimension_numbers = #tpu.dot_dimension_numbers<[1], [0], [0], [1], [0, 0, 1, 1], [], []>} : vector<16x32xf32>, vector<32x32xf32>, vector<16x32xf32> -> vector<16x32xf32>
    %c792 = arith.constant 792 : index
    %c0_90 = arith.constant 0 : index
    %209 = vector.load %arg4[%c792, %c0_90] : memref<1192x64xf32, #tpu.memory_space<vmem>>, vector<1x32xf32>
    %210 = vector.broadcast %209 : vector<1x32xf32> to vector<16x32xf32>
    %211 = arith.addf %208, %210 : vector<16x32xf32>
    %c680 = arith.constant 680 : index
    %c0_91 = arith.constant 0 : index
    %212 = vector.load %arg4[%c680, %c0_91] : memref<1192x64xf32, #tpu.memory_space<vmem>>, vector<32x32xf32>
    %cst_92 = arith.constant dense<0.000000e+00> : vector<256x32xf32>
    %213 = tpu.matmul %15, %212, %cst_92 {dimension_numbers = #tpu.dot_dimension_numbers<[1], [0], [0], [1], [0, 0, 1, 1], [], []>} : vector<256x32xf32>, vector<32x32xf32>, vector<256x32xf32> -> vector<256x32xf32>
    %c712 = arith.constant 712 : index
    %c0_93 = arith.constant 0 : index
    %214 = vector.load %arg4[%c712, %c0_93] : memref<1192x64xf32, #tpu.memory_space<vmem>>, vector<1x32xf32>
    %215 = vector.broadcast %214 : vector<1x32xf32> to vector<256x32xf32>
    %216 = arith.addf %213, %215 : vector<256x32xf32>
    %217 = vector.shape_cast %216 : vector<256x32xf32> to vector<16x16x32xf32>
    %218 = vector.shape_cast %193 : vector<16x32xf32> to vector<16x1x32xf32>
    %219 = vector.shape_cast %201 : vector<16x32xf32> to vector<1x16x32xf32>
    %220 = vector.broadcast %218 : vector<16x1x32xf32> to vector<16x16x32xf32>
    %221 = vector.broadcast %219 : vector<1x16x32xf32> to vector<16x16x32xf32>
    %222 = arith.mulf %220, %221 : vector<16x16x32xf32>
    %223 = arith.mulf %222, %217 : vector<16x16x32xf32>
    %c800 = arith.constant 800 : index
    %c0_94 = arith.constant 0 : index
    %224 = vector.load %arg4[%c800, %c0_94] : memref<1192x64xf32, #tpu.memory_space<vmem>>, vector<32x32xf32>
    %c840 = arith.constant 840 : index
    %c0_95 = arith.constant 0 : index
    %225 = vector.load %arg4[%c840, %c0_95] : memref<1192x64xf32, #tpu.memory_space<vmem>>, vector<32x32xf32>
    %cst_96 = arith.constant 0.000000e+00 : f32
    %226 = vector.broadcast %cst_96 : f32 to vector<16x32xf32>
    %c832 = arith.constant 832 : index
    %c0_97 = arith.constant 0 : index
    %227 = vector.load %arg4[%c832, %c0_97] : memref<1192x64xf32, #tpu.memory_space<vmem>>, vector<1x32xf32>
    %228 = vector.broadcast %227 : vector<1x32xf32> to vector<16x32xf32>
    %229 = arith.addf %226, %228 : vector<16x32xf32>
    %cst_98 = arith.constant 0.000000e+00 : f32
    %230 = vector.broadcast %cst_98 : f32 to vector<16x32xf32>
    %c872 = arith.constant 872 : index
    %c0_99 = arith.constant 0 : index
    %231 = vector.load %arg4[%c872, %c0_99] : memref<1192x64xf32, #tpu.memory_space<vmem>>, vector<1x32xf32>
    %232 = vector.broadcast %231 : vector<1x32xf32> to vector<16x32xf32>
    %233 = arith.addf %230, %232 : vector<16x32xf32>
    %234 = vector.extract_strided_slice %223 {offsets = [0, 0, 0], sizes = [16, 16, 16], strides = [1, 1, 1]} : vector<16x16x32xf32> to vector<16x16x16xf32>
    %cst_100 = arith.constant dense<0.000000e+00> : vector<16x16xf32>
    %235 = vector.multi_reduction <add>, %234, %cst_100 [2] : vector<16x16x16xf32> to vector<16x16xf32>
    %cst_101 = arith.constant -5.000000e+00 : f32
    %cst_102 = arith.constant 5.000000e+00 : f32
    %236 = vector.broadcast %cst_101 : f32 to vector<16x16xf32>
    %237 = arith.maximumf %236, %235 : vector<16x16xf32>
    %238 = vector.broadcast %cst_102 : f32 to vector<16x16xf32>
    %239 = arith.minimumf %238, %237 : vector<16x16xf32>
    %240 = math.exp %239 : vector<16x16xf32>
    %241 = arith.mulf %240, %0 : vector<16x16xf32>
    %cst_103 = arith.constant dense<0.000000e+00> : vector<16xf32>
    %242 = vector.multi_reduction <add>, %241, %cst_103 [1] : vector<16x16xf32> to vector<16xf32>
    %243 = vector.shape_cast %242 : vector<16xf32> to vector<16x1xf32>
    %cst_104 = arith.constant 9.99999997E-7 : f32
    %244 = vector.broadcast %cst_104 : f32 to vector<16x1xf32>
    %245 = arith.addf %243, %244 : vector<16x1xf32>
    %246 = tpu.reciprocal %245 {approx = true} : vector<16x1xf32> -> vector<16x1xf32>
    %247 = vector.extract_strided_slice %206 {offsets = [0, 0], sizes = [16, 16], strides = [1, 1]} : vector<16x32xf32> to vector<16x16xf32>
    %cst_105 = arith.constant dense<0.000000e+00> : vector<16x16xf32>
    %248 = tpu.matmul %241, %247, %cst_105 {dimension_numbers = #tpu.dot_dimension_numbers<[1], [0], [0], [1], [0, 0, 1, 1], [], []>} : vector<16x16xf32>, vector<16x16xf32>, vector<16x16xf32> -> vector<16x16xf32>
    %249 = vector.broadcast %246 : vector<16x1xf32> to vector<16x16xf32>
    %250 = arith.mulf %248, %249 : vector<16x16xf32>
    %251 = vector.extract_strided_slice %224 {offsets = [0, 0], sizes = [16, 32], strides = [1, 1]} : vector<32x32xf32> to vector<16x32xf32>
    %cst_106 = arith.constant dense<0.000000e+00> : vector<16x32xf32>
    %252 = tpu.matmul %250, %251, %cst_106 {dimension_numbers = #tpu.dot_dimension_numbers<[1], [0], [0], [1], [0, 0, 1, 1], [], []>} : vector<16x16xf32>, vector<16x32xf32>, vector<16x32xf32> -> vector<16x32xf32>
    %253 = arith.addf %229, %252 : vector<16x32xf32>
    %254 = vector.extract_strided_slice %211 {offsets = [0, 0], sizes = [16, 16], strides = [1, 1]} : vector<16x32xf32> to vector<16x16xf32>
    %cst_107 = arith.constant dense<0.000000e+00> : vector<16x16xf32>
    %255 = tpu.matmul %241, %254, %cst_107 {dimension_numbers = #tpu.dot_dimension_numbers<[1], [0], [0], [1], [0, 0, 1, 1], [], []>} : vector<16x16xf32>, vector<16x16xf32>, vector<16x16xf32> -> vector<16x16xf32>
    %256 = vector.broadcast %246 : vector<16x1xf32> to vector<16x16xf32>
    %257 = arith.mulf %255, %256 : vector<16x16xf32>
    %258 = vector.extract_strided_slice %225 {offsets = [0, 0], sizes = [16, 32], strides = [1, 1]} : vector<32x32xf32> to vector<16x32xf32>
    %cst_108 = arith.constant dense<0.000000e+00> : vector<16x32xf32>
    %259 = tpu.matmul %257, %258, %cst_108 {dimension_numbers = #tpu.dot_dimension_numbers<[1], [0], [0], [1], [0, 0, 1, 1], [], []>} : vector<16x16xf32>, vector<16x32xf32>, vector<16x32xf32> -> vector<16x32xf32>
    %260 = arith.addf %233, %259 : vector<16x32xf32>
    %261 = vector.extract_strided_slice %223 {offsets = [0, 0, 16], sizes = [16, 16, 16], strides = [1, 1, 1]} : vector<16x16x32xf32> to vector<16x16x16xf32>
    %cst_109 = arith.constant dense<0.000000e+00> : vector<16x16xf32>
    %262 = vector.multi_reduction <add>, %261, %cst_109 [2] : vector<16x16x16xf32> to vector<16x16xf32>
    %cst_110 = arith.constant -5.000000e+00 : f32
    %cst_111 = arith.constant 5.000000e+00 : f32
    %263 = vector.broadcast %cst_110 : f32 to vector<16x16xf32>
    %264 = arith.maximumf %263, %262 : vector<16x16xf32>
    %265 = vector.broadcast %cst_111 : f32 to vector<16x16xf32>
    %266 = arith.minimumf %265, %264 : vector<16x16xf32>
    %267 = math.exp %266 : vector<16x16xf32>
    %268 = arith.mulf %267, %0 : vector<16x16xf32>
    %cst_112 = arith.constant dense<0.000000e+00> : vector<16xf32>
    %269 = vector.multi_reduction <add>, %268, %cst_112 [1] : vector<16x16xf32> to vector<16xf32>
    %270 = vector.shape_cast %269 : vector<16xf32> to vector<16x1xf32>
    %cst_113 = arith.constant 9.99999997E-7 : f32
    %271 = vector.broadcast %cst_113 : f32 to vector<16x1xf32>
    %272 = arith.addf %270, %271 : vector<16x1xf32>
    %273 = tpu.reciprocal %272 {approx = true} : vector<16x1xf32> -> vector<16x1xf32>
    %274 = vector.extract_strided_slice %206 {offsets = [0, 16], sizes = [16, 16], strides = [1, 1]} : vector<16x32xf32> to vector<16x16xf32>
    %cst_114 = arith.constant dense<0.000000e+00> : vector<16x16xf32>
    %275 = tpu.matmul %268, %274, %cst_114 {dimension_numbers = #tpu.dot_dimension_numbers<[1], [0], [0], [1], [0, 0, 1, 1], [], []>} : vector<16x16xf32>, vector<16x16xf32>, vector<16x16xf32> -> vector<16x16xf32>
    %276 = vector.broadcast %273 : vector<16x1xf32> to vector<16x16xf32>
    %277 = arith.mulf %275, %276 : vector<16x16xf32>
    %278 = vector.extract_strided_slice %224 {offsets = [16, 0], sizes = [16, 32], strides = [1, 1]} : vector<32x32xf32> to vector<16x32xf32>
    %cst_115 = arith.constant dense<0.000000e+00> : vector<16x32xf32>
    %279 = tpu.matmul %277, %278, %cst_115 {dimension_numbers = #tpu.dot_dimension_numbers<[1], [0], [0], [1], [0, 0, 1, 1], [], []>} : vector<16x16xf32>, vector<16x32xf32>, vector<16x32xf32> -> vector<16x32xf32>
    %280 = arith.addf %253, %279 : vector<16x32xf32>
    %281 = vector.extract_strided_slice %211 {offsets = [0, 16], sizes = [16, 16], strides = [1, 1]} : vector<16x32xf32> to vector<16x16xf32>
    %cst_116 = arith.constant dense<0.000000e+00> : vector<16x16xf32>
    %282 = tpu.matmul %268, %281, %cst_116 {dimension_numbers = #tpu.dot_dimension_numbers<[1], [0], [0], [1], [0, 0, 1, 1], [], []>} : vector<16x16xf32>, vector<16x16xf32>, vector<16x16xf32> -> vector<16x16xf32>
    %283 = vector.broadcast %273 : vector<16x1xf32> to vector<16x16xf32>
    %284 = arith.mulf %282, %283 : vector<16x16xf32>
    %285 = vector.extract_strided_slice %225 {offsets = [16, 0], sizes = [16, 32], strides = [1, 1]} : vector<32x32xf32> to vector<16x32xf32>
    %cst_117 = arith.constant dense<0.000000e+00> : vector<16x32xf32>
    %286 = tpu.matmul %284, %285, %cst_117 {dimension_numbers = #tpu.dot_dimension_numbers<[1], [0], [0], [1], [0, 0, 1, 1], [], []>} : vector<16x16xf32>, vector<16x32xf32>, vector<16x32xf32> -> vector<16x32xf32>
    %287 = arith.addf %260, %286 : vector<16x32xf32>
    %288 = math.tanh %287 : vector<16x32xf32>
    %289 = arith.addf %183, %280 : vector<16x32xf32>
    %290 = arith.addf %122, %288 : vector<16x32xf32>
    %c880 = arith.constant 880 : index
    %c0_118 = arith.constant 0 : index
    %291 = vector.load %arg4[%c880, %c0_118] : memref<1192x64xf32, #tpu.memory_space<vmem>>, vector<1x32xf32>
    %c888 = arith.constant 888 : index
    %c0_119 = arith.constant 0 : index
    %292 = vector.load %arg4[%c888, %c0_119] : memref<1192x64xf32, #tpu.memory_space<vmem>>, vector<1x32xf32>
    %cst_120 = arith.constant dense<0.000000e+00> : vector<16xf32>
    %293 = vector.multi_reduction <add>, %289, %cst_120 [1] : vector<16x32xf32> to vector<16xf32>
    %294 = vector.shape_cast %293 : vector<16xf32> to vector<16x1xf32>
    %cst_121 = arith.constant 3.200000e+01 : f32
    %295 = vector.broadcast %cst_121 : f32 to vector<16x1xf32>
    %296 = arith.divf %294, %295 : vector<16x1xf32>
    %297 = vector.broadcast %296 : vector<16x1xf32> to vector<16x32xf32>
    %298 = arith.subf %289, %297 : vector<16x32xf32>
    %299 = arith.mulf %298, %298 : vector<16x32xf32>
    %cst_122 = arith.constant dense<0.000000e+00> : vector<16xf32>
    %300 = vector.multi_reduction <add>, %299, %cst_122 [1] : vector<16x32xf32> to vector<16xf32>
    %301 = vector.shape_cast %300 : vector<16xf32> to vector<16x1xf32>
    %cst_123 = arith.constant 3.200000e+01 : f32
    %302 = vector.broadcast %cst_123 : f32 to vector<16x1xf32>
    %303 = arith.divf %301, %302 : vector<16x1xf32>
    %304 = vector.broadcast %296 : vector<16x1xf32> to vector<16x32xf32>
    %305 = arith.subf %289, %304 : vector<16x32xf32>
    %cst_124 = arith.constant 9.99999974E-6 : f32
    %306 = vector.broadcast %cst_124 : f32 to vector<16x1xf32>
    %307 = arith.addf %303, %306 : vector<16x1xf32>
    %308 = math.rsqrt %307 : vector<16x1xf32>
    %309 = vector.broadcast %308 : vector<16x1xf32> to vector<16x32xf32>
    %310 = arith.mulf %305, %309 : vector<16x32xf32>
    %311 = vector.broadcast %291 : vector<1x32xf32> to vector<16x32xf32>
    %312 = arith.mulf %310, %311 : vector<16x32xf32>
    %313 = vector.broadcast %292 : vector<1x32xf32> to vector<16x32xf32>
    %314 = arith.addf %312, %313 : vector<16x32xf32>
    %c896 = arith.constant 896 : index
    %c0_125 = arith.constant 0 : index
    %315 = vector.load %arg4[%c896, %c0_125] : memref<1192x64xf32, #tpu.memory_space<vmem>>, vector<32x64xf32>
    %cst_126 = arith.constant dense<0.000000e+00> : vector<16x64xf32>
    %316 = tpu.matmul %314, %315, %cst_126 {dimension_numbers = #tpu.dot_dimension_numbers<[1], [0], [0], [1], [0, 0, 1, 1], [], []>} : vector<16x32xf32>, vector<32x64xf32>, vector<16x64xf32> -> vector<16x64xf32>
    %c928 = arith.constant 928 : index
    %c0_127 = arith.constant 0 : index
    %317 = vector.load %arg4[%c928, %c0_127] : memref<1192x64xf32, #tpu.memory_space<vmem>>, vector<1x64xf32>
    %318 = vector.broadcast %317 : vector<1x64xf32> to vector<16x64xf32>
    %319 = arith.addf %316, %318 : vector<16x64xf32>
    %cst_128 = arith.constant 0.000000e+00 : f32
    %320 = vector.broadcast %cst_128 : f32 to vector<16x64xf32>
    %321 = arith.maximumf %319, %320 : vector<16x64xf32>
    %c936 = arith.constant 936 : index
    %c0_129 = arith.constant 0 : index
    %322 = vector.load %arg4[%c936, %c0_129] : memref<1192x64xf32, #tpu.memory_space<vmem>>, vector<64x32xf32>
    %cst_130 = arith.constant dense<0.000000e+00> : vector<16x32xf32>
    %323 = tpu.matmul %321, %322, %cst_130 {dimension_numbers = #tpu.dot_dimension_numbers<[1], [0], [0], [1], [0, 0, 1, 1], [], []>} : vector<16x64xf32>, vector<64x32xf32>, vector<16x32xf32> -> vector<16x32xf32>
    %c1000 = arith.constant 1000 : index
    %c0_131 = arith.constant 0 : index
    %324 = vector.load %arg4[%c1000, %c0_131] : memref<1192x64xf32, #tpu.memory_space<vmem>>, vector<1x32xf32>
    %325 = vector.broadcast %324 : vector<1x32xf32> to vector<16x32xf32>
    %326 = arith.addf %323, %325 : vector<16x32xf32>
    %327 = arith.addf %314, %326 : vector<16x32xf32>
    %c1008 = arith.constant 1008 : index
    %c0_132 = arith.constant 0 : index
    %328 = vector.load %arg4[%c1008, %c0_132] : memref<1192x64xf32, #tpu.memory_space<vmem>>, vector<1x32xf32>
    %c1016 = arith.constant 1016 : index
    %c0_133 = arith.constant 0 : index
    %329 = vector.load %arg4[%c1016, %c0_133] : memref<1192x64xf32, #tpu.memory_space<vmem>>, vector<1x32xf32>
    %cst_134 = arith.constant dense<0.000000e+00> : vector<16xf32>
    %330 = vector.multi_reduction <add>, %327, %cst_134 [1] : vector<16x32xf32> to vector<16xf32>
    %331 = vector.shape_cast %330 : vector<16xf32> to vector<16x1xf32>
    %cst_135 = arith.constant 3.200000e+01 : f32
    %332 = vector.broadcast %cst_135 : f32 to vector<16x1xf32>
    %333 = arith.divf %331, %332 : vector<16x1xf32>
    %334 = vector.broadcast %333 : vector<16x1xf32> to vector<16x32xf32>
    %335 = arith.subf %327, %334 : vector<16x32xf32>
    %336 = arith.mulf %335, %335 : vector<16x32xf32>
    %cst_136 = arith.constant dense<0.000000e+00> : vector<16xf32>
    %337 = vector.multi_reduction <add>, %336, %cst_136 [1] : vector<16x32xf32> to vector<16xf32>
    %338 = vector.shape_cast %337 : vector<16xf32> to vector<16x1xf32>
    %cst_137 = arith.constant 3.200000e+01 : f32
    %339 = vector.broadcast %cst_137 : f32 to vector<16x1xf32>
    %340 = arith.divf %338, %339 : vector<16x1xf32>
    %341 = vector.broadcast %333 : vector<16x1xf32> to vector<16x32xf32>
    %342 = arith.subf %327, %341 : vector<16x32xf32>
    %cst_138 = arith.constant 9.99999974E-6 : f32
    %343 = vector.broadcast %cst_138 : f32 to vector<16x1xf32>
    %344 = arith.addf %340, %343 : vector<16x1xf32>
    %345 = math.rsqrt %344 : vector<16x1xf32>
    %346 = vector.broadcast %345 : vector<16x1xf32> to vector<16x32xf32>
    %347 = arith.mulf %342, %346 : vector<16x32xf32>
    %348 = vector.broadcast %328 : vector<1x32xf32> to vector<16x32xf32>
    %349 = arith.mulf %347, %348 : vector<16x32xf32>
    %350 = vector.broadcast %329 : vector<1x32xf32> to vector<16x32xf32>
    %351 = arith.addf %349, %350 : vector<16x32xf32>
    %c1024 = arith.constant 1024 : index
    %c0_139 = arith.constant 0 : index
    %352 = vector.load %arg4[%c1024, %c0_139] : memref<1192x64xf32, #tpu.memory_space<vmem>>, vector<32x8xf32>
    %cst_140 = arith.constant dense<0.000000e+00> : vector<16x8xf32>
    %353 = tpu.matmul %290, %352, %cst_140 {dimension_numbers = #tpu.dot_dimension_numbers<[1], [0], [0], [1], [0, 0, 1, 1], [], []>} : vector<16x32xf32>, vector<32x8xf32>, vector<16x8xf32> -> vector<16x8xf32>
    %c1056 = arith.constant 1056 : index
    %c0_141 = arith.constant 0 : index
    %354 = vector.load %arg4[%c1056, %c0_141] : memref<1192x64xf32, #tpu.memory_space<vmem>>, vector<1x8xf32>
    %355 = vector.broadcast %354 : vector<1x8xf32> to vector<16x8xf32>
    %356 = arith.addf %353, %355 : vector<16x8xf32>
    %cst_142 = arith.constant dense<0.000000e+00> : vector<8xf32>
    %357 = vector.multi_reduction <add>, %356, %cst_142 [0] : vector<16x8xf32> to vector<8xf32>
    %358 = vector.shape_cast %357 : vector<8xf32> to vector<1x8xf32>
    %cst_143 = arith.constant 1.600000e+01 : f32
    %359 = vector.broadcast %cst_143 : f32 to vector<1x8xf32>
    %360 = arith.divf %358, %359 : vector<1x8xf32>
    %361 = vector.broadcast %360 : vector<1x8xf32> to vector<16x8xf32>
    %362 = arith.subf %356, %361 : vector<16x8xf32>
    %363 = arith.mulf %362, %362 : vector<16x8xf32>
    %cst_144 = arith.constant dense<0.000000e+00> : vector<8xf32>
    %364 = vector.multi_reduction <add>, %363, %cst_144 [0] : vector<16x8xf32> to vector<8xf32>
    %365 = vector.shape_cast %364 : vector<8xf32> to vector<1x8xf32>
    %cst_145 = arith.constant 9.99999997E-7 : f32
    %366 = vector.broadcast %cst_145 : f32 to vector<1x8xf32>
    %367 = arith.addf %365, %366 : vector<1x8xf32>
    %368 = math.rsqrt %367 : vector<1x8xf32>
    %369 = vector.broadcast %368 : vector<1x8xf32> to vector<16x8xf32>
    %370 = arith.mulf %362, %369 : vector<16x8xf32>
    %c1064 = arith.constant 1064 : index
    %c0_146 = arith.constant 0 : index
    %371 = vector.load %arg4[%c1064, %c0_146] : memref<1192x64xf32, #tpu.memory_space<vmem>>, vector<40x32xf32>
    %372 = vector.extract_strided_slice %371 {offsets = [0, 0], sizes = [32, 32], strides = [1, 1]} : vector<40x32xf32> to vector<32x32xf32>
    %cst_147 = arith.constant dense<0.000000e+00> : vector<16x32xf32>
    %373 = tpu.matmul %351, %372, %cst_147 {dimension_numbers = #tpu.dot_dimension_numbers<[1], [0], [0], [1], [0, 0, 1, 1], [], []>} : vector<16x32xf32>, vector<32x32xf32>, vector<16x32xf32> -> vector<16x32xf32>
    %374 = vector.extract_strided_slice %371 {offsets = [32, 0], sizes = [8, 32], strides = [1, 1]} : vector<40x32xf32> to vector<8x32xf32>
    %cst_148 = arith.constant dense<0.000000e+00> : vector<16x32xf32>
    %375 = tpu.matmul %370, %374, %cst_148 {dimension_numbers = #tpu.dot_dimension_numbers<[1], [0], [0], [1], [0, 0, 1, 1], [], []>} : vector<16x8xf32>, vector<8x32xf32>, vector<16x32xf32> -> vector<16x32xf32>
    %376 = arith.addf %373, %375 : vector<16x32xf32>
    %c1104 = arith.constant 1104 : index
    %c0_149 = arith.constant 0 : index
    %377 = vector.load %arg4[%c1104, %c0_149] : memref<1192x64xf32, #tpu.memory_space<vmem>>, vector<1x32xf32>
    %378 = vector.broadcast %377 : vector<1x32xf32> to vector<16x32xf32>
    %379 = arith.addf %376, %378 : vector<16x32xf32>
    %c1112 = arith.constant 1112 : index
    %c0_150 = arith.constant 0 : index
    %380 = vector.load %arg4[%c1112, %c0_150] : memref<1192x64xf32, #tpu.memory_space<vmem>>, vector<32x16xf32>
    %cst_151 = arith.constant dense<0.000000e+00> : vector<16x16xf32>
    %381 = tpu.matmul %351, %380, %cst_151 {dimension_numbers = #tpu.dot_dimension_numbers<[1], [0], [0], [1], [0, 0, 1, 1], [], []>} : vector<16x32xf32>, vector<32x16xf32>, vector<16x16xf32> -> vector<16x16xf32>
    %c1144 = arith.constant 1144 : index
    %c0_152 = arith.constant 0 : index
    %382 = vector.load %arg4[%c1144, %c0_152] : memref<1192x64xf32, #tpu.memory_space<vmem>>, vector<1x16xf32>
    %383 = vector.broadcast %382 : vector<1x16xf32> to vector<16x16xf32>
    %384 = arith.addf %381, %383 : vector<16x16xf32>
    %cst_153 = arith.constant 0.000000e+00 : f32
    %385 = vector.broadcast %cst_153 : f32 to vector<16x16xf32>
    %386 = arith.maximumf %384, %385 : vector<16x16xf32>
    %c1152 = arith.constant 1152 : index
    %c0_154 = arith.constant 0 : index
    %387 = vector.load %arg4[%c1152, %c0_154] : memref<1192x64xf32, #tpu.memory_space<vmem>>, vector<16x8xf32>
    %cst_155 = arith.constant dense<0.000000e+00> : vector<16x8xf32>
    %388 = tpu.matmul %386, %387, %cst_155 {dimension_numbers = #tpu.dot_dimension_numbers<[1], [0], [0], [1], [0, 0, 1, 1], [], []>} : vector<16x16xf32>, vector<16x8xf32>, vector<16x8xf32> -> vector<16x8xf32>
    %c1168 = arith.constant 1168 : index
    %c0_156 = arith.constant 0 : index
    %389 = vector.load %arg4[%c1168, %c0_156] : memref<1192x64xf32, #tpu.memory_space<vmem>>, vector<1x8xf32>
    %390 = vector.broadcast %389 : vector<1x8xf32> to vector<16x8xf32>
    %391 = arith.addf %388, %390 : vector<16x8xf32>
    %cst_157 = arith.constant 0.000000e+00 : f32
    %392 = vector.broadcast %cst_157 : f32 to vector<16x8xf32>
    %393 = arith.maximumf %391, %392 : vector<16x8xf32>
    %c1176 = arith.constant 1176 : index
    %c0_158 = arith.constant 0 : index
    %394 = vector.load %arg4[%c1176, %c0_158] : memref<1192x64xf32, #tpu.memory_space<vmem>>, vector<8x4xf32>
    %cst_159 = arith.constant dense<0.000000e+00> : vector<16x4xf32>
    %395 = tpu.matmul %393, %394, %cst_159 {dimension_numbers = #tpu.dot_dimension_numbers<[1], [0], [0], [1], [0, 0, 1, 1], [], []>} : vector<16x8xf32>, vector<8x4xf32>, vector<16x4xf32> -> vector<16x4xf32>
    %c1184 = arith.constant 1184 : index
    %c0_160 = arith.constant 0 : index
    %396 = vector.load %arg4[%c1184, %c0_160] : memref<1192x64xf32, #tpu.memory_space<vmem>>, vector<1x4xf32>
    %397 = vector.broadcast %396 : vector<1x4xf32> to vector<16x4xf32>
    %398 = arith.addf %395, %397 : vector<16x4xf32>
    %c0_161 = arith.constant 0 : index
    %c0_162 = arith.constant 0 : index
    %399 = vector.load %arg5[%c0_161, %c0_162] : memref<16x44xf32, #tpu.memory_space<vmem>>, vector<16x32xf32>
    tpu.vector_store %arg5[%c0_161, %c0_162], %379 {strides = array<i32>} : memref<16x44xf32, #tpu.memory_space<vmem>>, vector<16x32xf32>,
    %c0_163 = arith.constant 0 : index
    %c32_164 = arith.constant 32 : index
    %400 = vector.load %arg5[%c0_163, %c32_164] : memref<16x44xf32, #tpu.memory_space<vmem>>, vector<16x8xf32>
    tpu.vector_store %arg5[%c0_163, %c32_164], %370 {strides = array<i32>} : memref<16x44xf32, #tpu.memory_space<vmem>>, vector<16x8xf32>,
    %c0_165 = arith.constant 0 : index
    %c40_166 = arith.constant 40 : index
    %401 = vector.load %arg5[%c0_165, %c40_166] : memref<16x44xf32, #tpu.memory_space<vmem>>, vector<16x4xf32>
    tpu.vector_store %arg5[%c0_165, %c40_166], %398 {strides = array<i32>} : memref<16x44xf32, #tpu.memory_space<vmem>>, vector<16x4xf32>,
    return
  }
}

</mosaic_0001>

<bundles_post_ra>
// kernel: san_net_forward.1
= control target key start
LH: loop header
LB: loop body
LE: loop exit
PB: predicated region body
PF: predicated region fallthrough
CT: control target
= control target key end

     0   :  { %vm120_vm0 = vcmask 64512   ;;  %vm33_vm1 = vcmask 1041408   ;;  %vm26_vm2 = vcmask 80896   ;;  %vm337_vm3 = vcmask 1043456   ;;  %s9315_s7 = smov 112   ;;  %s9316_s30 = smov 32   ;;  %s11732_s4 = inlined_call_operand.vmem [shape: f32[1192,64], index: 4, kind: input, shape index: {}]   ;;  %s11733_s1 = inlined_call_operand.vmem [shape: f32[16,8], index: 1, kind: input, shape index: {}]   ;;  %s11734_s0 = inlined_call_operand.vmem [shape: f32[16,10], index: 0, kind: input, shape index: {}]   ;;  %s11735_s3 = inlined_call_operand.vmem [shape: f32[256,4], index: 3, kind: input, shape index: {}]   ;;  %s11736_s2 = inlined_call_operand.vmem [shape: f32[16,16], index: 2, kind: input, shape index: {}]   ;;  %s11737_s5 = inlined_call_operand.vmem [shape: f32[16,44], index: 5, kind: output, shape index: {}]  }
   0x1   :  { %v114_v0 = vld [vmem:[%s11732_s4 + $0x10] sm:$0xff]  ;;  %v112_v1 = vld [vmem:[%s11733_s1] sm:$0xff]  ;;  %v113_v2 = vld [vmem:[%s11733_s1 + $0x8] sm:$0xff]  ;;  %vm240_vm4 = vcmask 31744   ;;  %v11738_v45 = vlaneseq  ;;  %vm582_vm5 = vcmask 261120   ;;  %vm1671_vm6 = vcmask 130048  }
   0x2   :  { %8486 = vmatprep.subr.mxu1 %v114_v0  ;;  %8488 = vmatprep.mubr.msk.f32.mxu1 %vm120_vm0, %v112_v1  ;;  %v25_v3 = vld [vmem:[%s11732_s4 + $0x8] sm:$0x3]  ;;  %v24_v4 = vld [vmem:[%s11732_s4] sm:$0xff]  ;;  %v204_v10 = vld [vmem:[%s11735_s3 + $0x10] sm:$0xff]  ;;  %vm2277_vm7 = vcmask 130112   ;;  %vm2414_vm8 = vcmask 1041409  }
   0x3   :  { %v22_v5 = vld [vmem:[%s11734_s0] sm:$0xff]  ;;  %8487 = vmatpush3.msra.mxu1 %v114_v0  ;;  %8479 = vmatprep.subr.msk.mxu0 %vm33_vm1, %v25_v3  ;;  %v23_v7 = vld [vmem:[%s11734_s0 + $0x8] sm:$0xff]  ;;  %v205_v11 = vld [vmem:[%s11735_s3 + $0x18] sm:$0xff]  ;;  %v9522_v46 = vshrl.u32 %v11738_v45, 7  ;;  %vm2416_vm9 = vcmask 1042434   ;;  %vm2418_vm10 = vcmask 1043459  }
   0x4   :  { %v234_v6 = vld [vmem:[%s11732_s4 + $0x20] sm:$0xf]  ;;  %8489 = vmatmul.mubr.msk.f32.vlgmr.msra.gmra.mxu1 %vm120_vm0, %v113_v2  ;;  %8480 = vmatpush3.msk.msra.mxu0 %vm33_vm1, %v25_v3  ;;  %v203_v9 = vld [vmem:[%s11735_s3 + $0x8] sm:$0xff]  ;;  %v208_v16 = vld [vmem:[%s11735_s3 + $0x30] sm:$0xff]  ;;  %vm2420_vm11 = vcmask 1044484   ;;  %vm2422_vm12 = vcmask 1045509  }
   0x5   :  { %8481 = vmatprep.subr.mxu0 %v24_v4  ;;  %8483 = vmatprep.mubr.msk.f32.mxu0 %vm26_vm2, %v22_v5  ;;  %v202_v8 = vld [vmem:[%s11735_s3] sm:$0xff]  ;;  %v207_v13 = vld [vmem:[%s11735_s3 + $0x28] sm:$0xff]  ;;  %v209_v17 = vld [vmem:[%s11735_s3 + $0x38] sm:$0xff]  ;;  %11846 = vst [vmem:[#allocation2_spill] sm:$0xff] %v9522_v46  ;;  %v9530_v48 = vsub.s32 0, %v9522_v46  ;;  %v1911_v49 = vsub.s32 1, %v9522_v46 }
   0x6   :  { %8482 = vmatpush3.msra.mxu0 %v24_v4  ;;  %8491 = vmatprep.subr.msk.mxu1 %vm337_vm3, %v234_v6  ;;  %v206_v12 = vld [vmem:[%s11735_s3 + $0x20] sm:$0xff]  ;;  %v573_v14 = vld [vmem:[%s11732_s4 + $0x68] sm:$0xff]  ;;  %v212_v20 = vld [vmem:[%s11735_s3 + $0x50] sm:$0xff]  ;;  %v1922_v50 = vsub.s32 2, %v9522_v46  ;;  %v1933_v63 = vsub.s32 3, %v9522_v46  ;;  %vm2424_vm13 = vcmask 1046534  }
   0x7   :  { %8484 = vmatmul.mubr.msk.f32.vlgmr.msra.gmra.mxu0 %vm26_vm2, %v23_v7  ;;  %8492 = vmatpush3.msk.msra.mxu1 %vm337_vm3, %v234_v6  ;;  %v572_v15 = vld [vmem:[%s11732_s4 + $0x60] sm:$0xff]  ;;  %v211_v19 = vld [vmem:[%s11735_s3 + $0x48] sm:$0xff]  ;;  %v213_v21 = vld [vmem:[%s11735_s3 + $0x58] sm:$0xff]  ;;  %11847 = vst [vmem:[#allocation3_spill] sm:$0xff] %v9530_v48  ;;  %vm2426_vm14 = vcmask 1047559   ;;  %vm3945_vm15 = vcmask 523264  }
   0x8   :  { %8493 = vmatprep.mubr.msk.f32.mxu1 %vm240_vm4, %v202_v8  ;;  %8541 = vmatprep.subr.mxu0 %v573_v14  ;;  %v210_v18 = vld [vmem:[%s11735_s3 + $0x40] sm:$0xff]  ;;  %v215_v23 = vld [vmem:[%s11735_s3 + $0x68] sm:$0xff]  ;;  %v216_v24 = vld [vmem:[%s11735_s3 + $0x70] sm:$0xff]  ;;  %vm7814_vm1 = vcmask 326912   ;;  %s9317_s9 = smov 40   ;;  %vm7825_vm2 = vcmask 359744  }
   0x9   :  { %8494 = vmatmul.mubr.msk.f32.vlgmr.msra.gmra.mxu1 %vm240_vm4, %v203_v9  ;;  %8542 = vmatpush3.msra.mxu0 %v573_v14  ;;  %v214_v22 = vld [vmem:[%s11735_s3 + $0x60] sm:$0xff]  ;;  %v217_v25 = vld [vmem:[%s11735_s3 + $0x78] sm:$0xff]  ;;  %v219_v27 = vld [vmem:[%s11735_s3 + $0x88] sm:$0xff] }
   0xa   :  { %8496 = vmatprep.mubr.msk.f32.mxu1 %vm240_vm4, %v204_v10  ;;  %8543 = vmatprep.subr.mxu0 %v572_v15  ;;  %v218_v26 = vld [vmem:[%s11735_s3 + $0x80] sm:$0xff]  ;;  %v220_v28 = vld [vmem:[%s11735_s3 + $0x90] sm:$0xff]  ;;  %v221_v29 = vld [vmem:[%s11735_s3 + $0x98] sm:$0xff] }
   0xb   :  { %8544 = vmatpush3.msra.mxu0 %v572_v15  ;;  %v222_v30 = vld [vmem:[%s11735_s3 + $0xa0] sm:$0xff]  ;;  %v223_v31 = vld [vmem:[%s11735_s3 + $0xa8] sm:$0xff]  ;;  %v224_v32 = vld [vmem:[%s11735_s3 + $0xb0] sm:$0xff] }
   0xc   :  { %v225_v33 = vld [vmem:[%s11735_s3 + $0xb8] sm:$0xff]  ;;  %v226_v34 = vld [vmem:[%s11735_s3 + $0xc0] sm:$0xff]  ;;  %v227_v35 = vld [vmem:[%s11735_s3 + $0xc8] sm:$0xff] }
   0xd   :  { %8497 = vmatmul.mubr.msk.f32.gmra.mxu1 %vm240_vm4, %v205_v11  ;;  %v228_v36 = vld [vmem:[%s11735_s3 + $0xd0] sm:$0xff]  ;;  %v229_v37 = vld [vmem:[%s11735_s3 + $0xd8] sm:$0xff]  ;;  %v230_v38 = vld [vmem:[%s11735_s3 + $0xe0] sm:$0xff] }
   0xe   :  { %8499 = vmatprep.mubr.msk.f32.mxu1 %vm240_vm4, %v206_v12  ;;  %v231_v39 = vld [vmem:[%s11735_s3 + $0xe8] sm:$0xff]  ;;  %v232_v40 = vld [vmem:[%s11735_s3 + $0xf0] sm:$0xff]  ;;  %v233_v41 = vld [vmem:[%s11735_s3 + $0xf8] sm:$0xff] }
   0xf   :  { %v571_v42 = vld [vmem:[%s11732_s4 + $0x58] sm:$0xff]  ;;  %v570_v43 = vld [vmem:[%s11732_s4 + $0x50] sm:$0xff]  ;;  %v569_v44 = vld [vmem:[%s11732_s4 + $0x48] sm:$0xff] }
  0x10   :  { %8545 = vmatprep.subr.mxu0 %v571_v42  ;;  %v9527_v47 = vld [vmem:[%s11736_s2] sm:$0xff]  ;;  %v9541_v54 = vld [vmem:[%s11736_s2 + $0x8] sm:$0xff]  ;;  %v7835_v57 = vld [vmem:[%s11732_s4 + $0x18] ss:$0 sm:$0xff] }
  0x11   :  { %8500 = vmatmul.mubr.msk.f32.gmra.mxu1 %vm240_vm4, %v207_v13  ;;  %8546 = vmatpush3.msra.mxu0 %v571_v42  ;;  %v1901_v51 = vrot.slane %v9527_v47, %v9530_v48  ;;  %v1912_v52 = vrot.slane %v9527_v47, %v1911_v49  ;;  %v1923_v53 = vrot.slane %v9527_v47, %v1922_v50  ;;  %v568_v0 = vld [vmem:[%s11732_s4 + $0x40] sm:$0xff]  ;;  %v567_v3 = vld [vmem:[%s11732_s4 + $0x38] sm:$0xff]  ;;  %v566_v6 = vld [vmem:[%s11732_s4 + $0x30] sm:$0xff]  ;;  %v1944_v13 = vsub.s32 4, %v9522_v46 }
  0x12   :  { %8502 = vmatprep.mubr.msk.f32.mxu1 %vm240_vm4, %v208_v16  ;;  %8547 = vmatprep.subr.mxu0 %v570_v43  ;;  %v1989_v55 = vrot.slane %v9541_v54, %v9530_v48  ;;  %v2000_v62 = vrot.slane %v9541_v54, %v1911_v49  ;;  %v1934_v5 = vrot.slane %v9527_v47, %v1933_v63  ;;  %v581_v8 = vld [vmem:[%s11732_s4 + $0xb0] sm:$0xff]  ;;  %v580_v10 = vld [vmem:[%s11732_s4 + $0xa8] sm:$0xff]  ;;  %v579_v14 = vld [vmem:[%s11732_s4 + $0xa0] sm:$0xff] }
  0x13   :  { %8548 = vmatpush3.msra.mxu0 %v570_v43  ;;  %1907 = vbcast.lane.b32.xlu1 %v1901_v51, 264  ;;  %v2011_v12 = vrot.slane %v9541_v54, %v1922_v50  ;;  %v578_v16 = vld [vmem:[%s11732_s4 + $0x98] sm:$0xff]  ;;  %v993_v43 = vld [vmem:[%s11732_s4 + $0x110] sm:$0xff] }
  0x14   :  { %8552 = vmatprep.subr.mxu0 %v569_v44  ;;  %1903 = vbcast.lane.b32.xlu0 %v1901_v51, 256  ;;  %v1079_v51 = vld [vmem:[%s11732_s4 + $0xd0] sm:$0xff] }
  0x15   :  { %8503 = vmatmul.mubr.msk.f32.gmra.mxu1 %vm240_vm4, %v209_v17 }
  0x16   :  { %8505 = vmatprep.mubr.msk.f32.mxu1 %vm240_vm4, %v210_v18  ;;  %v1945_v18 = vrot.slane %v9527_v47, %v1944_v13 }
  0x17   :  { %1914 = vbcast.lane.b32.xlu1 %v1912_v52, 256 }
  0x18   :  { %1925 = vbcast.lane.b32.xlu0 %v1923_v53, 256 }
  0x19   :  { %8506 = vmatmul.mubr.msk.f32.gmra.mxu1 %vm240_vm4, %v211_v19  ;;  %v577_v19 = vld [vmem:[%s11732_s4 + $0x90] sm:$0xff] }
  0x1a   :  { %8508 = vmatprep.mubr.msk.f32.mxu1 %vm240_vm4, %v212_v20 }
  0x1b   :  { %1918 = vbcast.lane.b32.xlu1 %v1912_v52, 264  ;;  %v1078_v52 = vld [vmem:[%s11732_s4 + $0xc8] sm:$0xff] }
  0x1c   :  { %1991 = vbcast.lane.b32.xlu0 %v1989_v55, 256 }
  0x1d   :  { %8509 = vmatmul.mubr.msk.f32.gmra.mxu1 %vm240_vm4, %v213_v21  ;;  %v576_v21 = vld [vmem:[%s11732_s4 + $0x88] sm:$0xff] }
  0x1e   :  { %8511 = vmatprep.mubr.msk.f32.mxu1 %vm240_vm4, %v214_v22 }
  0x1f   :  { %1929 = vbcast.lane.b32.xlu1 %v1923_v53, 264 }
  0x20   :  { %2002 = vbcast.lane.b32.xlu0 %v2000_v62, 256 }
  0x21   :  { %8512 = vmatmul.mubr.msk.f32.gmra.mxu1 %vm240_vm4, %v215_v23  ;;  %v2022_v23 = vrot.slane %v9541_v54, %v1933_v63 }
  0x22   :  { %8514 = vmatprep.mubr.msk.f32.mxu1 %vm240_vm4, %v216_v24  ;;  %v1955_v24 = vsub.s32 5, %v9522_v46 }
  0x23   :  { %1995 = vbcast.lane.b32.xlu1 %v1989_v55, 264  ;;  %v1077_v55 = vld [vmem:[%s11732_s4 + $0xc0] sm:$0xff] }
  0x24   :  { %1936 = vbcast.lane.b32.xlu0 %v1934_v5, 256 }
  0x25   :  { %8515 = vmatmul.mubr.msk.f32.gmra.mxu1 %vm240_vm4, %v217_v25  ;;  %v575_v25 = vld [vmem:[%s11732_s4 + $0x80] sm:$0xff] }
  0x26   :  { %8517 = vmatprep.mubr.msk.f32.mxu1 %vm240_vm4, %v218_v26 }
  0x27   :  { %2006 = vbcast.lane.b32.xlu1 %v2000_v62, 264 }
  0x28   :  { %2013 = vbcast.lane.b32.xlu0 %v2011_v12, 256 }
  0x29   :  { %8518 = vmatmul.mubr.msk.f32.gmra.mxu1 %vm240_vm4, %v219_v27  ;;  %v574_v27 = vld [vmem:[%s11732_s4 + $0x78] sm:$0xff] }
  0x2a   :  { %8520 = vmatprep.mubr.msk.f32.mxu1 %vm240_vm4, %v220_v28 }
  0x2b   :  { %1940 = vbcast.lane.b32.xlu1 %v1934_v5, 264 }
  0x2c   :  { %1947 = vbcast.lane.b32.xlu0 %v1945_v18, 256 }
  0x2d   :  { %8521 = vmatmul.mubr.msk.f32.gmra.mxu1 %vm240_vm4, %v221_v29  ;;  %v1956_v29 = vrot.slane %v9527_v47, %v1955_v24 }
  0x2e   :  { %8523 = vmatprep.mubr.msk.f32.mxu1 %vm240_vm4, %v222_v30  ;;  %v912_v30 = vld [vmem:[%s11732_s4 + $0x100] sm:$0xff] }
  0x2f   :  { %2017 = vbcast.lane.b32.xlu1 %v2011_v12, 264  ;;  %v2033_v12 = vrot.slane %v9541_v54, %v1944_v13 }
  0x30   :  { %2024 = vbcast.lane.b32.xlu0 %v2022_v23, 256 }
  0x31   :  { %8524 = vmatmul.mubr.msk.f32.gmra.mxu1 %vm240_vm4, %v223_v31 }
  0x32   :  { %8526 = vmatprep.mubr.msk.f32.mxu1 %vm240_vm4, %v224_v32  ;;  %v911_v32 = vld [vmem:[%s11732_s4 + $0xf8] sm:$0xff] }
  0x33   :  { %1951 = vbcast.lane.b32.xlu1 %v1945_v18, 264 }
  0x34   :  { %1958 = vbcast.lane.b32.xlu0 %v1956_v29, 256 }
  0x35   :  { %8527 = vmatmul.mubr.msk.f32.gmra.mxu1 %vm240_vm4, %v225_v33 }
  0x36   :  { %8529 = vmatprep.mubr.msk.f32.mxu1 %vm240_vm4, %v226_v34  ;;  %v910_v34 = vld [vmem:[%s11732_s4 + $0xf0] sm:$0xff] }
  0x37   :  { %2028 = vbcast.lane.b32.xlu1 %v2022_v23, 264 }
  0x38   :  { %2035 = vbcast.lane.b32.xlu0 %v2033_v12, 256 }
  0x39   :  { %8530 = vmatmul.mubr.msk.f32.gmra.mxu1 %vm240_vm4, %v227_v35 }
  0x3a   :  { %8532 = vmatprep.mubr.msk.f32.mxu1 %vm240_vm4, %v228_v36  ;;  %v909_v36 = vld [vmem:[%s11732_s4 + $0xe8] sm:$0xff] }
  0x3b   :  { %1962 = vbcast.lane.b32.xlu1 %v1956_v29, 264 }
  0x3d   :  { %8533 = vmatmul.mubr.msk.f32.gmra.mxu1 %vm240_vm4, %v229_v37  ;;  %v996_v37 = vld [vmem:[%s11732_s4 + $0x128] sm:$0xff] }
  0x3e   :  { %8535 = vmatprep.mubr.msk.f32.mxu1 %vm240_vm4, %v230_v38 }
  0x3f   :  { %2039 = vbcast.lane.b32.xlu1 %v2033_v12, 264 }
  0x41   :  { %8536 = vmatmul.mubr.msk.f32.gmra.mxu1 %vm240_vm4, %v231_v39  ;;  %v995_v39 = vld [vmem:[%s11732_s4 + $0x120] sm:$0xff] }
  0x42   :  { %8538 = vmatprep.mubr.msk.f32.mxu1 %vm240_vm4, %v232_v40  ;;  %v994_v40 = vld [vmem:[%s11732_s4 + $0x118] sm:$0xff] }
  0x45   :  { %8539 = vmatmul.mubr.msk.f32.gmra.mxu1 %vm240_vm4, %v233_v41  ;;  %v9678_v41 = vld [vmem:[%s11732_s4 + $0x28] ss:$0 sm:$0xff] }
  0xc4   :  { %v8490_v56 = vpop.f32.mrf.mxu1 }
  0xc5   :  { %v9552_v61 = vadd.f32 %v8490_v56, %v7835_v57 }
  0xc6   :  { %v193_v58 = vpop.f32.mrf.mxu1 }
  0xc7   :  { %v9548_v59 = vadd.f32 %v7835_v57, %v193_v58  ;;  %v9550_v60 = vpop.f32.mrf.mxu0  ;;  %11850 = vst [vmem:[#allocation6_spill] sm:$0xff] %v9552_v61 }
  0xc8   :  { %11849 = vst [vmem:[#allocation5_spill] sm:$0xff] %v9550_v60 }
  0xc9   :  { %11848 = vst [vmem:[#allocation4_spill] sm:$0xff] %v9548_v59  ;;  %8549 = vmatprep.mubr.msk.f32.mxu0 %vm582_vm5, %v9548_v59  ;;  %v9561_v1 = vpop.f32.mrf.mxu0  ;;  %v9563_v2 = vpop.f32.mrf.mxu1 }
  0xca   :  { %11851 = vst [vmem:[#allocation7_spill] sm:$0xff] %v9561_v1  ;;  %8550 = vmatmul.mubr.msk.f32.vlgmr.msra.gmra.mxu0 %vm582_vm5, %v9552_v61  ;;  %v9711_v57 = vadd.f32 %v9563_v2, %v9678_v41 }
  0xcb   :  { %8553 = vmatpush3.msra.mxu0 %v569_v44  ;;  %8560 = vmatprep.mubr.msk.f32.mxu0 %vm582_vm5, %v9561_v1  ;;  %v9572_v4 = vpop.f32.mrf.mxu1  ;;  %v1080_v44 = vld [vmem:[%s11732_s4 + $0xd8] sm:$0xff] }
  0xcc   :  { %8554 = vmatprep.subr.mxu0 %v568_v0  ;;  %v9688_v49 = vadd.f32 %v9678_v41, %v9572_v4  ;;  %11854 = vst [vmem:[#allocation10_spill] sm:$0xff] %v9711_v57 }
  0xcd   :  { %8555 = vmatpush3.msra.mxu0 %v568_v0  ;;  %v9578_v7 = vpop.f32.mrf.mxu1 }
  0xce   :  { %8556 = vmatprep.subr.mxu0 %v567_v3  ;;  %11852 = vst [vmem:[#allocation8_spill] sm:$0xff] %v9688_v49  ;;  %v9723_v63 = vadd.f32 %v9578_v7, %v9678_v41 }
  0xcf   :  { %8557 = vmatpush3.msra.mxu0 %v567_v3  ;;  %v9583_v9 = vpop.f32.mrf.mxu1 }
  0xd0   :  { %8558 = vmatprep.subr.mxu0 %v566_v6  ;;  %v9707_v56 = vadd.f32 %v9678_v41, %v9583_v9  ;;  %11856 = vst [vmem:[#allocation12_spill] sm:$0xff] %v9723_v63 }
  0xd1   :  { %8559 = vmatpush3.msra.mxu0 %v566_v6  ;;  %v9588_v11 = vpop.f32.mrf.mxu1 }
  0xd2   :  { %8561 = vmatmul.mubr.msk.f32.vlgmr.msra.gmra.mxu0 %vm582_vm5, %v9550_v60  ;;  %8563 = vmatprep.subr.mxu0 %v581_v8  ;;  %11853 = vst [vmem:[#allocation9_spill] sm:$0xff] %v9707_v56  ;;  %v9727_v2 = vadd.f32 %v9588_v11, %v9678_v41 }
  0xd3   :  { %8564 = vmatpush3.msra.mxu0 %v581_v8  ;;  %8571 = vmatprep.mubr.msk.f32.mxu0 %vm582_vm5, %v9548_v59  ;;  %v9599_v15 = vpop.f32.mrf.mxu1 }
  0xd4   :  { %8565 = vmatprep.subr.mxu0 %v580_v10  ;;  %v9719_v62 = vadd.f32 %v9678_v41, %v9599_v15  ;;  %11857 = vst [vmem:[#allocation13_spill] sm:$0xff] %v9727_v2 }
  0xd5   :  { %8566 = vmatpush3.msra.mxu0 %v580_v10  ;;  %v9604_v17 = vpop.f32.mrf.mxu1 }
  0xd6   :  { %8567 = vmatprep.subr.mxu0 %v579_v14  ;;  %11855 = vst [vmem:[#allocation11_spill] sm:$0xff] %v9719_v62  ;;  %v9739_v5 = vadd.f32 %v9604_v17, %v9678_v41 }
  0xd7   :  { %8568 = vmatpush3.msra.mxu0 %v579_v14  ;;  %v9612_v20 = vpop.f32.mrf.mxu1 }
  0xd8   :  { %8569 = vmatprep.subr.mxu0 %v578_v16  ;;  %v9735_v3 = vadd.f32 %v9678_v41, %v9612_v20  ;;  %11859 = vst [vmem:[#allocation15_spill] sm:$0xff] %v9739_v5 }
  0xd9   :  { %8570 = vmatpush3.msra.mxu0 %v578_v16  ;;  %v9617_v22 = vpop.f32.mrf.mxu1  ;;  %v1966_v16 = vsub.s32 6, %v9522_v46 }
  0xda   :  { %8572 = vmatmul.mubr.msk.f32.vlgmr.msra.gmra.mxu0 %vm582_vm5, %v9552_v61  ;;  %8574 = vmatprep.subr.mxu0 %v577_v19  ;;  %11858 = vst [vmem:[#allocation14_spill] sm:$0xff] %v9735_v3  ;;  %v9751_v8 = vadd.f32 %v9617_v22, %v9678_v41 }
  0xdb   :  { %8575 = vmatpush3.msra.mxu0 %v577_v19  ;;  %8582 = vmatprep.mubr.msk.f32.mxu0 %vm582_vm5, %v9561_v1  ;;  %v9628_v26 = vpop.f32.mrf.mxu1  ;;  %v1967_v13 = vrot.slane %v9527_v47, %v1966_v16 }
  0xdc   :  { %8576 = vmatprep.subr.mxu0 %v576_v21  ;;  %v9747_v6 = vadd.f32 %v9678_v41, %v9628_v26  ;;  %11861 = vst [vmem:[#allocation17_spill] sm:$0xff] %v9751_v8 }
  0xdd   :  { %8577 = vmatpush3.msra.mxu0 %v576_v21  ;;  %v9633_v28 = vpop.f32.mrf.mxu1  ;;  %1973 = vbcast.lane.b32.xlu1 %v1967_v13, 264  ;;  %v2044_v21 = vrot.slane %v9541_v54, %v1955_v24 }
  0xde   :  { %8578 = vmatprep.subr.mxu0 %v575_v25  ;;  %11860 = vst [vmem:[#allocation16_spill] sm:$0xff] %v9747_v6  ;;  %v9763_v11 = vadd.f32 %v9633_v28, %v9678_v41  ;;  %1969 = vbcast.lane.b32.xlu0 %v1967_v13, 256 }
  0xdf   :  { %8579 = vmatpush3.msra.mxu0 %v575_v25  ;;  %v9641_v31 = vpop.f32.mrf.mxu1  ;;  %v1977_v25 = vsub.s32 7, %v9522_v46 }
  0xe0   :  { %8580 = vmatprep.subr.mxu0 %v574_v27  ;;  %v9759_v9 = vadd.f32 %v9678_v41, %v9641_v31  ;;  %11863 = vst [vmem:[#allocation19_spill] sm:$0xff] %v9763_v11  ;;  %v2055_v31 = vrot.slane %v9541_v54, %v1966_v16  ;;  %v7882_v16 = vld [vmem:[%s11732_s4 + $0x108] ss:$0 sm:$0xff] }
  0xe1   :  { %8581 = vmatpush3.msra.mxu0 %v574_v27  ;;  %v9646_v33 = vpop.f32.mrf.mxu1  ;;  %2050 = vbcast.lane.b32.xlu1 %v2044_v21, 264  ;;  %v1978_v27 = vrot.slane %v9527_v47, %v1977_v25  ;;  %v2066_v47 = vrot.slane %v9541_v54, %v1977_v25  ;;  %v9899_v25 = vld [vmem:[%s11732_s4 + $0x70] ss:$0 sm:$0xff] }
  0xe2   :  { %8583 = vmatmul.mubr.msk.f32.vlgmr.msra.gmra.mxu0 %vm582_vm5, %v9550_v60  ;;  %8585 = vmatprep.subr.mxu0 %v912_v30  ;;  %11862 = vst [vmem:[#allocation18_spill] sm:$0xff] %v9759_v9  ;;  %v9779_v17 = vadd.f32 %v9646_v33, %v9678_v41 }
  0xe3   :  { %8586 = vmatpush3.msra.mxu0 %v912_v30  ;;  %8593 = vmatprep.mubr.msk.f32.mxu0 %vm582_vm5, %v9561_v1  ;;  %v9655_v35 = vpop.f32.mrf.mxu1 }
  0xe4   :  { %8587 = vmatprep.subr.mxu0 %v911_v32  ;;  %v9774_v14 = vadd.f32 %v9678_v41, %v9655_v35  ;;  %11865 = vst [vmem:[#allocation21_spill] sm:$0xff] %v9779_v17  ;;  %2046 = vbcast.lane.b32.xlu0 %v2044_v21, 256 }
  0xe5   :  { %8588 = vmatpush3.msra.mxu0 %v911_v32  ;;  %v9663_v38 = vpop.f32.mrf.mxu1  ;;  %1984 = vbcast.lane.b32.xlu1 %v1978_v27, 264 }
  0xe6   :  { %8589 = vmatprep.subr.mxu0 %v910_v34  ;;  %11864 = vst [vmem:[#allocation20_spill] sm:$0xff] %v9774_v14  ;;  %v9791_v20 = vadd.f32 %v9663_v38, %v9678_v41 }
  0xe7   :  { %8590 = vmatpush3.msra.mxu0 %v910_v34  ;;  %v477_v42 = vpop.f32.mrf.mxu1 }
  0xe8   :  { %8591 = vmatprep.subr.mxu0 %v909_v36  ;;  %v9787_v18 = vadd.f32 %v9678_v41, %v477_v42  ;;  %11867 = vst [vmem:[#allocation23_spill] sm:$0xff] %v9791_v20  ;;  %1980 = vbcast.lane.b32.xlu0 %v1978_v27, 256 }
  0xe9   :  { %8592 = vmatpush3.msra.mxu0 %v909_v36  ;;  %v9690_v50 = vpop.f32.mrf.mxu1  ;;  %2061 = vbcast.lane.b32.xlu1 %v2055_v31, 264 }
  0xea   :  { %8594 = vmatmul.mubr.msk.f32.vlgmr.msra.gmra.mxu0 %vm582_vm5, %v9550_v60  ;;  %8596 = vmatprep.subr.mxu0 %v996_v37  ;;  %11866 = vst [vmem:[#allocation22_spill] sm:$0xff] %v9787_v18  ;;  %v9806_v26 = vadd.f32 %v9690_v50, %v9678_v41 }
  0xeb   :  { %8597 = vmatpush3.msra.mxu0 %v996_v37  ;;  %8604 = vmatprep.mubr.msk.f32.mxu0 %vm582_vm5, %v9548_v59  ;;  %v487_v53 = vpop.f32.mrf.mxu1 }
  0xec   :  { %8598 = vmatprep.subr.mxu0 %v995_v39  ;;  %v9801_v22 = vadd.f32 %v9678_v41, %v487_v53  ;;  %11869 = vst [vmem:[#allocation25_spill] sm:$0xff] %v9806_v26  ;;  %2057 = vbcast.lane.b32.xlu0 %v2055_v31, 256 }
  0xed   :  { %8599 = vmatpush3.msra.mxu0 %v995_v39  ;;  %v8522_v58 = vpop.f32.mrf.mxu1  ;;  %2072 = vbcast.lane.b32.xlu1 %v2066_v47, 264 }
  0xee   :  { %8600 = vmatprep.subr.mxu0 %v994_v40  ;;  %11868 = vst [vmem:[#allocation24_spill] sm:$0xff] %v9801_v22  ;;  %v9817_v29 = vadd.f32 %v8522_v58, %v9678_v41 }
  0xef   :  { %8601 = vmatpush3.msra.mxu0 %v994_v40  ;;  %v497_v0 = vpop.f32.mrf.mxu1 }
  0xf0   :  { %8602 = vmatprep.subr.mxu0 %v993_v43  ;;  %v9813_v24 = vadd.f32 %v9678_v41, %v497_v0  ;;  %11871 = vst [vmem:[#allocation27_spill] sm:$0xff] %v9817_v29  ;;  %2068 = vbcast.lane.b32.xlu0 %v2066_v47, 256 }
  0xf1   :  { %8603 = vmatpush3.msra.mxu0 %v993_v43  ;;  %v8525_v4 = vpop.f32.mrf.mxu1 }
  0xf2   :  { %8605 = vmatmul.mubr.msk.f32.vlgmr.msra.gmra.mxu0 %vm582_vm5, %v9552_v61  ;;  %8607 = vmatprep.subr.mxu0 %v1080_v44  ;;  %11870 = vst [vmem:[#allocation26_spill] sm:$0xff] %v9813_v24  ;;  %v9829_v33 = vadd.f32 %v8525_v4, %v9678_v41 }
  0xf3   :  { %8608 = vmatpush3.msra.mxu0 %v1080_v44  ;;  %8615 = vmatprep.mubr.msk.f32.mxu0 %vm582_vm5, %v9688_v49  ;;  %v507_v7 = vpop.f32.mrf.mxu1 }
  0xf4   :  { %8609 = vmatprep.subr.mxu0 %v1079_v51  ;;  %v9824_v30 = vadd.f32 %v9678_v41, %v507_v7  ;;  %11873 = vst [vmem:[#allocation29_spill] sm:$0xff] %v9829_v33 }
  0xf5   :  { %8610 = vmatpush3.msra.mxu0 %v1079_v51  ;;  %v8528_v10 = vpop.f32.mrf.mxu1 }
  0xf6   :  { %8611 = vmatprep.subr.mxu0 %v1078_v52  ;;  %11872 = vst [vmem:[#allocation28_spill] sm:$0xff] %v9824_v30  ;;  %v9839_v36 = vadd.f32 %v8528_v10, %v9678_v41 }
  0xf7   :  { %8612 = vmatpush3.msra.mxu0 %v1078_v52  ;;  %v517_v15 = vpop.f32.mrf.mxu1 }
  0xf8   :  { %8613 = vmatprep.subr.mxu0 %v1077_v55  ;;  %v9836_v34 = vadd.f32 %v9678_v41, %v517_v15  ;;  %11875 = vst [vmem:[#allocation31_spill] sm:$0xff] %v9839_v36 }
  0xf9   :  { %8614 = vmatpush3.msra.mxu0 %v1077_v55  ;;  %v8531_v19 = vpop.f32.mrf.mxu1 }
  0xfa   :  { %8616 = vmatmul.mubr.msk.f32.vlgmr.msra.gmra.mxu0 %vm582_vm5, %v9711_v57  ;;  %11874 = vst [vmem:[#allocation30_spill] sm:$0xff] %v9836_v34  ;;  %v9849_v38 = vadd.f32 %v8531_v19, %v9678_v41 }
  0xfb   :  { %8618 = vmatprep.mubr.msk.f32.mxu0 %vm582_vm5, %v9707_v56  ;;  %v527_v23 = vpop.f32.mrf.mxu1 }
  0xfc   :  { %v9846_v54 = vadd.f32 %v9678_v41, %v527_v23  ;;  %11877 = vst [vmem:[#allocation33_spill] sm:$0xff] %v9849_v38 }
  0xfd   :  { %v8534_v28 = vpop.f32.mrf.mxu1 }
  0xfe   :  { %8619 = vmatmul.mubr.msk.f32.gmra.mxu0 %vm582_vm5, %v9723_v63  ;;  %11876 = vst [vmem:[#allocation32_spill] sm:$0xff] %v9846_v54  ;;  %v9859_v42 = vadd.f32 %v8534_v28, %v9678_v41 }
  0xff   :  { %8621 = vmatprep.mubr.msk.f32.mxu0 %vm582_vm5, %v9719_v62  ;;  %v537_v32 = vpop.f32.mrf.mxu1 }
 0x100   :  { %v9856_v39 = vadd.f32 %v9678_v41, %v537_v32  ;;  %11879 = vst [vmem:[#allocation35_spill] sm:$0xff] %v9859_v42 }
 0x101   :  { %v8537_v35 = vpop.f32.mrf.mxu1 }
 0x102   :  { %8622 = vmatmul.mubr.msk.f32.gmra.mxu0 %vm582_vm5, %v9727_v2  ;;  %11878 = vst [vmem:[#allocation34_spill] sm:$0xff] %v9856_v39  ;;  %v9869_v50 = vadd.f32 %v8537_v35, %v9678_v41 }
 0x103   :  { %8624 = vmatprep.mubr.msk.f32.mxu0 %vm582_vm5, %v9735_v3  ;;  %v547_v37 = vpop.f32.mrf.mxu1 }
 0x104   :  { %v9866_v43 = vadd.f32 %v9678_v41, %v547_v37  ;;  %11881 = vst [vmem:[#allocation37_spill] sm:$0xff] %v9869_v50 }
 0x105   :  { %v8540_v40 = vpop.f32.mrf.mxu1 }
 0x106   :  { %8625 = vmatmul.mubr.msk.f32.gmra.mxu0 %vm582_vm5, %v9739_v5  ;;  %11880 = vst [vmem:[#allocation36_spill] sm:$0xff] %v9866_v43  ;;  %v9879_v52 = vadd.f32 %v8540_v40, %v9678_v41  ;;  %v7881_v40 = vld [vmem:[%s11732_s4 + $0xb8] ss:$0 sm:$0xff] }
 0x107   :  { %8627 = vmatprep.mubr.msk.f32.mxu0 %vm582_vm5, %v9747_v6  ;;  %v557_v44 = vpop.f32.mrf.mxu1 }
 0x108   :  { %v9876_v51 = vadd.f32 %v9678_v41, %v557_v44  ;;  %11883 = vst [vmem:[#allocation39_spill] sm:$0xff] %v9879_v52  ;;  %v9313_v41 = vmov 1966171168   ;;  %v7885_v44 = vld [vmem:[%s11732_s4 + $0x130] ss:$0 sm:$0xff] }
 0x109   :  { %v1411_v12 = vunpack.c.l.s4 %v9313_v41 }
 0x10a   :  { %8628 = vmatmul.mubr.msk.f32.gmra.mxu0 %vm582_vm5, %v9751_v8  ;;  %11882 = vst [vmem:[#allocation38_spill] sm:$0xff] %v9876_v51 }
 0x10b   :  { %8630 = vmatprep.mubr.msk.f32.mxu0 %vm582_vm5, %v9759_v9  ;;  %v1412_v21 = vunpack.c.0.s8 %v1411_v12 }
 0x10d   :  { %v9907_v32 = vsub.s32 %v1412_v21, %v9522_v46 }
 0x10e   :  { %8631 = vmatmul.mubr.msk.f32.gmra.mxu0 %vm582_vm5, %v9763_v11 }
 0x10f   :  { %8633 = vmatprep.mubr.msk.f32.mxu0 %vm582_vm5, %v9774_v14  ;;  %11886 = vst [vmem:[#allocation42_spill] sm:$0xff] %v9907_v32  ;;  %v10090_v14 = vpop.permute.xlu1 %1907 }
 0x112   :  { %8634 = vmatmul.mubr.msk.f32.gmra.mxu0 %vm582_vm5, %v9779_v17 }
 0x113   :  { %8636 = vmatprep.mubr.msk.f32.mxu0 %vm582_vm5, %v9787_v18 }
 0x116   :  { %8637 = vmatmul.mubr.msk.f32.gmra.mxu0 %vm582_vm5, %v9791_v20  ;;  %v9314_v20 = vmov 0  }
 0x117   :  { %8639 = vmatprep.mubr.msk.f32.mxu0 %vm582_vm5, %v9801_v22  ;;  %9012 = vset.pattern.permute.xlu1 %v9314_v20 }
 0x118   :  { %9013 = vset.pattern.permute.xlu0 %v9314_v20 }
 0x11a   :  { %8640 = vmatmul.mubr.msk.f32.gmra.mxu0 %vm582_vm5, %v9806_v26 }
 0x11b   :  { %8642 = vmatprep.mubr.msk.f32.mxu0 %vm582_vm5, %v9813_v24 }
 0x11e   :  { %8643 = vmatmul.mubr.msk.f32.gmra.mxu0 %vm582_vm5, %v9817_v29 }
 0x11f   :  { %8645 = vmatprep.mubr.msk.f32.mxu0 %vm582_vm5, %v9824_v30 }
 0x122   :  { %8646 = vmatmul.mubr.msk.f32.gmra.mxu0 %vm582_vm5, %v9829_v33 }
 0x123   :  { %8648 = vmatprep.mubr.msk.f32.mxu0 %vm582_vm5, %v9836_v34 }
 0x126   :  { %8649 = vmatmul.mubr.msk.f32.gmra.mxu0 %vm582_vm5, %v9839_v36 }
 0x127   :  { %8651 = vmatprep.mubr.msk.f32.mxu0 %vm582_vm5, %v9846_v54 }
 0x12a   :  { %8652 = vmatmul.mubr.msk.f32.gmra.mxu0 %vm582_vm5, %v9849_v38 }
 0x12b   :  { %8654 = vmatprep.mubr.msk.f32.mxu0 %vm582_vm5, %v9856_v39 }
 0x12e   :  { %8655 = vmatmul.mubr.msk.f32.gmra.mxu0 %vm582_vm5, %v9859_v42 }
 0x12f   :  { %8657 = vmatprep.mubr.msk.f32.mxu0 %vm582_vm5, %v9866_v43 }
 0x132   :  { %8658 = vmatmul.mubr.msk.f32.gmra.mxu0 %vm582_vm5, %v9869_v50 }
 0x133   :  { %8660 = vmatprep.mubr.msk.f32.mxu0 %vm582_vm5, %v9876_v51 }
 0x136   :  { %8661 = vmatmul.mubr.msk.f32.gmra.mxu0 %vm582_vm5, %v9879_v52 }
 0x18a   :  { %v9887_v53 = vpop.f32.mrf.mxu0 }
 0x18c   :  { %v655_v55 = vpop.f32.mrf.mxu0 }
 0x192   :  { %v9889_v58 = vpop.f32.mrf.mxu0 }
 0x194   :  { %v736_v0 = vpop.f32.mrf.mxu0 }
 0x195   :  { %v737_v13 = vadd.f32 %v736_v0, %v655_v55 }
 0x197   :  { %v750_v28 = vadd.f32 %v9899_v25, %v737_v13 }
 0x199   :  { %v1416_v47 = vrot.slane %v750_v28, %v9907_v32 }
 0x19a   :  { %v8573_v4 = vpop.f32.mrf.mxu0 }
 0x19b   :  { %v1424_v0 = vcombine.high %v1416_v47, %v1416_v47  ;;  %v1432_v41 = vrot.slane %v1416_v47, %v9907_v32 }
 0x19c   :  { %v818_v7 = vpop.f32.mrf.mxu0 }
 0x19d   :  { %v1446_v21 = vrot.slane %v1424_v0, %v9907_v32  ;;  %v1454_v52 = vcombine.high %v1432_v41, %v1432_v41 }
 0x1a2   :  { %v8584_v10 = vpop.f32.mrf.mxu0 }
 0x1a3   :  { %v899_v37 = vadd.f32 %v8584_v10, %v8573_v4  ;;  %v9928_v4 = vld [vmem:[%s11732_s4 + $0xe0] ss:$0 sm:$0xff] }
 0x1a4   :  { %v893_v15 = vpop.f32.mrf.mxu0 }
 0x1a5   :  { %v894_v12 = vadd.f32 %v893_v15, %v818_v7  ;;  %v9923_v13 = vadd.f32 %v7881_v40, %v899_v37 }
 0x1a7   :  { %v9930_v10 = vadd.f32 %v7881_v40, %v894_v12  ;;  %v1514_v40 = vrot.slane %v1446_v21, %v9530_v48 }
 0x1a9   :  { %v1590_v50 = vmul.f32 %v1514_v40, %v9923_v13 }
 0x1aa   :  { %v8595_v19 = vpop.f32.mrf.mxu0 }
 0x1ab   :  { %v9894_v23 = vadd.f32 %v8595_v19, %v7882_v16  ;;  %v1510_v19 = vrot.slane %v1432_v41, %v9530_v48 }
 0x1ac   :  { %v984_v27 = vpop.f32.mrf.mxu0 }
 0x1ad   :  { %11884 = vst [vmem:[#allocation40_spill] sm:$0xff] %v9894_v23  ;;  %v9902_v31 = vadd.f32 %v7882_v16, %v984_v27  ;;  %8663 = vmatprep.subr.mxu1 %v9894_v23  ;;  %v1588_v7 = vmul.f32 %v1510_v19, %v9923_v13 }
 0x1ae   :  { %8664 = vmatpush3.msra.mxu1 %v9894_v23 }
 0x1af   :  { %11885 = vst [vmem:[#allocation41_spill] sm:$0xff] %v9902_v31  ;;  %8665 = vmatprep.subr.mxu1 %v9902_v31 }
 0x1b0   :  { %8666 = vmatpush3.msra.mxu1 %v9902_v31 }
 0x1b2   :  { %v9912_v35 = vpop.f32.mrf.mxu0 }
 0x1b3   :  { %11887 = vst [vmem:[#allocation43_spill] sm:$0xff] %v9912_v35 }
 0x1b4   :  { %v1068_v55 = vpop.f32.mrf.mxu0 }
 0x1b5   :  { %v9921_v16 = vadd.f32 %v7885_v44, %v1068_v55  ;;  %v1587_v44 = vmul.f32 %v1510_v19, %v9930_v10  ;;  %v1409_v55 = vcombine.high %v750_v28, %v750_v28  ;;  %v1589_v19 = vmul.f32 %v1514_v40, %v9930_v10 }
 0x1b7   :  { %11888 = vst [vmem:[#allocation44_spill] sm:$0xff] %v9921_v16  ;;  %v1423_v28 = vrot.slane %v1409_v55, %v9907_v32 }
 0x1ba   :  { %v8617_v27 = vpop.f32.mrf.mxu0 }
 0x1bb   :  { %v1254_v45 = vadd.f32 %v8617_v27, %v9928_v4 }
 0x1bc   :  { %v1248_v15 = vpop.f32.mrf.mxu0 }
 0x1bd   :  { %v1249_v47 = vadd.f32 %v9928_v4, %v1248_v15  ;;  %v9937_v37 = vmul.f32 %v1588_v7, %v1254_v45  ;;  %v1518_v15 = vrot.slane %v1454_v52, %v9530_v48 }
 0x1be   :  { %v8620_v12 = vpop.f32.mrf.mxu0 }
 0x1bf   :  { %v1264_v0 = vadd.f32 %v8620_v12, %v9928_v4  ;;  %v1675_v27 = vsel %vm1671_vm6, %v9937_v37, 0.0  ;;  %v9944_v51 = vmul.f32 %v1587_v44, %v1249_v47  ;;  %v1456_v12 = vcombine.high %v1446_v21, %v1446_v21 }
 0x1c0   :  { %v1258_v43 = vpop.f32.mrf.mxu0  ;;  %1676 = vadd.xlane.f32.xlu0 %v1675_v27  ;;  %v1591_v40 = vmul.f32 %v1518_v15, %v9930_v10  ;;  %v1592_v52 = vmul.f32 %v1518_v15, %v9923_v13  ;;  %v1425_v21 = vcombine.high %v1423_v28, %v1423_v28 }
 0x1c1   :  { %v1259_v45 = vadd.f32 %v9928_v4, %v1258_v43  ;;  %v9948_v7 = vmul.f32 %v1590_v50, %v1264_v0  ;;  %v1672_v47 = vsel %vm1671_vm6, %v9944_v51, 0.0  ;;  %v1522_v0 = vrot.slane %v1456_v12, %v9530_v48 }
 0x1c2   :  { %v8623_v41 = vpop.f32.mrf.mxu0 }
 0x1c3   :  { %v1274_v42 = vadd.f32 %v8623_v41, %v9928_v4  ;;  %v1681_v44 = vsel %vm1671_vm6, %v9948_v7, 0.0  ;;  %v9958_v27 = vmul.f32 %v1589_v19, %v1259_v45  ;;  %v1439_v41 = vrot.slane %v1423_v28, %v9907_v32 }
 0x1c4   :  { %v1268_v43 = vpop.f32.mrf.mxu0  ;;  %1673 = vadd.xlane.f32.xlu0 %v1672_v47  ;;  %1682 = vadd.xlane.f32.xlu1 %v1681_v44  ;;  %v1593_v12 = vmul.f32 %v1522_v0, %v9930_v10  ;;  %v1594_v28 = vmul.f32 %v1522_v0, %v9923_v13 }
 0x1c5   :  { %v1269_v50 = vadd.f32 %v9928_v4, %v1268_v43  ;;  %v1678_v45 = vsel %vm1671_vm6, %v9958_v27, 0.0  ;;  %v9970_v47 = vmul.f32 %v1592_v52, %v1274_v42  ;;  %v1453_v42 = vrot.slane %v1425_v21, %v9907_v32 }
 0x1c6   :  { %v8626_v55 = vpop.f32.mrf.mxu0 }
 0x1c7   :  { %v1284_v39 = vadd.f32 %v8626_v55, %v9928_v4  ;;  %v9968_v19 = vmul.f32 %v1591_v40, %v1269_v50  ;;  %v742_v55 = vadd.f32 %v9889_v58, %v9887_v53  ;;  %v1526_v50 = vrot.slane %v1439_v41, %v9530_v48 }
 0x1c8   :  { %v1278_v44 = vpop.f32.mrf.mxu0  ;;  %1679 = vadd.xlane.f32.xlu1 %v1678_v45  ;;  %v1687_v52 = vsel %vm1671_vm6, %v9970_v47, 0.0 }
 0x1c9   :  { %v1279_v43 = vadd.f32 %v9928_v4, %v1278_v44  ;;  %v1684_v15 = vsel %vm1671_vm6, %v9968_v19, 0.0  ;;  %v9986_v44 = vmul.f32 %v1594_v28, %v1284_v39  ;;  %v1595_v58 = vmul.f32 %v1526_v50, %v9930_v10 }
 0x1ca   :  { %v8629_v38 = vpop.f32.mrf.mxu0  ;;  %1685 = vadd.xlane.f32.xlu0 %v1684_v15  ;;  %v1596_v21 = vmul.f32 %v1526_v50, %v9923_v13  ;;  %v1455_v39 = vcombine.high %v1439_v41, %v1439_v41 }
 0x1cb   :  { %v1294_v40 = vadd.f32 %v8629_v38, %v9928_v4  ;;  %v9984_v45 = vmul.f32 %v1593_v12, %v1279_v43  ;;  %v9994_v38 = vadd.f32 %v9899_v25, %v742_v55  ;;  %v1530_v43 = vrot.slane %v1453_v42, %v9530_v48 }
 0x1cc   :  { %v1288_v54 = vpop.f32.mrf.mxu0  ;;  %1688 = vadd.xlane.f32.xlu1 %v1687_v52 }
 0x1cd   :  { %v1289_v0 = vadd.f32 %v9928_v4, %v1288_v54  ;;  %v1690_v53 = vsel %vm1671_vm6, %v9984_v45, 0.0  ;;  %v1693_v54 = vsel %vm1671_vm6, %v9986_v44, 0.0  ;;  %v10002_v52 = vmul.f32 %v1596_v21, %v1294_v40 }
 0x1ce   :  { %v8632_v15 = vpop.f32.mrf.mxu0  ;;  %1691 = vadd.xlane.f32.xlu0 %v1690_v53  ;;  %v1597_v55 = vmul.f32 %v1530_v43, %v9930_v10  ;;  %v1598_v41 = vmul.f32 %v1530_v43, %v9923_v13  ;;  %v1465_v53 = vrot.slane %v9994_v38, %v9907_v32  ;;  %v1457_v40 = vcombine.high %v1453_v42, %v1453_v42 }
 0x1cf   :  { %v1304_v12 = vadd.f32 %v8632_v15, %v9928_v4  ;;  %v10000_v28 = vmul.f32 %v1595_v58, %v1289_v0  ;;  %11890 = vst [vmem:[#allocation46_spill] sm:$0xff] %v10002_v52  ;;  %v1534_v0 = vrot.slane %v1455_v39, %v9530_v48 }
 0x1d0   :  { %v1298_v36 = vpop.f32.mrf.mxu0  ;;  %1694 = vadd.xlane.f32.xlu1 %v1693_v54  ;;  %v1473_v39 = vcombine.high %v1465_v53, %v1465_v53 }
 0x1d1   :  { %11889 = vst [vmem:[#allocation45_spill] sm:$0xff] %v10000_v28  ;;  %v1299_v50 = vadd.f32 %v9928_v4, %v1298_v36  ;;  %v1696_v25 = vsel %vm1671_vm6, %v10000_v28, 0.0  ;;  %v1699_v36 = vsel %vm1671_vm6, %v10002_v52, 0.0  ;;  %v10017_v54 = vmul.f32 %v1598_v41, %v1304_v12 }
 0x1d2   :  { %v8635_v15 = vpop.f32.mrf.mxu0  ;;  %1697 = vadd.xlane.f32.xlu0 %v1696_v25  ;;  %v1599_v25 = vmul.f32 %v1534_v0, %v9930_v10  ;;  %v1600_v42 = vmul.f32 %v1534_v0, %v9923_v13 }
 0x1d3   :  { %v1314_v58 = vadd.f32 %v8635_v15, %v9928_v4  ;;  %v10015_v21 = vmul.f32 %v1597_v55, %v1299_v50  ;;  %11892 = vst [vmem:[#allocation48_spill] sm:$0xff] %v10017_v54  ;;  %v1481_v15 = vrot.slane %v1465_v53, %v9907_v32  ;;  %v1538_v50 = vrot.slane %v1457_v40, %v9530_v48 }
 0x1d4   :  { %v1308_v34 = vpop.f32.mrf.mxu0  ;;  %1700 = vadd.xlane.f32.xlu1 %v1699_v36  ;;  %v1705_v55 = vsel %vm1671_vm6, %v10017_v54, 0.0 }
 0x1d5   :  { %11891 = vst [vmem:[#allocation47_spill] sm:$0xff] %v10015_v21  ;;  %v1309_v43 = vadd.f32 %v9928_v4, %v1308_v34  ;;  %v1702_v33 = vsel %vm1671_vm6, %v10015_v21, 0.0  ;;  %v10031_v41 = vmul.f32 %v1600_v42, %v1314_v58  ;;  %v1602_v40 = vmul.f32 %v1538_v50, %v9923_v13 }
 0x1d6   :  { %v8638_v30 = vpop.f32.mrf.mxu0  ;;  %1703 = vadd.xlane.f32.xlu0 %v1702_v33  ;;  %v1601_v33 = vmul.f32 %v1538_v50, %v9930_v10 }
 0x1d7   :  { %v1324_v12 = vadd.f32 %v8638_v30, %v9928_v4  ;;  %v10029_v34 = vmul.f32 %v1599_v25, %v1309_v43  ;;  %11894 = vst [vmem:[#allocation50_spill] sm:$0xff] %v10031_v41  ;;  %v1542_v30 = vrot.slane %v1481_v15, %v9530_v48  ;;  %v1495_v43 = vrot.slane %v1473_v39, %v9907_v32 }
 0x1d8   :  { %v1318_v36 = vpop.f32.mrf.mxu0  ;;  %1706 = vadd.xlane.f32.xlu1 %v1705_v55  ;;  %v1711_v25 = vsel %vm1671_vm6, %v10031_v41, 0.0 }
 0x1d9   :  { %11893 = vst [vmem:[#allocation49_spill] sm:$0xff] %v10029_v34  ;;  %v1319_v0 = vadd.f32 %v9928_v4, %v1318_v36  ;;  %v1708_v53 = vsel %vm1671_vm6, %v10029_v34, 0.0  ;;  %v10045_v55 = vmul.f32 %v1602_v40, %v1324_v12  ;;  %v1604_v39 = vmul.f32 %v1542_v30, %v9923_v13 }
 0x1da   :  { %v8641_v29 = vpop.f32.mrf.mxu0  ;;  %1709 = vadd.xlane.f32.xlu0 %v1708_v53  ;;  %v1603_v53 = vmul.f32 %v1542_v30, %v9930_v10  ;;  %v1503_v12 = vcombine.high %v1481_v15, %v1481_v15 }
 0x1db   :  { %v1334_v58 = vadd.f32 %v8641_v29, %v9928_v4  ;;  %v10043_v42 = vmul.f32 %v1601_v33, %v1319_v0  ;;  %11896 = vst [vmem:[#allocation52_spill] sm:$0xff] %v10045_v55  ;;  %v1458_v29 = vcombine.high %v9994_v38, %v9994_v38  ;;  %v1546_v0 = vrot.slane %v1495_v43, %v9530_v48 }
 0x1dc   :  { %v1328_v36 = vpop.f32.mrf.mxu0  ;;  %1712 = vadd.xlane.f32.xlu1 %v1711_v25  ;;  %v1717_v40 = vsel %vm1671_vm6, %v10045_v55, 0.0 }
 0x1dd   :  { %11895 = vst [vmem:[#allocation51_spill] sm:$0xff] %v10043_v42  ;;  %v1329_v24 = vadd.f32 %v9928_v4, %v1328_v36  ;;  %v1714_v50 = vsel %vm1671_vm6, %v10043_v42, 0.0  ;;  %v10060_v36 = vmul.f32 %v1604_v39, %v1334_v58  ;;  %v1606_v15 = vmul.f32 %v1546_v0, %v9923_v13 }
 0x1de   :  { %v8644_v26 = vpop.f32.mrf.mxu0  ;;  %1715 = vadd.xlane.f32.xlu0 %v1714_v50  ;;  %v1605_v50 = vmul.f32 %v1546_v0, %v9930_v10  ;;  %v1550_v58 = vrot.slane %v1503_v12, %v9530_v48 }
 0x1df   :  { %v1344_v33 = vadd.f32 %v8644_v26, %v9928_v4  ;;  %v10058_v25 = vmul.f32 %v1603_v53, %v1329_v24  ;;  %v1472_v26 = vrot.slane %v1458_v29, %v9907_v32  ;;  %v1505_v53 = vcombine.high %v1495_v43, %v1495_v43 }
 0x1e0   :  { %v1338_v22 = vpop.f32.mrf.mxu0  ;;  %1718 = vadd.xlane.f32.xlu1 %v1717_v40  ;;  %v1608_v43 = vmul.f32 %v1550_v58, %v9923_v13 }
 0x1e1   :  { %v1339_v30 = vadd.f32 %v9928_v4, %v1338_v22  ;;  %v1720_v38 = vsel %vm1671_vm6, %v10058_v25, 0.0  ;;  %v1723_v22 = vsel %vm1671_vm6, %v10060_v36, 0.0  ;;  %v10074_v18 = vmul.f32 %v1606_v15, %v1344_v33 }
 0x1e2   :  { %v8647_v24 = vpop.f32.mrf.mxu0  ;;  %1721 = vadd.xlane.f32.xlu0 %v1720_v38  ;;  %v1607_v38 = vmul.f32 %v1550_v58, %v9930_v10  ;;  %v1474_v12 = vcombine.high %v1472_v26, %v1472_v26  ;;  %v1554_v17 = vrot.slane %v1505_v53, %v9530_v48 }
 0x1e3   :  { %v1354_v39 = vadd.f32 %v8647_v24, %v9928_v4  ;;  %v10072_v40 = vmul.f32 %v1605_v50, %v1339_v30  ;;  %v1488_v30 = vrot.slane %v1472_v26, %v9907_v32  ;;  %v1729_v50 = vsel %vm1671_vm6, %v10074_v18, 0.0 }
 0x1e4   :  { %v1348_v0 = vpop.f32.mrf.mxu0  ;;  %1724 = vadd.xlane.f32.xlu1 %v1723_v22  ;;  %v1609_v26 = vmul.f32 %v1554_v17, %v9930_v10 }
 0x1e5   :  { %v1349_v20 = vadd.f32 %v9928_v4, %v1348_v0  ;;  %v1726_v29 = vsel %vm1671_vm6, %v10072_v40, 0.0  ;;  %v10088_v22 = vmul.f32 %v1608_v43, %v1354_v39  ;;  %v1502_v39 = vrot.slane %v1474_v12, %v9907_v32 }
 0x1e6   :  { %v8650_v24 = vpop.f32.mrf.mxu0  ;;  %1727 = vadd.xlane.f32.xlu0 %v1726_v29  ;;  %v1610_v29 = vmul.f32 %v1554_v17, %v9923_v13  ;;  %v1504_v8 = vcombine.high %v1488_v30, %v1488_v30 }
 0x1e7   :  { %v1364_v33 = vadd.f32 %v8650_v24, %v9928_v4  ;;  %v10086_v15 = vmul.f32 %v1607_v38, %v1349_v20  ;;  %v1558_v20 = vrot.slane %v1488_v30, %v9530_v48  ;;  %v1735_v43 = vsel %vm1671_vm6, %v10088_v22, 0.0 }
 0x1e8   :  { %v1358_v0 = vpop.f32.mrf.mxu0  ;;  %1730 = vadd.xlane.f32.xlu1 %v1729_v50  ;;  %v1506_v6 = vcombine.high %v1502_v39, %v1502_v39 }
 0x1e9   :  { %v1359_v58 = vadd.f32 %v9928_v4, %v1358_v0  ;;  %v1732_v53 = vsel %vm1671_vm6, %v10086_v15, 0.0  ;;  %v10104_v0 = vmul.f32 %v1610_v29, %v1364_v33  ;;  %v1612_v12 = vmul.f32 %v1558_v20, %v9923_v13 }
 0x1ea   :  { %v8653_v24 = vpop.f32.mrf.mxu0  ;;  %1733 = vadd.xlane.f32.xlu0 %v1732_v53  ;;  %v1611_v53 = vmul.f32 %v1558_v20, %v9930_v10  ;;  %v10121_v20 = vpop.permute.xlu0 %1903 }
 0x1eb   :  { %v1374_v38 = vadd.f32 %v8653_v24, %v9928_v4  ;;  %v10102_v50 = vmul.f32 %v1609_v26, %v1359_v58  ;;  %11898 = vst [vmem:[#allocation54_spill] sm:$0xff] %v10104_v0  ;;  %v1562_v24 = vrot.slane %v1502_v39, %v9530_v48  ;;  %v10112_v58 = vpop.permute.xlu1 %1914  ;;  %v1741_v26 = vsel %vm1671_vm6, %v10104_v0, 0.0 }
 0x1ec   :  { %v1368_v11 = vpop.f32.mrf.mxu0  ;;  %1736 = vadd.xlane.f32.xlu1 %v1735_v43 }
 0x1ed   :  { %11897 = vst [vmem:[#allocation53_spill] sm:$0xff] %v10102_v50  ;;  %v1369_v9 = vadd.f32 %v9928_v4, %v1368_v11  ;;  %v1738_v17 = vsel %vm1671_vm6, %v10102_v50, 0.0  ;;  %v10119_v29 = vmul.f32 %v1612_v12, %v1374_v38  ;;  %v1613_v5 = vmul.f32 %v1562_v24, %v9930_v10 }
 0x1ee   :  { %v8656_v32 = vpop.f32.mrf.mxu0  ;;  %1739 = vadd.xlane.f32.xlu0 %v1738_v17 }
 0x1ef   :  { %v1384_v33 = vadd.f32 %v8656_v32, %v9928_v4  ;;  %v10117_v11 = vmul.f32 %v1611_v53, %v1369_v9  ;;  %11900 = vst [vmem:[#allocation56_spill] sm:$0xff] %v10119_v29  ;;  %v1614_v32 = vmul.f32 %v1562_v24, %v9923_v13  ;;  %v1566_v9 = vrot.slane %v1504_v8, %v9530_v48  ;;  %v10137_v2 = vpop.permute.xlu1 %1918 }
 0x1f0   :  { %v1378_v43 = vpop.f32.mrf.mxu0  ;;  %1742 = vadd.xlane.f32.xlu1 %v1741_v26  ;;  %v1747_v39 = vsel %vm1671_vm6, %v10119_v29, 0.0 }
 0x1f1   :  { %11899 = vst [vmem:[#allocation55_spill] sm:$0xff] %v10117_v11  ;;  %v1379_v17 = vadd.f32 %v9928_v4, %v1378_v43  ;;  %v1744_v30 = vsel %vm1671_vm6, %v10117_v11, 0.0  ;;  %v10134_v12 = vmul.f32 %v1614_v32, %v1384_v33  ;;  %v1570_v43 = vrot.slane %v1506_v6, %v9530_v48  ;;  %v10145_v33 = vpop.permute.xlu0 %1925 }
 0x1f2   :  { %v8659_v3 = vpop.f32.mrf.mxu0  ;;  %1745 = vadd.xlane.f32.xlu0 %v1744_v30  ;;  %v1616_v30 = vmul.f32 %v1566_v9, %v9923_v13 }
 0x1f3   :  { %v1394_v38 = vadd.f32 %v8659_v3, %v9928_v4  ;;  %v10132_v53 = vmul.f32 %v1613_v5, %v1379_v17  ;;  %11902 = vst [vmem:[#allocation58_spill] sm:$0xff] %v10134_v12  ;;  %v1615_v3 = vmul.f32 %v1566_v9, %v9930_v10  ;;  %v1618_v5 = vmul.f32 %v1570_v43, %v9923_v13 }
 0x1f4   :  { %v1388_v26 = vpop.f32.mrf.mxu0  ;;  %1748 = vadd.xlane.f32.xlu1 %v1747_v39  ;;  %v1753_v6 = vsel %vm1671_vm6, %v10134_v12, 0.0  ;;  %v1617_v13 = vmul.f32 %v1570_v43, %v9930_v10 }
 0x1f5   :  { %11901 = vst [vmem:[#allocation57_spill] sm:$0xff] %v10132_v53  ;;  %v1389_v24 = vadd.f32 %v9928_v4, %v1388_v26  ;;  %v1750_v8 = vsel %vm1671_vm6, %v10132_v53, 0.0  ;;  %v10152_v39 = vmul.f32 %v1616_v30, %v1394_v38  ;;  %v10166_v38 = vpop.permute.xlu0 %1991 }
 0x1f6   :  { %v8662_v62 = vpop.f32.mrf.mxu0  ;;  %1751 = vadd.xlane.f32.xlu0 %v1750_v8 }
 0x1f7   :  { %v1404_v17 = vadd.f32 %v8662_v62, %v9928_v4  ;;  %v10150_v32 = vmul.f32 %v1615_v3, %v1389_v24  ;;  %11904 = vst [vmem:[#allocation60_spill] sm:$0xff] %v10152_v39  ;;  %v10160_v62 = vpop.permute.xlu1 %1929  ;;  %v1759_v24 = vsel %vm1671_vm6, %v10152_v39, 0.0 }
 0x1f8   :  { %v1398_v26 = vpop.f32.mrf.mxu0  ;;  %1754 = vadd.xlane.f32.xlu1 %v1753_v6 }
 0x1f9   :  { %11903 = vst [vmem:[#allocation59_spill] sm:$0xff] %v10150_v32  ;;  %v1399_v48 = vadd.f32 %v9928_v4, %v1398_v26  ;;  %v1756_v9 = vsel %vm1671_vm6, %v10150_v32, 0.0  ;;  %v10158_v8 = vmul.f32 %v1618_v5, %v1404_v17  ;;  %v10174_v30 = vpop.permute.xlu0 %2002 }
 0x1fa   :  { %1757 = vadd.xlane.f32.xlu0 %v1756_v9  ;;  %11907 = vst [vmem:[#allocation63_spill] sm:$0xff] %v10174_v30 }
 0x1fb   :  { %11905 = vst [vmem:[#allocation61_spill] sm:$0xff] %v10158_v8  ;;  %v10164_v3 = vmul.f32 %v1617_v13, %v1399_v48  ;;  %v1765_v10 = vsel %vm1671_vm6, %v10158_v8, 0.0  ;;  %v10172_v43 = vpop.permute.xlu1 %1995 }
 0x1fc   :  { %1760 = vadd.xlane.f32.xlu1 %v1759_v24 }
 0x1fd   :  { %11906 = vst [vmem:[#allocation62_spill] sm:$0xff] %v10164_v3  ;;  %v1762_v4 = vsel %vm1671_vm6, %v10164_v3, 0.0  ;;  %v10178_v17 = vpop.permute.xlu0 %1936 }
 0x1fe   :  { %1763 = vadd.xlane.f32.xlu0 %v1762_v4 }
 0x1ff   :  { %v10176_v5 = vpop.permute.xlu1 %2006 }
 0x200   :  { %1766 = vadd.xlane.f32.xlu1 %v1765_v10 }
 0x201   :  { %v10182_v6 = vpop.permute.xlu0 %2013 }
 0x202   :  { %11908 = vst [vmem:[#allocation64_spill] sm:$0xff] %v10182_v6 }
 0x203   :  { %v10180_v48 = vpop.permute.xlu1 %1940 }
 0x205   :  { %v10186_v9 = vpop.permute.xlu0 %1947 }
 0x207   :  { %v10184_v26 = vpop.permute.xlu1 %2017 }
 0x208   :  { %11909 = vst [vmem:[#allocation65_spill] sm:$0xff] %v10184_v26 }
 0x209   :  { %v10190_v24 = vpop.permute.xlu0 %2024 }
 0x20a   :  { %11910 = vst [vmem:[#allocation66_spill] sm:$0xff] %v10190_v24 }
 0x20b   :  { %v10188_v13 = vpop.permute.xlu1 %1951 }
 0x20d   :  { %v10194_v10 = vpop.permute.xlu0 %1958 }
 0x20f   :  { %v10192_v4 = vpop.permute.xlu1 %2028 }
 0x210   :  { %11911 = vst [vmem:[#allocation67_spill] sm:$0xff] %v10192_v4 }
 0x211   :  { %v10198_v56 = vpop.permute.xlu0 %2035 }
 0x212   :  { %11912 = vst [vmem:[#allocation68_spill] sm:$0xff] %v10198_v56 }
 0x213   :  { %v10196_v63 = vpop.permute.xlu1 %1962 }
 0x215   :  { %v10202_v49 = vpop.permute.xlu0 %1969 }
 0x216   :  { %11914 = vst [vmem:[#allocation70_spill] sm:$0xff] %v10202_v49 }
 0x217   :  { %v10200_v57 = vpop.permute.xlu1 %2039 }
 0x218   :  { %11913 = vst [vmem:[#allocation69_spill] sm:$0xff] %v10200_v57 }
 0x219   :  { %v10206_v59 = vpop.permute.xlu0 %2046 }
 0x21a   :  { %11916 = vst [vmem:[#allocation72_spill] sm:$0xff] %v10206_v59 }
 0x21b   :  { %v10204_v61 = vpop.permute.xlu1 %1973 }
 0x21c   :  { %11915 = vst [vmem:[#allocation71_spill] sm:$0xff] %v10204_v61 }
 0x21d   :  { %v10210_v60 = vpop.permute.xlu0 %1980 }
 0x21e   :  { %11918 = vst [vmem:[#allocation74_spill] sm:$0xff] %v10210_v60 }
 0x21f   :  { %v10208_v1 = vpop.permute.xlu1 %2050 }
 0x220   :  { %11917 = vst [vmem:[#allocation73_spill] sm:$0xff] %v10208_v1 }
 0x221   :  { %v10214_v23 = vpop.permute.xlu0 %2057 }
 0x222   :  { %11920 = vst [vmem:[#allocation76_spill] sm:$0xff] %v10214_v23 }
 0x223   :  { %v10212_v31 = vpop.permute.xlu1 %1984 }
 0x224   :  { %11919 = vst [vmem:[#allocation75_spill] sm:$0xff] %v10212_v31 }
 0x225   :  { %v10218_v8 = vpop.permute.xlu0 %2068 }
 0x226   :  { %11922 = vst [vmem:[#allocation78_spill] sm:$0xff] %v10218_v8 }
 0x227   :  { %v10216_v16 = vpop.permute.xlu1 %2061 }
 0x228   :  { %11921 = vst [vmem:[#allocation77_spill] sm:$0xff] %v10216_v16 }
 0x22b   :  { %v10220_v39 = vpop.permute.xlu1 %2072 }
 0x22c   :  { %11923 = vst [vmem:[#allocation79_spill] sm:$0xff] %v10220_v39 }
 0x249   :  { %v1677_v55 = vpop.xlane.xlu0 %1676 }
 0x24a   :  { %v7924_v12 = vclamps-f32 %v1677_v55, 5.0 }
 0x24c   :  { %v1834_v41 = vmul.f32 1.442695, %v7924_v12 }
 0x24d   :  { %v1674_v29 = vpop.xlane.xlu0 %1673  ;;  %v1683_v3 = vpop.xlane.xlu1 %1682 }
 0x24e   :  { %9014 = vpow2.f32 %v1834_v41  ;;  %v7923_v32 = vclamps-f32 %v1674_v29, 5.0  ;;  %v7926_v35 = vclamps-f32 %v1683_v3, 5.0 }
 0x250   :  { %v1832_v42 = vmul.f32 1.442695, %v7923_v32  ;;  %v1838_v53 = vmul.f32 1.442695, %v7926_v35 }
 0x251   :  { %v1680_v34 = vpop.xlane.xlu1 %1679 }
 0x252   :  { %9016 = vpow2.f32 %v1832_v42  ;;  %v7925_v11 = vclamps-f32 %v1680_v34, 5.0 }
 0x253   :  { %9018 = vpow2.f32 %v1838_v53  ;;  %v1686_v46 = vpop.xlane.xlu0 %1685 }
 0x254   :  { %v1836_v21 = vmul.f32 1.442695, %v7925_v11  ;;  %v7927_v54 = vclamps-f32 %v1686_v46, 5.0 }
 0x255   :  { %v1689_v50 = vpop.xlane.xlu1 %1688 }
 0x256   :  { %9020 = vpow2.f32 %v1836_v21  ;;  %v1840_v0 = vmul.f32 1.442695, %v7927_v54  ;;  %v7928_v28 = vclamps-f32 %v1689_v50, 5.0 }
 0x257   :  { %v1692_v55 = vpop.xlane.xlu0 %1691 }
 0x258   :  { %9022 = vpow2.f32 %v1840_v0  ;;  %v1842_v12 = vmul.f32 1.442695, %v7928_v28  ;;  %v7929_v52 = vclamps-f32 %v1692_v55, 5.0 }
 0x259   :  { %v1695_v41 = vpop.xlane.xlu1 %1694 }
 0x25a   :  { %9024 = vpow2.f32 %v1842_v12  ;;  %v1844_v29 = vmul.f32 1.442695, %v7929_v52  ;;  %v7930_v32 = vclamps-f32 %v1695_v41, 5.0 }
 0x25b   :  { %v9015_v35 = vpop.eup %9014  ;;  %v1698_v3 = vpop.xlane.xlu0 %1697 }
 0x25c   :  { %9026 = vpow2.f32 %v1844_v29  ;;  %v1846_v34 = vmul.f32 1.442695, %v7930_v32  ;;  %v7931_v42 = vclamps-f32 %v1698_v3, 5.0  ;;  %v2107_v11 = vmul.f32 %v9015_v35, %v10090_v14 }
 0x25d   :  { %v1701_v46 = vpop.xlane.xlu1 %1700 }
 0x25e   :  { %9028 = vpow2.f32 %v1846_v34  ;;  %v1848_v21 = vmul.f32 1.442695, %v7931_v42  ;;  %v7932_v54 = vclamps-f32 %v1701_v46, 5.0  ;;  %2174 = vperm.xlu1 %9012, %v2107_v11  }
 0x25f   :  { %v9017_v50 = vpop.eup %9016  ;;  %v1704_v0 = vpop.xlane.xlu0 %1703 }
 0x260   :  { %v9019_v28 = vpop.eup %9018  ;;  %9030 = vpow2.f32 %v1848_v21  ;;  %v1850_v53 = vmul.f32 1.442695, %v7932_v54  ;;  %v7933_v55 = vclamps-f32 %v1704_v0, 5.0  ;;  %v2106_v52 = vmul.f32 %v9017_v50, %v10121_v20 }
 0x261   :  { %v1707_v12 = vpop.xlane.xlu1 %1706  ;;  %v2109_v3 = vmul.f32 %v9019_v28, %v10137_v2 }
 0x262   :  { %9032 = vpow2.f32 %v1850_v53  ;;  %v1852_v41 = vmul.f32 1.442695, %v7933_v55  ;;  %v7934_v29 = vclamps-f32 %v1707_v12, 5.0  ;;  %2171 = vperm.xlu0 %9013, %v2106_v52  }
 0x263   :  { %v9021_v32 = vpop.eup %9020  ;;  %v1710_v35 = vpop.xlane.xlu0 %1709 }
 0x264   :  { %9034 = vpow2.f32 %v1852_v41  ;;  %v1854_v34 = vmul.f32 1.442695, %v7934_v29  ;;  %v7935_v42 = vclamps-f32 %v1710_v35, 5.0  ;;  %v2108_v11 = vmul.f32 %v9021_v32, %v10112_v58 }
 0x265   :  { %v9023_v46 = vpop.eup %9022  ;;  %v1713_v21 = vpop.xlane.xlu1 %1712 }
 0x266   :  { %9036 = vpow2.f32 %v1854_v34  ;;  %v1856_v54 = vmul.f32 1.442695, %v7935_v42  ;;  %v7936_v0 = vclamps-f32 %v1713_v21, 5.0  ;;  %2177 = vperm.xlu1 %9012, %v2108_v11   ;;  %2180 = vperm.xlu0 %9013, %v2109_v3   ;;  %v2110_v55 = vmul.f32 %v9023_v46, %v10145_v33 }
 0x267   :  { %v9025_v50 = vpop.eup %9024  ;;  %v1716_v53 = vpop.xlane.xlu0 %1715 }
 0x268   :  { %9038 = vpow2.f32 %v1856_v54  ;;  %v1858_v52 = vmul.f32 1.442695, %v7936_v0  ;;  %v7937_v12 = vclamps-f32 %v1716_v53, 5.0  ;;  %v2111_v28 = vmul.f32 %v9025_v50, %v10160_v62 }
 0x269   :  { %v9027_v41 = vpop.eup %9026  ;;  %v1719_v29 = vpop.xlane.xlu1 %1718 }
 0x26a   :  { %9040 = vpow2.f32 %v1858_v52  ;;  %v1860_v32 = vmul.f32 1.442695, %v7937_v12  ;;  %v7938_v35 = vclamps-f32 %v1719_v29, 5.0  ;;  %2183 = vperm.xlu1 %9012, %v2110_v55   ;;  %2186 = vperm.xlu0 %9013, %v2111_v28   ;;  %v2112_v3 = vmul.f32 %v9027_v41, %v10178_v17 }
 0x26b   :  { %v9029_v34 = vpop.eup %9028  ;;  %v1722_v42 = vpop.xlane.xlu0 %1721 }
 0x26c   :  { %9042 = vpow2.f32 %v1860_v32  ;;  %v1862_v11 = vmul.f32 1.442695, %v7938_v35  ;;  %v7939_v21 = vclamps-f32 %v1722_v42, 5.0  ;;  %v2113_v46 = vmul.f32 %v9029_v34, %v10180_v48 }
 0x26d   :  { %v9031_v54 = vpop.eup %9030  ;;  %v1725_v0 = vpop.xlane.xlu1 %1724 }
 0x26e   :  { %9044 = vpow2.f32 %v1862_v11  ;;  %v1864_v50 = vmul.f32 1.442695, %v7939_v21  ;;  %v7940_v53 = vclamps-f32 %v1725_v0, 5.0  ;;  %2189 = vperm.xlu1 %9012, %v2112_v3   ;;  %2192 = vperm.xlu0 %9013, %v2113_v46   ;;  %v2114_v55 = vmul.f32 %v9031_v54, %v10186_v9 }
 0x26f   :  { %v9033_v52 = vpop.eup %9032  ;;  %v1728_v12 = vpop.xlane.xlu0 %1727 }
 0x270   :  { %9046 = vpow2.f32 %v1864_v50  ;;  %v1866_v28 = vmul.f32 1.442695, %v7940_v53  ;;  %v7941_v29 = vclamps-f32 %v1728_v12, 5.0  ;;  %v2115_v41 = vmul.f32 %v9033_v52, %v10188_v13 }
 0x271   :  { %v9035_v32 = vpop.eup %9034  ;;  %v1731_v35 = vpop.xlane.xlu1 %1730 }
 0x272   :  { %9048 = vpow2.f32 %v1866_v28  ;;  %v1868_v34 = vmul.f32 1.442695, %v7941_v29  ;;  %v7942_v42 = vclamps-f32 %v1731_v35, 5.0  ;;  %2195 = vperm.xlu1 %9012, %v2114_v55   ;;  %2198 = vperm.xlu0 %9013, %v2115_v41   ;;  %v2116_v3 = vmul.f32 %v9035_v32, %v10194_v10 }
 0x273   :  { %v9037_v11 = vpop.eup %9036  ;;  %v1734_v21 = vpop.xlane.xlu0 %1733 }
 0x274   :  { %9050 = vpow2.f32 %v1868_v34  ;;  %v1870_v46 = vmul.f32 1.442695, %v7942_v42  ;;  %v7943_v0 = vclamps-f32 %v1734_v21, 5.0  ;;  %v2117_v54 = vmul.f32 %v9037_v11, %v10196_v63 }
 0x275   :  { %v9039_v50 = vpop.eup %9038  ;;  %v1737_v53 = vpop.xlane.xlu1 %1736 }
 0x276   :  { %9052 = vpow2.f32 %v1870_v46  ;;  %v1872_v52 = vmul.f32 1.442695, %v7943_v0  ;;  %v7944_v12 = vclamps-f32 %v1737_v53, 5.0  ;;  %2201 = vperm.xlu1 %9012, %v2116_v3   ;;  %2204 = vperm.xlu0 %9013, %v2117_v54   ;;  %v2118_v55 = vmul.f32 %v9039_v50, %v10202_v49 }
 0x277   :  { %v9041_v28 = vpop.eup %9040  ;;  %v1740_v29 = vpop.xlane.xlu0 %1739 }
 0x278   :  { %9054 = vpow2.f32 %v1872_v52  ;;  %v1874_v41 = vmul.f32 1.442695, %v7944_v12  ;;  %v7945_v35 = vclamps-f32 %v1740_v29, 5.0  ;;  %v2119_v32 = vmul.f32 %v9041_v28, %v10204_v61 }
 0x279   :  { %v9043_v34 = vpop.eup %9042  ;;  %v1743_v42 = vpop.xlane.xlu1 %1742 }
 0x27a   :  { %9056 = vpow2.f32 %v1874_v41  ;;  %v1876_v11 = vmul.f32 1.442695, %v7945_v35  ;;  %v7946_v21 = vclamps-f32 %v1743_v42, 5.0  ;;  %2207 = vperm.xlu1 %9012, %v2118_v55   ;;  %2210 = vperm.xlu0 %9013, %v2119_v32   ;;  %v2120_v3 = vmul.f32 %v9043_v34, %v10210_v60 }
 0x27b   :  { %v9045_v46 = vpop.eup %9044  ;;  %v1746_v0 = vpop.xlane.xlu0 %1745 }
 0x27c   :  { %9058 = vpow2.f32 %v1876_v11  ;;  %v1878_v54 = vmul.f32 1.442695, %v7946_v21  ;;  %v7947_v53 = vclamps-f32 %v1746_v0, 5.0  ;;  %v2121_v50 = vmul.f32 %v9045_v46, %v10212_v31 }
 0x27d   :  { %v9047_v52 = vpop.eup %9046  ;;  %v1749_v12 = vpop.xlane.xlu1 %1748 }
 0x27e   :  { %9060 = vpow2.f32 %v1878_v54  ;;  %v1880_v28 = vmul.f32 1.442695, %v7947_v53  ;;  %v7948_v29 = vclamps-f32 %v1749_v12, 5.0  ;;  %2216 = vperm.xlu0 %9013, %v2121_v50   ;;  %2213 = vperm.xlu1 %9012, %v2120_v3   ;;  %v2122_v55 = vmul.f32 %v9047_v52, %v10166_v38 }
 0x27f   :  { %v9049_v41 = vpop.eup %9048  ;;  %v1752_v35 = vpop.xlane.xlu0 %1751 }
 0x280   :  { %9062 = vpow2.f32 %v1880_v28  ;;  %v1882_v32 = vmul.f32 1.442695, %v7948_v29  ;;  %v7949_v42 = vclamps-f32 %v1752_v35, 5.0  ;;  %v2123_v34 = vmul.f32 %v9049_v41, %v10172_v43 }
 0x281   :  { %v9051_v11 = vpop.eup %9050  ;;  %v1755_v21 = vpop.xlane.xlu1 %1754 }
 0x282   :  { %9064 = vpow2.f32 %v1882_v32  ;;  %v1884_v46 = vmul.f32 1.442695, %v7949_v42  ;;  %v7950_v0 = vclamps-f32 %v1755_v21, 5.0  ;;  %2222 = vperm.xlu0 %9013, %v2123_v34   ;;  %2219 = vperm.xlu1 %9012, %v2122_v55   ;;  %v2124_v3 = vmul.f32 %v9051_v11, %v10174_v30 }
 0x283   :  { %v9053_v54 = vpop.eup %9052  ;;  %v1758_v53 = vpop.xlane.xlu0 %1757 }
 0x284   :  { %9066 = vpow2.f32 %v1884_v46  ;;  %v1886_v50 = vmul.f32 1.442695, %v7950_v0  ;;  %v7951_v12 = vclamps-f32 %v1758_v53, 5.0  ;;  %v2125_v52 = vmul.f32 %v9053_v54, %v10176_v5 }
 0x285   :  { %v9055_v28 = vpop.eup %9054  ;;  %v1761_v29 = vpop.xlane.xlu1 %1760 }
 0x286   :  { %9068 = vpow2.f32 %v1886_v50  ;;  %v1888_v41 = vmul.f32 1.442695, %v7951_v12  ;;  %v7952_v35 = vclamps-f32 %v1761_v29, 5.0  ;;  %2228 = vperm.xlu0 %9013, %v2125_v52   ;;  %2225 = vperm.xlu1 %9012, %v2124_v3   ;;  %v2126_v55 = vmul.f32 %v9055_v28, %v10182_v6 }
 0x287   :  { %v9057_v32 = vpop.eup %9056  ;;  %v1764_v42 = vpop.xlane.xlu0 %1763 }
 0x288   :  { %9070 = vpow2.f32 %v1888_v41  ;;  %v1890_v34 = vmul.f32 1.442695, %v7952_v35  ;;  %v7953_v21 = vclamps-f32 %v1764_v42, 5.0  ;;  %v2127_v11 = vmul.f32 %v9057_v32, %v10184_v26 }
 0x289   :  { %v9059_v46 = vpop.eup %9058  ;;  %v1767_v0 = vpop.xlane.xlu1 %1766 }
 0x28a   :  { %9072 = vpow2.f32 %v1890_v34  ;;  %v1892_v54 = vmul.f32 1.442695, %v7953_v21  ;;  %v7954_v53 = vclamps-f32 %v1767_v0, 5.0  ;;  %2234 = vperm.xlu0 %9013, %v2127_v11   ;;  %2231 = vperm.xlu1 %9012, %v2126_v55   ;;  %v2128_v52 = vmul.f32 %v9059_v46, %v10190_v24 }
 0x28b   :  { %v9061_v50 = vpop.eup %9060 }
 0x28c   :  { %9074 = vpow2.f32 %v1892_v54  ;;  %v1894_v12 = vmul.f32 1.442695, %v7954_v53  ;;  %v2129_v3 = vmul.f32 %v9061_v50, %v10192_v4 }
 0x28d   :  { %v9063_v28 = vpop.eup %9062 }
 0x28e   :  { %9076 = vpow2.f32 %v1894_v12  ;;  %2240 = vperm.xlu0 %9013, %v2129_v3   ;;  %2237 = vperm.xlu1 %9012, %v2128_v52   ;;  %v2130_v35 = vmul.f32 %v9063_v28, %v10198_v56  ;;  %v10257_v3 = vld [vmem:[%s11732_s4 + $0x140] sm:$0xff] }
 0x28f   :  { %v9065_v29 = vpop.eup %9064  ;;  %8670 = vmatprep.subr.mxu1 %v10257_v3 }
 0x290   :  { %v2131_v41 = vmul.f32 %v9065_v29, %v10200_v57 }
 0x291   :  { %v9067_v32 = vpop.eup %9066 }
 0x292   :  { %2246 = vperm.xlu0 %9013, %v2131_v41   ;;  %2243 = vperm.xlu1 %9012, %v2130_v35   ;;  %v2132_v34 = vmul.f32 %v9067_v32, %v10206_v59  ;;  %v11931_v32 = vld [vmem:[#allocation2_spill] sm:$0xff] }
 0x293   :  { %v9069_v42 = vpop.eup %9068 }
 0x294   :  { %v2133_v55 = vmul.f32 %v9069_v42, %v10208_v1 }
 0x295   :  { %v9071_v21 = vpop.eup %9070 }
 0x296   :  { %2252 = vperm.xlu0 %9013, %v2133_v55   ;;  %2249 = vperm.xlu1 %9012, %v2132_v34   ;;  %v2134_v0 = vmul.f32 %v9071_v21, %v10214_v23 }
 0x297   :  { %v9073_v11 = vpop.eup %9072 }
 0x298   :  { %v2135_v46 = vmul.f32 %v9073_v11, %v10216_v16 }
 0x299   :  { %v9075_v54 = vpop.eup %9074 }
 0x29a   :  { %2258 = vperm.xlu0 %9013, %v2135_v46   ;;  %2255 = vperm.xlu1 %9012, %v2134_v0   ;;  %v2136_v12 = vmul.f32 %v9075_v54, %v10218_v8 }
 0x29b   :  { %v9077_v53 = vpop.eup %9076 }
 0x29c   :  { %v2137_v50 = vmul.f32 %v9077_v53, %v10220_v39 }
 0x29e   :  { %2264 = vperm.xlu0 %9013, %v2137_v50   ;;  %2261 = vperm.xlu1 %9012, %v2136_v12  }
 0x2a2   :  { %2803 = vrot.lane.b32.xlu0 %v9944_v51, %s9315_s7  ;;  %2805 = vrot.lane.b32.xlu1 %v9937_v37, %s9315_s7  ;;  %v11924_v51 = vld [vmem:[#allocation46_spill] sm:$0xff] }
 0x2a3   :  { %v11926_v37 = vld [vmem:[#allocation54_spill] sm:$0xff] }
 0x2a6   :  { %2809 = vrot.lane.b32.xlu0 %v9948_v7, %s9315_s7  ;;  %2807 = vrot.lane.b32.xlu1 %v9958_v27, %s9315_s7  ;;  %v11927_v7 = vld [vmem:[#allocation53_spill] sm:$0xff]  ;;  %v11928_v27 = vld [vmem:[#allocation48_spill] sm:$0xff] }
 0x2aa   :  { %2813 = vrot.lane.b32.xlu0 %v9970_v47, %s9315_s7  ;;  %2811 = vrot.lane.b32.xlu1 %v9968_v19, %s9315_s7  ;;  %v11929_v19 = vld [vmem:[#allocation47_spill] sm:$0xff] }
 0x2ae   :  { %2837 = vrot.lane.b32.xlu0 %v10060_v36, %s9315_s7  ;;  %2835 = vrot.lane.b32.xlu1 %v10058_v25, %s9315_s7 }
 0x2b2   :  { %2841 = vrot.lane.b32.xlu0 %v10074_v18, %s9315_s7  ;;  %2839 = vrot.lane.b32.xlu1 %v10072_v40, %s9315_s7  ;;  %v11925_v18 = vld [vmem:[#allocation45_spill] sm:$0xff] }
 0x2b6   :  { %2817 = vrot.lane.b32.xlu0 %v9986_v44, %s9315_s7  ;;  %2815 = vrot.lane.b32.xlu1 %v9984_v45, %s9315_s7 }
 0x2ba   :  { %2845 = vrot.lane.b32.xlu0 %v10088_v22, %s9315_s7  ;;  %2843 = vrot.lane.b32.xlu1 %v10086_v15, %s9315_s7  ;;  %v11930_v15 = vlaneseq }
 0x2bc   :  { %v2267_v22 = vand.u32 127, %v11930_v15 }
 0x2be   :  { %2821 = vrot.lane.b32.xlu0 %v11924_v51, %s9315_s7  ;;  %2819 = vrot.lane.b32.xlu1 %v11925_v18, %s9315_s7  ;;  %v2272_v29 = vadd.s32 4294967288, %v2267_v22  ;;  %v10302_v42 = vsub.s32 %v2267_v22, %v11931_v32 }
 0x2c0   :  { %v10305_v55 = vsub.s32 %v2272_v29, %v11931_v32 }
 0x2c2   :  { %2849 = vrot.lane.b32.xlu0 %v11926_v37, %s9315_s7  ;;  %2847 = vrot.lane.b32.xlu1 %v11927_v7, %s9315_s7 }
 0x2c6   :  { %2825 = vrot.lane.b32.xlu0 %v11928_v27, %s9315_s7  ;;  %2823 = vrot.lane.b32.xlu1 %v11929_v19, %s9315_s7 }
 0x2d9   :  { %v2175_v47 = vpop.permute.xlu1 %2174 }
 0x2da   :  { %v2276_v37 = vrot.slane %v2175_v47, %v10305_v55 }
 0x2dd   :  { %v2172_v45 = vpop.permute.xlu0 %2171 }
 0x2de   :  { %v2271_v53 = vrot.slane %v2172_v45, %v10302_v42 }
 0x2e1   :  { %v2178_v44 = vpop.permute.xlu1 %2177  ;;  %v2181_v25 = vpop.permute.xlu0 %2180 }
 0x2e2   :  { %v2282_v34 = vrot.slane %v2178_v44, %v10302_v42  ;;  %v2286_v21 = vrot.slane %v2181_v25, %v10305_v55 }
 0x2e4   :  { %v2287_v7 = vsel %vm2277_vm7, %v2286_v21, %v2282_v34 }
 0x2e5   :  { %v2184_v36 = vpop.permute.xlu1 %2183  ;;  %v2187_v40 = vpop.permute.xlu0 %2186 }
 0x2e6   :  { %v2291_v11 = vrot.slane %v2184_v36, %v10302_v42  ;;  %v2295_v46 = vrot.slane %v2187_v40, %v10305_v55  ;;  %v2278_v36 = vsel %vm2277_vm7, %v2276_v37, %v2271_v53 }
 0x2e7   :  { %v2415_v22 = vsel %vm2414_vm8, %v2287_v7, %v2278_v36 }
 0x2e8   :  { %v2296_v45 = vsel %vm2277_vm7, %v2295_v46, %v2291_v11 }
 0x2e9   :  { %v2190_v52 = vpop.permute.xlu1 %2189  ;;  %v2193_v28 = vpop.permute.xlu0 %2192 }
 0x2ea   :  { %v2300_v50 = vrot.slane %v2190_v52, %v10302_v42  ;;  %v2304_v12 = vrot.slane %v2193_v28, %v10305_v55  ;;  %v2417_v28 = vsel %vm2416_vm9, %v2296_v45, %v2415_v22 }
 0x2ec   :  { %v2305_v40 = vsel %vm2277_vm7, %v2304_v12, %v2300_v50 }
 0x2ed   :  { %v2196_v41 = vpop.permute.xlu1 %2195  ;;  %v2199_v35 = vpop.permute.xlu0 %2198 }
 0x2ee   :  { %v2309_v51 = vrot.slane %v2196_v41, %v10302_v42  ;;  %v2313_v18 = vrot.slane %v2199_v35, %v10305_v55  ;;  %v2419_v41 = vsel %vm2418_vm10, %v2305_v40, %v2417_v28 }
 0x2f0   :  { %v2314_v52 = vsel %vm2277_vm7, %v2313_v18, %v2309_v51 }
 0x2f1   :  { %v2202_v0 = vpop.permute.xlu1 %2201  ;;  %v2205_v54 = vpop.permute.xlu0 %2204  ;;  %v2421_v21 = vsel %vm2420_vm11, %v2314_v52, %v2419_v41 }
 0x2f2   :  { %v2318_v27 = vrot.slane %v2202_v0, %v10302_v42  ;;  %v2322_v19 = vrot.slane %v2205_v54, %v10305_v55 }
 0x2f4   :  { %v2323_v29 = vsel %vm2277_vm7, %v2322_v19, %v2318_v27 }
 0x2f5   :  { %v2208_v44 = vpop.permute.xlu1 %2207  ;;  %v2211_v25 = vpop.permute.xlu0 %2210  ;;  %v2423_v0 = vsel %vm2422_vm12, %v2323_v29, %v2421_v21 }
 0x2f6   :  { %v2327_v15 = vrot.slane %v2208_v44, %v10302_v42  ;;  %v2331_v47 = vrot.slane %v2211_v25, %v10305_v55 }
 0x2f8   :  { %v2332_v35 = vsel %vm2277_vm7, %v2331_v47, %v2327_v15  ;;  %v11932_v47 = vld [vmem:[#allocation55_spill] sm:$0xff] }
 0x2f9   :  { %v2214_v32 = vpop.permute.xlu1 %2213  ;;  %v2217_v34 = vpop.permute.xlu0 %2216  ;;  %v2425_v53 = vsel %vm2424_vm13, %v2332_v35, %v2423_v0 }
 0x2fa   :  { %v2336_v11 = vrot.slane %v2214_v32, %v10302_v42  ;;  %v2340_v46 = vrot.slane %v2217_v34, %v10305_v55 }
 0x2fc   :  { %v2341_v54 = vsel %vm2277_vm7, %v2340_v46, %v2336_v11 }
 0x2fd   :  { %v2220_v50 = vpop.permute.xlu1 %2219  ;;  %v2223_v12 = vpop.permute.xlu0 %2222  ;;  %v10338_v51 = vsel %vm2426_vm14, %v2341_v54, %v2425_v53  ;;  %v11933_v53 = vld [vmem:[#allocation49_spill] sm:$0xff] }
 0x2fe   :  { %8667 = vmatprep.mubr.msk.f32.mxu1 %vm1671_vm6, %v10338_v51  ;;  %v2437_v18 = vsel %vm1671_vm6, %v10338_v51, 0.0  ;;  %v2345_v41 = vrot.slane %v2220_v50, %v10302_v42  ;;  %v2349_v35 = vrot.slane %v2223_v12, %v10305_v55 }
 0x2ff   :  { %2438 = vadd.xlane.f32.xlu1 %v2437_v18 }
 0x301   :  { %v2226_v37 = vpop.permute.xlu1 %2225  ;;  %v2229_v7 = vpop.permute.xlu0 %2228 }
 0x302   :  { %v2354_v40 = vrot.slane %v2226_v37, %v10302_v42  ;;  %v2358_v15 = vrot.slane %v2229_v7, %v10305_v55  ;;  %v2350_v37 = vsel %vm2277_vm7, %v2349_v35, %v2345_v41 }
 0x304   :  { %v2359_v46 = vsel %vm2277_vm7, %v2358_v15, %v2354_v40  ;;  %v11934_v40 = vld [vmem:[#allocation57_spill] sm:$0xff] }
 0x305   :  { %v2232_v27 = vpop.permute.xlu1 %2231  ;;  %v2235_v19 = vpop.permute.xlu0 %2234 }
 0x306   :  { %v2363_v22 = vrot.slane %v2232_v27, %v10302_v42  ;;  %v2367_v52 = vrot.slane %v2235_v19, %v10305_v55 }
 0x308   :  { %v2368_v50 = vsel %vm2277_vm7, %v2367_v52, %v2363_v22 }
 0x309   :  { %v2238_v45 = vpop.permute.xlu1 %2237  ;;  %v2241_v44 = vpop.permute.xlu0 %2240 }
 0x30a   :  { %v2372_v32 = vrot.slane %v2238_v45, %v10302_v42  ;;  %v2376_v34 = vrot.slane %v2241_v44, %v10305_v55  ;;  %v2428_v45 = vsel %vm2414_vm8, %v2359_v46, %v2350_v37  ;;  %v1651_v46 = vld [vmem:[%s11732_s4 + $0x138] sm:$0xff] }
 0x30c   :  { %v2377_v7 = vsel %vm2277_vm7, %v2376_v34, %v2372_v32 }
 0x30d   :  { %v2244_v25 = vpop.permute.xlu1 %2243  ;;  %v2247_v36 = vpop.permute.xlu0 %2246 }
 0x30e   :  { %v2381_v21 = vrot.slane %v2244_v25, %v10302_v42  ;;  %v2385_v11 = vrot.slane %v2247_v36, %v10305_v55  ;;  %v2429_v25 = vsel %vm2416_vm9, %v2368_v50, %v2428_v45  ;;  %v11941_v45 = vld [vmem:[#allocation58_spill] sm:$0xff] }
 0x30f   :  { %v2430_v15 = vsel %vm2418_vm10, %v2377_v7, %v2429_v25  ;;  %v11939_v7 = vld [vmem:[#allocation56_spill] sm:$0xff] }
 0x310   :  { %2851 = vrot.lane.b32.xlu1 %v11932_v47, %s9315_s7  ;;  %v2386_v44 = vsel %vm2277_vm7, %v2385_v11, %v2381_v21  ;;  %v11935_v21 = vld [vmem:[#allocation51_spill] sm:$0xff]  ;;  %v11942_v25 = vld [vmem:[#allocation52_spill] sm:$0xff] }
 0x311   :  { %v2250_v28 = vpop.permute.xlu1 %2249  ;;  %v2253_v29 = vpop.permute.xlu0 %2252 }
 0x312   :  { %v2390_v0 = vrot.slane %v2250_v28, %v10302_v42  ;;  %v2394_v54 = vrot.slane %v2253_v29, %v10305_v55  ;;  %v2431_v28 = vsel %vm2420_vm11, %v2386_v44, %v2430_v15 }
 0x314   :  { %2827 = vrot.lane.b32.xlu1 %v11933_v53, %s9315_s7  ;;  %v2395_v36 = vsel %vm2277_vm7, %v2394_v54, %v2390_v0  ;;  %v9312_v54 = vld [vmem:[%s11732_s4 + $0x130] ss:$0 sm:$0xff]  ;;  %v11936_v53 = vld [vmem:[#allocation43_spill] sm:$0xff] }
 0x315   :  { %v2256_v12 = vpop.permute.xlu1 %2255  ;;  %v2259_v18 = vpop.permute.xlu0 %2258  ;;  %v2432_v35 = vsel %vm2422_vm12, %v2395_v36, %v2431_v28  ;;  %v10397_v50 = vadd.f32 %v9312_v54, %v11936_v53 }
 0x316   :  { %v2399_v27 = vrot.slane %v2256_v12, %v10302_v42  ;;  %v2403_v19 = vrot.slane %v2259_v18, %v10305_v55  ;;  %v11937_v12 = vld [vmem:[#allocation59_spill] sm:$0xff]  ;;  %v11938_v18 = vld [vmem:[#allocation62_spill] sm:$0xff] }
 0x318   :  { %2855 = vrot.lane.b32.xlu1 %v11934_v40, %s9315_s7  ;;  %v2404_v47 = vsel %vm2277_vm7, %v2403_v19, %v2399_v27  ;;  %v11940_v27 = vld [vmem:[#allocation50_spill] sm:$0xff]  ;;  %v11943_v40 = vld [vmem:[#allocation60_spill] sm:$0xff] }
 0x319   :  { %v2262_v22 = vpop.permute.xlu1 %2261  ;;  %v2265_v52 = vpop.permute.xlu0 %2264  ;;  %v2433_v32 = vsel %vm2424_vm13, %v2404_v47, %v2432_v35 }
 0x31a   :  { %v2408_v29 = vrot.slane %v2262_v22, %v10302_v42  ;;  %v2412_v41 = vrot.slane %v2265_v52, %v10305_v55  ;;  %v11944_v22 = vld [vmem:[#allocation61_spill] sm:$0xff] }
 0x31c   :  { %v2413_v34 = vsel %vm2277_vm7, %v2412_v41, %v2408_v29  ;;  %2831 = vrot.lane.b32.xlu1 %v11935_v21, %s9315_s7 }
 0x31d   :  { %v10383_v11 = vsel %vm2426_vm14, %v2413_v34, %v2433_v32  ;;  %v2806_v37 = vpop.permute.xlu1 %2805  ;;  %v2804_v36 = vpop.permute.xlu0 %2803 }
 0x31e   :  { %8668 = vmatmul.mubr.msk.f32.vlgmr.msra.gmra.mxu1 %vm1671_vm6, %v10383_v11  ;;  %v2440_v0 = vsel %vm1671_vm6, %v10383_v11, 0.0  ;;  %v2899_v47 = vsel %vm1671_vm6, %v2804_v36, 0.0 }
 0x31f   :  { %8671 = vmatpush3.msra.mxu1 %v10257_v3  ;;  %2441 = vadd.xlane.f32.xlu0 %v2440_v0 }
 0x320   :  { %8672 = vmatprep.subr.mxu1 %v1651_v46  ;;  %2859 = vrot.lane.b32.xlu1 %v11937_v12, %s9315_s7 }
 0x321   :  { %8673 = vmatpush3.msra.mxu1 %v1651_v46  ;;  %v2808_v3 = vpop.permute.xlu1 %2807  ;;  %v2810_v46 = vpop.permute.xlu0 %2809 }
 0x322   :  { %8677 = vmatprep.subr.mxu1 %v10397_v50 }
 0x324   :  { %2863 = vrot.lane.b32.xlu1 %v11938_v18, %s9315_s7 }
 0x325   :  { %v2812_v19 = vpop.permute.xlu1 %2811  ;;  %v2814_v53 = vpop.permute.xlu0 %2813 }
 0x326   :  { %v2911_v52 = vsel %vm1671_vm6, %v2812_v19, 0.0  ;;  %v2914_v36 = vsel %vm1671_vm6, %v2814_v53, 0.0 }
 0x329   :  { %v2836_v44 = vpop.permute.xlu1 %2835  ;;  %v2838_v19 = vpop.permute.xlu0 %2837 }
 0x32a   :  { %v2947_v29 = vsel %vm1671_vm6, %v2836_v44, 0.0 }
 0x32d   :  { %v2840_v15 = vpop.permute.xlu1 %2839  ;;  %v2842_v44 = vpop.permute.xlu0 %2841 }
 0x32e   :  { %v2953_v35 = vsel %vm1671_vm6, %v2840_v15, 0.0  ;;  %v2950_v15 = vsel %vm1671_vm6, %v2838_v19, 0.0 }
 0x331   :  { %v2816_v28 = vpop.permute.xlu1 %2815 }
 0x332   :  { %v2917_v32 = vsel %vm1671_vm6, %v2816_v28, 0.0 }
 0x335   :  { %2853 = vrot.lane.b32.xlu0 %v11939_v7, %s9315_s7  ;;  %v2844_v41 = vpop.permute.xlu1 %2843  ;;  %v2902_v7 = vsel %vm1671_vm6, %v2806_v37, 0.0 }
 0x336   :  { %v2959_v21 = vsel %vm1671_vm6, %v2844_v41, 0.0 }
 0x339   :  { %2829 = vrot.lane.b32.xlu0 %v11940_v27, %s9315_s7  ;;  %v2820_v34 = vpop.permute.xlu1 %2819 }
 0x33a   :  { %v2923_v54 = vsel %vm1671_vm6, %v2820_v34, 0.0 }
 0x33d   :  { %2857 = vrot.lane.b32.xlu0 %v11941_v45, %s9315_s7  ;;  %v2848_v0 = vpop.permute.xlu1 %2847  ;;  %v2905_v45 = vsel %vm1671_vm6, %v2808_v3, 0.0 }
 0x33e   :  { %v2965_v12 = vsel %vm1671_vm6, %v2848_v0, 0.0 }
 0x341   :  { %2833 = vrot.lane.b32.xlu0 %v11942_v25, %s9315_s7  ;;  %v2824_v18 = vpop.permute.xlu1 %2823  ;;  %v2908_v25 = vsel %vm1671_vm6, %v2810_v46, 0.0 }
 0x342   :  { %v2929_v27 = vsel %vm1671_vm6, %v2824_v18, 0.0 }
 0x345   :  { %2861 = vrot.lane.b32.xlu0 %v11943_v40, %s9315_s7  ;;  %v2818_v40 = vpop.permute.xlu0 %2817 }
 0x348   :  { %2900 = vadd.xlane.f32.xlu1 %v2899_v47  ;;  %v2956_v47 = vsel %vm1671_vm6, %v2842_v44, 0.0 }
 0x349   :  { %2865 = vrot.lane.b32.xlu0 %v11944_v22, %s9315_s7  ;;  %v2846_v37 = vpop.permute.xlu0 %2845  ;;  %v2920_v22 = vsel %vm1671_vm6, %v2818_v40, 0.0 }
 0x34a   :  { %v2962_v3 = vsel %vm1671_vm6, %v2846_v37, 0.0 }
 0x34c   :  { %2912 = vadd.xlane.f32.xlu1 %v2911_v52 }
 0x34d   :  { %v2822_v52 = vpop.permute.xlu0 %2821 }
 0x350   :  { %2948 = vadd.xlane.f32.xlu1 %v2947_v29  ;;  %v2926_v29 = vsel %vm1671_vm6, %v2822_v52, 0.0 }
 0x351   :  { %v2850_v28 = vpop.permute.xlu0 %2849 }
 0x354   :  { %2954 = vadd.xlane.f32.xlu1 %v2953_v35  ;;  %v2968_v35 = vsel %vm1671_vm6, %v2850_v28, 0.0 }
 0x358   :  { %2918 = vadd.xlane.f32.xlu1 %v2917_v32  ;;  %v2826_v32 = vpop.permute.xlu0 %2825 }
 0x359   :  { %v2932_v46 = vsel %vm1671_vm6, %v2826_v32, 0.0 }
 0x35c   :  { %2960 = vadd.xlane.f32.xlu1 %v2959_v21 }
 0x360   :  { %2924 = vadd.xlane.f32.xlu1 %v2923_v54 }
 0x364   :  { %2966 = vadd.xlane.f32.xlu1 %v2965_v12 }
 0x368   :  { %2903 = vadd.xlane.f32.xlu0 %v2902_v7  ;;  %2930 = vadd.xlane.f32.xlu1 %v2929_v27 }
 0x36c   :  { %2906 = vadd.xlane.f32.xlu0 %v2905_v45 }
 0x370   :  { %2909 = vadd.xlane.f32.xlu0 %v2908_v25 }
 0x374   :  { %2915 = vadd.xlane.f32.xlu0 %v2914_v36 }
 0x378   :  { %2951 = vadd.xlane.f32.xlu0 %v2950_v15 }
 0x37c   :  { %2957 = vadd.xlane.f32.xlu0 %v2956_v47 }
 0x380   :  { %2921 = vadd.xlane.f32.xlu0 %v2920_v22 }
 0x384   :  { %2963 = vadd.xlane.f32.xlu0 %v2962_v3 }
 0x388   :  { %v2439_v41 = vpop.xlane.xlu1 %2438  ;;  %2927 = vadd.xlane.f32.xlu0 %v2926_v29 }
 0x38c   :  { %v2852_v34 = vpop.permute.xlu1 %2851  ;;  %2969 = vadd.xlane.f32.xlu0 %v2968_v35 }
 0x38d   :  { %v2971_v21 = vsel %vm1671_vm6, %v2852_v34, 0.0  ;;  %v2443_v34 = vadd.f32 1e-06, %v2439_v41 }
 0x38e   :  { %2972 = vadd.xlane.f32.xlu1 %v2971_v21 }
 0x38f   :  { %9078 = vrcp.f32 %v2443_v34 }
 0x390   :  { %v2828_v0 = vpop.permute.xlu1 %2827  ;;  %2933 = vadd.xlane.f32.xlu0 %v2932_v46 }
 0x391   :  { %v2935_v54 = vsel %vm1671_vm6, %v2828_v0, 0.0 }
 0x392   :  { %2936 = vadd.xlane.f32.xlu1 %v2935_v54 }
 0x394   :  { %v2856_v53 = vpop.permute.xlu1 %2855 }
 0x395   :  { %v2977_v12 = vsel %vm1671_vm6, %v2856_v53, 0.0 }
 0x396   :  { %2978 = vadd.xlane.f32.xlu1 %v2977_v12 }
 0x398   :  { %v2832_v18 = vpop.permute.xlu1 %2831 }
 0x399   :  { %v2941_v7 = vsel %vm1671_vm6, %v2832_v18, 0.0 }
 0x39a   :  { %2942 = vadd.xlane.f32.xlu1 %v2941_v7 }
 0x39c   :  { %v2860_v27 = vpop.permute.xlu1 %2859  ;;  %v10448_v12 = vpop.eup %9078 }
 0x39d   :  { %v2983_v19 = vsel %vm1671_vm6, %v2860_v27, 0.0 }
 0x39e   :  { %2984 = vadd.xlane.f32.xlu1 %v2983_v19 }
 0x3a0   :  { %v2864_v45 = vpop.permute.xlu1 %2863 }
 0x3a1   :  { %v2989_v44 = vsel %vm1671_vm6, %v2864_v45, 0.0 }
 0x3a2   :  { %2990 = vadd.xlane.f32.xlu1 %v2989_v44 }
 0x3a8   :  { %v2442_v25 = vpop.xlane.xlu0 %2441 }
 0x3a9   :  { %v2444_v21 = vadd.f32 1e-06, %v2442_v25  ;;  %v11945_v25 = vld [vmem:[#allocation44_spill] sm:$0xff] }
 0x3ab   :  { %9080 = vrcp.f32 %v2444_v21 }
 0x3ac   :  { %v2854_v36 = vpop.permute.xlu0 %2853 }
 0x3ad   :  { %v2974_v40 = vsel %vm1671_vm6, %v2854_v36, 0.0 }
 0x3ae   :  { %2975 = vadd.xlane.f32.xlu0 %v2974_v40 }
 0x3b0   :  { %v2830_v15 = vpop.permute.xlu0 %2829 }
 0x3b1   :  { %v2938_v37 = vsel %vm1671_vm6, %v2830_v15, 0.0 }
 0x3b2   :  { %2939 = vadd.xlane.f32.xlu0 %v2938_v37 }
 0x3b4   :  { %v2858_v47 = vpop.permute.xlu0 %2857 }
 0x3b5   :  { %v2980_v22 = vsel %vm1671_vm6, %v2858_v47, 0.0 }
 0x3b6   :  { %2981 = vadd.xlane.f32.xlu0 %v2980_v22 }
 0x3b8   :  { %v2834_v52 = vpop.permute.xlu0 %2833  ;;  %v10450_v7 = vpop.eup %9080 }
 0x3b9   :  { %v2944_v3 = vsel %vm1671_vm6, %v2834_v52, 0.0 }
 0x3ba   :  { %2945 = vadd.xlane.f32.xlu0 %v2944_v3 }
 0x3bc   :  { %v2862_v28 = vpop.permute.xlu0 %2861 }
 0x3bd   :  { %v2986_v29 = vsel %vm1671_vm6, %v2862_v28, 0.0 }
 0x3be   :  { %2987 = vadd.xlane.f32.xlu0 %v2986_v29 }
 0x3c0   :  { %v2866_v35 = vpop.permute.xlu0 %2865 }
 0x3c1   :  { %v2992_v32 = vsel %vm1671_vm6, %v2866_v35, 0.0 }
 0x3c2   :  { %2993 = vadd.xlane.f32.xlu0 %v2992_v32 }
 0x3d1   :  { %v2901_v46 = vpop.xlane.xlu1 %2900 }
 0x3d2   :  { %v7963_v0 = vclamps-f32 %v2901_v46, 5.0 }
 0x3d4   :  { %v3059_v54 = vmul.f32 1.442695, %v7963_v0 }
 0x3d5   :  { %v2913_v44 = vpop.xlane.xlu1 %2912 }
 0x3d6   :  { %9082 = vpow2.f32 %v3059_v54  ;;  %v7967_v3 = vclamps-f32 %v2913_v44, 5.0 }
 0x3d8   :  { %v3067_v32 = vmul.f32 1.442695, %v7967_v3 }
 0x3d9   :  { %v2949_v36 = vpop.xlane.xlu1 %2948 }
 0x3da   :  { %v7979_v34 = vclamps-f32 %v2949_v36, 5.0 }
 0x3dc   :  { %v3091_v54 = vmul.f32 1.442695, %v7979_v34 }
 0x3dd   :  { %v2955_v15 = vpop.xlane.xlu1 %2954 }
 0x3de   :  { %v8669_v53 = vpop.f32.mrf.mxu1 }
 0x3df   :  { %v2527_v19 = vmul.f32 %v10450_v7, %v8669_v53  ;;  %v7981_v53 = vclamps-f32 %v2955_v15, 5.0 }
 0x3e0   :  { %v2517_v18 = vpop.f32.mrf.mxu1 }
 0x3e1   :  { %v2526_v27 = vmul.f32 %v10448_v12, %v2517_v18  ;;  %v2919_v28 = vpop.xlane.xlu1 %2918  ;;  %v3095_v44 = vmul.f32 1.442695, %v7981_v53 }
 0x3e3   :  { %v9083_v45 = vpop.eup %9082  ;;  %8674 = vmatprep.mubr.msk.f32.mxu1 %vm1671_vm6, %v2526_v27 }
 0x3e4   :  { %8675 = vmatmul.mubr.msk.f32.vlgmr.msra.gmra.mxu1 %vm1671_vm6, %v2527_v19  ;;  %v3123_v41 = vmul.f32 %v9083_v45, %v10121_v20  ;;  %v7969_v45 = vclamps-f32 %v2919_v28, 5.0 }
 0x3e5   :  { %8678 = vmatpush3.msra.mxu1 %v10397_v50  ;;  %8681 = vmatprep.mubr.msk.f32.mxu1 %vm1671_vm6, %v10338_v51  ;;  %v2961_v0 = vpop.xlane.xlu1 %2960 }
 0x3e6   :  { %8679 = vmatprep.subr.mxu1 %v11945_v25  ;;  %3188 = vperm.xlu1 %9012, %v3123_v41   ;;  %v3071_v3 = vmul.f32 1.442695, %v7969_v45 }
 0x3e7   :  { %8680 = vmatpush3.msra.mxu1 %v11945_v25 }
 0x3e8   :  { %8682 = vmatmul.mubr.msk.f32.vlgmr.msra.gmra.mxu1 %vm1671_vm6, %v10383_v11 }
 0x3f1   :  { %v2904_v40 = vpop.xlane.xlu0 %2903 }
 0x3f2   :  { %v7964_v37 = vclamps-f32 %v2904_v40, 5.0  ;;  %v2925_v40 = vpop.xlane.xlu1 %2924 }
 0x3f4   :  { %v3061_v47 = vmul.f32 1.442695, %v7964_v37 }
 0x3f5   :  { %v2907_v22 = vpop.xlane.xlu0 %2906 }
 0x3f6   :  { %v7965_v52 = vclamps-f32 %v2907_v22, 5.0  ;;  %9084 = vpow2.f32 %v3061_v47  ;;  %v2967_v28 = vpop.xlane.xlu1 %2966 }
 0x3f7   :  { %v7985_v45 = vclamps-f32 %v2967_v28, 5.0 }
 0x3f8   :  { %v3063_v51 = vmul.f32 1.442695, %v7965_v52 }
 0x3f9   :  { %v2910_v29 = vpop.xlane.xlu0 %2909 }
 0x3fa   :  { %9086 = vpow2.f32 %v3063_v51  ;;  %v7966_v35 = vclamps-f32 %v2910_v29, 5.0  ;;  %v7983_v51 = vclamps-f32 %v2961_v0, 5.0 }
 0x3fc   :  { %v3065_v21 = vmul.f32 1.442695, %v7966_v35 }
 0x3fd   :  { %v2916_v46 = vpop.xlane.xlu0 %2915 }
 0x3fe   :  { %9088 = vpow2.f32 %v3065_v21  ;;  %v7968_v11 = vclamps-f32 %v2916_v46, 5.0  ;;  %v3099_v21 = vmul.f32 1.442695, %v7983_v51  ;;  %v7971_v46 = vclamps-f32 %v2925_v40, 5.0 }
 0x3ff   :  { %9090 = vpow2.f32 %v3067_v32 }
 0x400   :  { %v3069_v18 = vmul.f32 1.442695, %v7968_v11 }
 0x401   :  { %v2952_v27 = vpop.xlane.xlu0 %2951 }
 0x402   :  { %9092 = vpow2.f32 %v3069_v18  ;;  %v7980_v19 = vclamps-f32 %v2952_v27, 5.0 }
 0x403   :  { %v9085_v41 = vpop.eup %9084  ;;  %9094 = vpow2.f32 %v3091_v54 }
 0x404   :  { %v3093_v37 = vmul.f32 1.442695, %v7980_v19  ;;  %v3124_v36 = vmul.f32 %v9085_v41, %v10090_v14  ;;  %v3075_v19 = vmul.f32 1.442695, %v7971_v46  ;;  %v2931_v41 = vpop.xlane.xlu1 %2930 }
 0x405   :  { %v2958_v47 = vpop.xlane.xlu0 %2957  ;;  %v7973_v51 = vclamps-f32 %v2931_v41, 5.0 }
 0x406   :  { %9096 = vpow2.f32 %v3093_v37  ;;  %v7982_v22 = vclamps-f32 %v2958_v47, 5.0  ;;  %3191 = vperm.xlu0 %9013, %v3124_v36  }
 0x407   :  { %v9087_v52 = vpop.eup %9086  ;;  %9098 = vpow2.f32 %v3095_v44  ;;  %v3079_v46 = vmul.f32 1.442695, %v7973_v51 }
 0x408   :  { %v3097_v15 = vmul.f32 1.442695, %v7982_v22  ;;  %v3125_v29 = vmul.f32 %v9087_v52, %v10112_v58 }
 0x409   :  { %v2922_v35 = vpop.xlane.xlu0 %2921 }
 0x40a   :  { %9100 = vpow2.f32 %v3097_v15  ;;  %v7970_v32 = vclamps-f32 %v2922_v35, 5.0  ;;  %3194 = vperm.xlu1 %9012, %v3125_v29  }
 0x40b   :  { %v9089_v34 = vpop.eup %9088  ;;  %9102 = vpow2.f32 %v3071_v3  ;;  %v3103_v3 = vmul.f32 1.442695, %v7985_v45 }
 0x40c   :  { %v3073_v11 = vmul.f32 1.442695, %v7970_v32  ;;  %v3126_v54 = vmul.f32 %v9089_v34, %v10137_v2  ;;  %v9091_v53 = vpop.eup %9090 }
 0x40d   :  { %v2964_v18 = vpop.xlane.xlu0 %2963  ;;  %v3127_v37 = vmul.f32 %v9091_v53, %v10145_v33 }
 0x40e   :  { %9104 = vpow2.f32 %v3073_v11  ;;  %v7984_v0 = vclamps-f32 %v2964_v18, 5.0  ;;  %3197 = vperm.xlu1 %9012, %v3126_v54  }
 0x40f   :  { %v9093_v27 = vpop.eup %9092  ;;  %9106 = vpow2.f32 %v3099_v21 }
 0x410   :  { %v3101_v44 = vmul.f32 1.442695, %v7984_v0  ;;  %v3128_v47 = vmul.f32 %v9093_v27, %v10160_v62  ;;  %v9095_v36 = vpop.eup %9094 }
 0x411   :  { %v2928_v40 = vpop.xlane.xlu0 %2927  ;;  %v3139_v29 = vmul.f32 %v9095_v36, %v10166_v38 }
 0x412   :  { %9108 = vpow2.f32 %v3101_v44  ;;  %v7972_v22 = vclamps-f32 %v2928_v40, 5.0  ;;  %3200 = vperm.xlu1 %9012, %v3127_v37   ;;  %3203 = vperm.xlu0 %9013, %v3128_v47  }
 0x413   :  { %v9097_v52 = vpop.eup %9096  ;;  %9110 = vpow2.f32 %v3075_v19 }
 0x414   :  { %v3077_v15 = vmul.f32 1.442695, %v7972_v22  ;;  %v3140_v35 = vmul.f32 %v9097_v52, %v10172_v43  ;;  %v9099_v28 = vpop.eup %9098 }
 0x415   :  { %v2970_v32 = vpop.xlane.xlu0 %2969  ;;  %v3141_v0 = vmul.f32 %v9099_v28, %v10174_v30 }
 0x416   :  { %9112 = vpow2.f32 %v3077_v15  ;;  %v7986_v34 = vclamps-f32 %v2970_v32, 5.0  ;;  %3236 = vperm.xlu1 %9012, %v3139_v29   ;;  %3239 = vperm.xlu0 %9013, %v3140_v35  }
 0x417   :  { %v9101_v21 = vpop.eup %9100  ;;  %9114 = vpow2.f32 %v3103_v3  ;;  %v2973_v11 = vpop.xlane.xlu1 %2972 }
 0x418   :  { %v9103_v54 = vpop.eup %9102  ;;  %v3105_v53 = vmul.f32 1.442695, %v7986_v34  ;;  %v7987_v18 = vclamps-f32 %v2973_v11, 5.0  ;;  %v3142_v27 = vmul.f32 %v9101_v21, %v10176_v5 }
 0x419   :  { %v2934_v19 = vpop.xlane.xlu0 %2933  ;;  %v3129_v37 = vmul.f32 %v9103_v54, %v10178_v17 }
 0x41a   :  { %9116 = vpow2.f32 %v3105_v53  ;;  %v7974_v45 = vclamps-f32 %v2934_v19, 5.0  ;;  %3242 = vperm.xlu1 %9012, %v3141_v0   ;;  %3245 = vperm.xlu0 %9013, %v3142_v27   ;;  %v3107_v36 = vmul.f32 1.442695, %v7987_v18 }
 0x41b   :  { %v9105_v41 = vpop.eup %9104  ;;  %9118 = vpow2.f32 %v3079_v46  ;;  %v2937_v44 = vpop.xlane.xlu1 %2936 }
 0x41c   :  { %v9107_v47 = vpop.eup %9106  ;;  %v3081_v40 = vmul.f32 1.442695, %v7974_v45  ;;  %v7975_v22 = vclamps-f32 %v2937_v44, 5.0  ;;  %v3130_v52 = vmul.f32 %v9105_v41, %v10180_v48 }
 0x41d   :  { %v3143_v15 = vmul.f32 %v9107_v47, %v10182_v6 }
 0x41e   :  { %9120 = vpow2.f32 %v3081_v40  ;;  %3206 = vperm.xlu1 %9012, %v3129_v37   ;;  %3209 = vperm.xlu0 %9013, %v3130_v52   ;;  %v3083_v35 = vmul.f32 1.442695, %v7975_v22 }
 0x41f   :  { %v9109_v3 = vpop.eup %9108  ;;  %v2979_v51 = vpop.xlane.xlu1 %2978  ;;  %9122 = vpow2.f32 %v3107_v36 }
 0x420   :  { %v9111_v29 = vpop.eup %9110  ;;  %v7989_v28 = vclamps-f32 %v2979_v51, 5.0  ;;  %v3144_v32 = vmul.f32 %v9109_v3, %v10184_v26  ;;  %9124 = vpow2.f32 %v3083_v35  ;;  %v1656_v51 = vld [vmem:[%s11732_s4 + $0x168] sm:$0xff] }
 0x421   :  { %v3131_v46 = vmul.f32 %v9111_v29, %v10186_v9  ;;  %8684 = vmatprep.subr.mxu1 %v1656_v51  ;;  %v1655_v29 = vld [vmem:[%s11732_s4 + $0x160] sm:$0xff] }
 0x422   :  { %3248 = vperm.xlu1 %9012, %v3143_v15   ;;  %3251 = vperm.xlu0 %9013, %v3144_v32   ;;  %v3111_v54 = vmul.f32 1.442695, %v7989_v28 }
 0x423   :  { %v9113_v34 = vpop.eup %9112  ;;  %v2943_v21 = vpop.xlane.xlu1 %2942  ;;  %8685 = vmatpush3.msra.mxu1 %v1656_v51 }
 0x424   :  { %v9115_v11 = vpop.eup %9114  ;;  %v7977_v53 = vclamps-f32 %v2943_v21, 5.0  ;;  %v3132_v18 = vmul.f32 %v9113_v34, %v10188_v13  ;;  %9126 = vpow2.f32 %v3111_v54  ;;  %8686 = vmatprep.subr.mxu1 %v1655_v29 }
 0x425   :  { %v3145_v19 = vmul.f32 %v9115_v11, %v10190_v24  ;;  %8687 = vmatpush3.msra.mxu1 %v1655_v29 }
 0x426   :  { %3212 = vperm.xlu1 %9012, %v3131_v46   ;;  %3215 = vperm.xlu0 %9013, %v3132_v18   ;;  %v3087_v41 = vmul.f32 1.442695, %v7977_v53 }
 0x427   :  { %v9117_v0 = vpop.eup %9116  ;;  %v2985_v27 = vpop.xlane.xlu1 %2984 }
 0x428   :  { %v9119_v45 = vpop.eup %9118  ;;  %v7991_v44 = vclamps-f32 %v2985_v27, 5.0  ;;  %v3146_v37 = vmul.f32 %v9117_v0, %v10192_v4  ;;  %9128 = vpow2.f32 %v3087_v41 }
 0x429   :  { %v3133_v40 = vmul.f32 %v9119_v45, %v10194_v10 }
 0x42a   :  { %3254 = vperm.xlu1 %9012, %v3145_v19   ;;  %3257 = vperm.xlu0 %9013, %v3146_v37   ;;  %v3115_v22 = vmul.f32 1.442695, %v7991_v44 }
 0x42b   :  { %v9121_v47 = vpop.eup %9120  ;;  %v2991_v36 = vpop.xlane.xlu1 %2990 }
 0x42c   :  { %v7993_v52 = vclamps-f32 %v2991_v36, 5.0  ;;  %v3134_v3 = vmul.f32 %v9121_v47, %v10196_v63  ;;  %v9123_v15 = vpop.eup %9122  ;;  %9130 = vpow2.f32 %v3115_v22 }
 0x42d   :  { %v3147_v28 = vmul.f32 %v9123_v15, %v10198_v56  ;;  %v9125_v32 = vpop.eup %9124 }
 0x42e   :  { %3218 = vperm.xlu1 %9012, %v3133_v40   ;;  %3221 = vperm.xlu0 %9013, %v3134_v3   ;;  %v3119_v35 = vmul.f32 1.442695, %v7993_v52  ;;  %v3135_v34 = vmul.f32 %v9125_v32, %v10202_v49  ;;  %v11946_v32 = vld [vmem:[#allocation40_spill] sm:$0xff] }
 0x430   :  { %9132 = vpow2.f32 %v3119_v35 }
 0x431   :  { %v9127_v21 = vpop.eup %9126 }
 0x432   :  { %3260 = vperm.xlu1 %9012, %v3147_v28   ;;  %v3149_v54 = vmul.f32 %v9127_v21, %v10206_v59 }
 0x435   :  { %v9129_v53 = vpop.eup %9128 }
 0x436   :  { %3224 = vperm.xlu1 %9012, %v3135_v34   ;;  %v3137_v19 = vmul.f32 %v9129_v53, %v10210_v60 }
 0x437   :  { %v2976_v46 = vpop.xlane.xlu0 %2975 }
 0x438   :  { %v7988_v11 = vclamps-f32 %v2976_v46, 5.0 }
 0x439   :  { %v9131_v45 = vpop.eup %9130 }
 0x43a   :  { %v3109_v18 = vmul.f32 1.442695, %v7988_v11  ;;  %3266 = vperm.xlu1 %9012, %v3149_v54   ;;  %v3151_v47 = vmul.f32 %v9131_v45, %v10214_v23 }
 0x43b   :  { %v2940_v0 = vpop.xlane.xlu0 %2939 }
 0x43c   :  { %9134 = vpow2.f32 %v3109_v18  ;;  %v7976_v27 = vclamps-f32 %v2940_v0, 5.0 }
 0x43d   :  { %v9133_v36 = vpop.eup %9132 }
 0x43e   :  { %v3085_v41 = vmul.f32 1.442695, %v7976_v27  ;;  %3230 = vperm.xlu1 %9012, %v3137_v19   ;;  %v3153_v3 = vmul.f32 %v9133_v36, %v10218_v8 }
 0x43f   :  { %v2982_v44 = vpop.xlane.xlu0 %2981 }
 0x440   :  { %9136 = vpow2.f32 %v3085_v41  ;;  %v7990_v37 = vclamps-f32 %v2982_v44, 5.0 }
 0x442   :  { %v3113_v40 = vmul.f32 1.442695, %v7990_v37  ;;  %3272 = vperm.xlu1 %9012, %v3151_v47   ;;  %v11947_v47 = vld [vmem:[#allocation41_spill] sm:$0xff] }
 0x443   :  { %v2946_v22 = vpop.xlane.xlu0 %2945 }
 0x444   :  { %9138 = vpow2.f32 %v3113_v40  ;;  %v7978_v52 = vclamps-f32 %v2946_v22, 5.0 }
 0x446   :  { %v3089_v51 = vmul.f32 1.442695, %v7978_v52  ;;  %3278 = vperm.xlu1 %9012, %v3153_v3  }
 0x447   :  { %v2988_v15 = vpop.xlane.xlu0 %2987 }
 0x448   :  { %9140 = vpow2.f32 %v3089_v51  ;;  %v7992_v29 = vclamps-f32 %v2988_v15, 5.0 }
 0x449   :  { %v9135_v35 = vpop.eup %9134 }
 0x44a   :  { %v3117_v28 = vmul.f32 1.442695, %v7992_v29  ;;  %3457 = vrot.lane.b32.xlu1 %v11946_v32, %s9315_s7  ;;  %v3148_v34 = vmul.f32 %v9135_v35, %v10200_v57 }
 0x44b   :  { %v2994_v21 = vpop.xlane.xlu0 %2993 }
 0x44c   :  { %9142 = vpow2.f32 %v3117_v28  ;;  %v7994_v46 = vclamps-f32 %v2994_v21, 5.0  ;;  %3263 = vperm.xlu0 %9013, %v3148_v34  }
 0x44d   :  { %v9137_v11 = vpop.eup %9136 }
 0x44e   :  { %v3121_v54 = vmul.f32 1.442695, %v7994_v46  ;;  %v3136_v53 = vmul.f32 %v9137_v11, %v10204_v61 }
 0x450   :  { %9144 = vpow2.f32 %v3121_v54  ;;  %3227 = vperm.xlu0 %9013, %v3136_v53  }
 0x451   :  { %v9139_v18 = vpop.eup %9138 }
 0x452   :  { %v3150_v0 = vmul.f32 %v9139_v18, %v10208_v1 }
 0x454   :  { %3269 = vperm.xlu0 %9013, %v3150_v0  }
 0x455   :  { %v9141_v27 = vpop.eup %9140 }
 0x456   :  { %v3138_v19 = vmul.f32 %v9141_v27, %v10212_v31 }
 0x458   :  { %3233 = vperm.xlu0 %9013, %v3138_v19  }
 0x459   :  { %v9143_v45 = vpop.eup %9142 }
 0x45a   :  { %v3152_v41 = vmul.f32 %v9143_v45, %v10216_v16 }
 0x45c   :  { %3275 = vperm.xlu0 %9013, %v3152_v41  }
 0x45d   :  { %v9145_v44 = vpop.eup %9144 }
 0x45e   :  { %v3154_v37 = vmul.f32 %v9145_v44, %v10220_v39 }
 0x460   :  { %3281 = vperm.xlu0 %9013, %v3154_v37  }
 0x461   :  { %v3189_v36 = vpop.permute.xlu1 %3188 }
 0x462   :  { %v3286_v30 = vrot.slane %v3189_v36, %v10302_v42 }
 0x464   :  { %3455 = vrot.lane.b32.xlu0 %v11947_v47, %s9315_s7 }
 0x481   :  { %v3192_v51 = vpop.permute.xlu0 %3191 }
 0x482   :  { %v3290_v56 = vrot.slane %v3192_v51, %v10305_v55 }
 0x485   :  { %v3195_v40 = vpop.permute.xlu1 %3194 }
 0x486   :  { %v3295_v1 = vrot.slane %v3195_v40, %v10302_v42  ;;  %v3291_v40 = vsel %vm2277_vm7, %v3290_v56, %v3286_v30 }
 0x489   :  { %v3198_v22 = vpop.permute.xlu1 %3197 }
 0x48d   :  { %v3201_v52 = vpop.permute.xlu1 %3200  ;;  %v3204_v29 = vpop.permute.xlu0 %3203 }
 0x491   :  { %v10505_v3 = vpop.permute.xlu1 %3236  ;;  %v10511_v32 = vpop.permute.xlu0 %3239 }
 0x495   :  { %v10507_v15 = vpop.permute.xlu1 %3242  ;;  %v10515_v46 = vpop.permute.xlu0 %3245 }
 0x496   :  { %v3367_v56 = vrot.slane %v10507_v15, %v10302_v42 }
 0x499   :  { %v3207_v35 = vpop.permute.xlu1 %3206  ;;  %v3210_v27 = vpop.permute.xlu0 %3209 }
 0x49a   :  { %v3313_v24 = vrot.slane %v3207_v35, %v10302_v42  ;;  %v3317_v57 = vrot.slane %v3210_v27, %v10305_v55 }
 0x49c   :  { %v3318_v35 = vsel %vm2277_vm7, %v3317_v57, %v3313_v24  ;;  %v3371_v57 = vrot.slane %v10515_v46, %v10305_v55 }
 0x49d   :  { %v10509_v28 = vpop.permute.xlu1 %3248  ;;  %v3252_v44 = vpop.permute.xlu0 %3251 }
 0x49e   :  { %v3376_v24 = vrot.slane %v10509_v28, %v10302_v42 }
 0x4a1   :  { %v3213_v34 = vpop.permute.xlu1 %3212  ;;  %v3216_v8 = vpop.permute.xlu0 %3215 }
 0x4a2   :  { %v3322_v4 = vrot.slane %v3213_v34, %v10302_v42 }
 0x4a4   :  { %v10513_v21 = vpop.f32.mrf.mxu1 }
 0x4a5   :  { %v10517_v11 = vpop.permute.xlu1 %3254  ;;  %v3258_v39 = vpop.permute.xlu0 %3257 }
 0x4a6   :  { %v10519_v54 = vpop.f32.mrf.mxu1  ;;  %v3385_v15 = vrot.slane %v10517_v11, %v10302_v42 }
 0x4a8   :  { %v8683_v53 = vpop.f32.mrf.mxu1 }
 0x4a9   :  { %v3219_v18 = vpop.permute.xlu1 %3218  ;;  %v2687_v45 = vmul.f32 %v10450_v7, %v8683_v53  ;;  %v3299_v53 = vrot.slane %v3198_v22, %v10305_v55 }
 0x4aa   :  { %v2677_v0 = vpop.f32.mrf.mxu1 }
 0x4ab   :  { %v2686_v19 = vmul.f32 %v10448_v12, %v2677_v0  ;;  %v3222_v12 = vpop.permute.xlu0 %3221  ;;  %v3300_v22 = vsel %vm2277_vm7, %v3299_v53, %v3295_v1  ;;  %v3358_v1 = vrot.slane %v10505_v3, %v10302_v42  ;;  %v3389_v53 = vrot.slane %v3258_v39, %v10305_v55 }
 0x4ac   :  { %v3335_v51 = vrot.slane %v3222_v12, %v10305_v55  ;;  %v3427_v34 = vsel %vm2414_vm8, %v3300_v22, %v3291_v40 }
 0x4ad   :  { %8688 = vmatprep.mubr.msk.f32.mxu1 %vm1671_vm6, %v2686_v19  ;;  %v10524_v41 = vpop.permute.xlu1 %3260  ;;  %v3304_v19 = vrot.slane %v3201_v52, %v10302_v42 }
 0x4ae   :  { %8689 = vmatmul.mubr.msk.f32.vlgmr.msra.gmra.mxu1 %vm1671_vm6, %v2687_v45  ;;  %v3308_v45 = vrot.slane %v3204_v29, %v10305_v55  ;;  %v3331_v29 = vrot.slane %v3219_v18, %v10302_v42  ;;  %v3362_v18 = vrot.slane %v10511_v32, %v10305_v55 }
 0x4b0   :  { %v3309_v52 = vsel %vm2277_vm7, %v3308_v45, %v3304_v19  ;;  %v3363_v11 = vsel %vm2277_vm7, %v3362_v18, %v3358_v1 }
 0x4b1   :  { %v3225_v37 = vpop.permute.xlu1 %3224  ;;  %v3428_v36 = vsel %vm2416_vm9, %v3309_v52, %v3427_v34 }
 0x4b2   :  { %v3340_v12 = vrot.slane %v3225_v37, %v10302_v42  ;;  %v3429_v30 = vsel %vm2418_vm10, %v3318_v35, %v3428_v36 }
 0x4b5   :  { %v10527_v47 = vpop.permute.xlu1 %3266 }
 0x4b6   :  { %v3403_v40 = vrot.slane %v10527_v47, %v10302_v42 }
 0x4b9   :  { %v3231_v23 = vpop.permute.xlu1 %3230 }
 0x4ba   :  { %v3349_v46 = vrot.slane %v3231_v23, %v10302_v42  ;;  %v3394_v23 = vrot.slane %v10524_v41, %v10302_v42 }
 0x4bd   :  { %v10529_v59 = vpop.permute.xlu1 %3272 }
 0x4be   :  { %v3412_v34 = vrot.slane %v10529_v59, %v10302_v42 }
 0x4c1   :  { %v10531_v16 = vpop.permute.xlu1 %3278 }
 0x4c5   :  { %v3458_v0 = vpop.permute.xlu1 %3457 }
 0x4c6   :  { %8691 = vmatprep.subr.mxu1 %v3458_v0 }
 0x4c7   :  { %8692 = vmatpush3.msra.mxu1 %v3458_v0  ;;  %v3264_v7 = vpop.permute.xlu0 %3263  ;;  %v3326_v0 = vrot.slane %v3216_v8, %v10305_v55 }
 0x4c8   :  { %v3398_v45 = vrot.slane %v3264_v7, %v10305_v55 }
 0x4c9   :  { %v3327_v8 = vsel %vm2277_vm7, %v3326_v0, %v3322_v4  ;;  %v3380_v4 = vrot.slane %v3252_v44, %v10305_v55  ;;  %v3372_v44 = vsel %vm2277_vm7, %v3371_v57, %v3367_v56 }
 0x4ca   :  { %v3430_v3 = vsel %vm2420_vm11, %v3327_v8, %v3429_v30  ;;  %v3399_v41 = vsel %vm2277_vm7, %v3398_v45, %v3394_v23  ;;  %v1657_v23 = vld [vmem:[%s11732_s4 + $0x170] sm:$0xff] }
 0x4cb   :  { %v3228_v6 = vpop.permute.xlu0 %3227  ;;  %v3381_v39 = vsel %vm2277_vm7, %v3380_v4, %v3376_v24 }
 0x4cc   :  { %v3344_v27 = vrot.slane %v3228_v6, %v10305_v55  ;;  %v3336_v6 = vsel %vm2277_vm7, %v3335_v51, %v3331_v29  ;;  %v3390_v51 = vsel %vm2277_vm7, %v3389_v53, %v3385_v15 }
 0x4cd   :  { %v3431_v28 = vsel %vm2422_vm12, %v3336_v6, %v3430_v3 }
 0x4ce   :  { %v3345_v32 = vsel %vm2277_vm7, %v3344_v27, %v3340_v12  ;;  %v3434_v27 = vsel %vm2414_vm8, %v3372_v44, %v3363_v11  ;;  %v3421_v12 = vrot.slane %v10531_v16, %v10302_v42  ;;  %v1654_v16 = vld [vmem:[%s11732_s4 + $0x150] sm:$0xff] }
 0x4cf   :  { %v3270_v26 = vpop.permute.xlu0 %3269  ;;  %v3432_v52 = vsel %vm2424_vm13, %v3345_v32, %v3431_v28  ;;  %v3435_v8 = vsel %vm2416_vm9, %v3381_v39, %v3434_v27  ;;  %v1653_v32 = vld [vmem:[%s11732_s4 + $0x148] sm:$0xff]  ;;  %v1658_v39 = vld [vmem:[%s11732_s4 + $0x178] sm:$0xff] }
 0x4d0   :  { %v3407_v0 = vrot.slane %v3270_v26, %v10305_v55  ;;  %v3436_v47 = vsel %vm2418_vm10, %v3390_v51, %v3435_v8  ;;  %v11948_v27 = vld [vmem:[#allocation5_spill] sm:$0xff] }
 0x4d1   :  { %v3437_v56 = vsel %vm2420_vm11, %v3399_v41, %v3436_v47 }
 0x4d2   :  { %v3408_v36 = vsel %vm2277_vm7, %v3407_v0, %v3403_v40 }
 0x4d3   :  { %v3234_v37 = vpop.permute.xlu0 %3233  ;;  %v3438_v59 = vsel %vm2422_vm12, %v3408_v36, %v3437_v56  ;;  %v11949_v36 = vld [vmem:[#allocation7_spill] sm:$0xff] }
 0x4d4   :  { %v3353_v19 = vrot.slane %v3234_v37, %v10305_v55 }
 0x4d6   :  { %v3354_v22 = vsel %vm2277_vm7, %v3353_v19, %v3349_v46 }
 0x4d7   :  { %v3276_v29 = vpop.permute.xlu0 %3275  ;;  %v3433_v7 = vsel %vm2426_vm14, %v3354_v22, %v3432_v52 }
 0x4d8   :  { %v3416_v26 = vrot.slane %v3276_v29, %v10305_v55  ;;  %8695 = vmatprep.mubr.msk.f32.mxu1 %vm1671_vm6, %v3433_v7  ;;  %v3443_v35 = vsel %vm1671_vm6, %v3433_v7, 0.0  ;;  %v7921_v29 = vld [vmem:[%s11732_s4 + $0x158] ss:$0 sm:$0xff] }
 0x4d9   :  { %3444 = vadd.xlane.f32.xlu1 %v3443_v35  ;;  %v2609_v40 = vadd.f32 %v7921_v29, %v10519_v54  ;;  %v4075_v54 = vld [vmem:[%s11732_s4 + $0x248] sm:$0xff] }
 0x4da   :  { %v3417_v1 = vsel %vm2277_vm7, %v3416_v26, %v3412_v34 }
 0x4db   :  { %v3282_v18 = vpop.permute.xlu0 %3281  ;;  %v3439_v6 = vsel %vm2424_vm13, %v3417_v1, %v3438_v59  ;;  %v4074_v59 = vld [vmem:[%s11732_s4 + $0x240] sm:$0xff] }
 0x4dc   :  { %v3425_v57 = vrot.slane %v3282_v18, %v10305_v55 }
 0x4de   :  { %v3426_v30 = vsel %vm2277_vm7, %v3425_v57, %v3421_v12 }
 0x4df   :  { %v3456_v24 = vpop.permute.xlu0 %3455  ;;  %v3440_v4 = vsel %vm2426_vm14, %v3426_v30, %v3439_v6  ;;  %v4073_v30 = vld [vmem:[%s11732_s4 + $0x238] sm:$0xff] }
 0x4e0   :  { %8693 = vmatprep.subr.mxu1 %v3456_v24  ;;  %v3446_v3 = vsel %vm1671_vm6, %v3440_v4, 0.0  ;;  %v4084_v6 = vld [vmem:[%s11732_s4 + $0x298] sm:$0xff] }
 0x4e1   :  { %3447 = vadd.xlane.f32.xlu0 %v3446_v3  ;;  %8694 = vmatpush3.msra.mxu1 %v3456_v24 }
 0x4e2   :  { %8696 = vmatmul.mubr.msk.f32.vlgmr.msra.gmra.mxu1 %vm1671_vm6, %v3440_v4  ;;  %8698 = vmatprep.subr.mxu1 %v1654_v16 }
 0x4e3   :  { %8699 = vmatpush3.msra.mxu1 %v1654_v16 }
 0x4e4   :  { %8700 = vmatprep.subr.mxu1 %v1653_v32 }
 0x4e5   :  { %8701 = vmatpush3.msra.mxu1 %v1653_v32 }
 0x4ea   :  { %3627 = vrot.lane.b32.xlu1 %v11945_v25, %s9315_s7 }
 0x4f7   :  { %3629 = vrot.lane.b32.xlu0 %v10397_v50, %s9315_s7 }
 0x562   :  { %v3445_v53 = vpop.xlane.xlu1 %3444 }
 0x563   :  { %v3449_v25 = vadd.f32 1e-06, %v3445_v53 }
 0x565   :  { %9146 = vrcp.f32 %v3449_v25 }
 0x566   :  { %v3628_v50 = vpop.permute.xlu1 %3627 }
 0x56a   :  { %v3448_v37 = vpop.xlane.xlu0 %3447 }
 0x56b   :  { %v3450_v46 = vadd.f32 1e-06, %v3448_v37 }
 0x56d   :  { %9148 = vrcp.f32 %v3450_v46 }
 0x56e   :  { %v3630_v15 = vpop.permute.xlu0 %3629  ;;  %v10619_v19 = vpop.f32.mrf.mxu1 }
 0x56f   :  { %8705 = vmatprep.subr.mxu1 %v3630_v15 }
 0x570   :  { %v10621_v45 = vpop.f32.mrf.mxu1 }
 0x572   :  { %v9147_v44 = vpop.eup %9146 }
 0x57a   :  { %v9149_v22 = vpop.eup %9148 }
 0x5a2   :  { %v8697_v28 = vpop.f32.mrf.mxu1 }
 0x5a3   :  { %v3541_v11 = vmul.f32 %v9149_v22, %v8697_v28  ;;  %v3843_v28 = vld [vmem:[%s11732_s4 + $0x1b0] sm:$0xff] }
 0x5a4   :  { %v3531_v0 = vpop.f32.mrf.mxu1 }
 0x5a5   :  { %v3540_v52 = vmul.f32 %v9147_v44, %v3531_v0  ;;  %v3841_v0 = vld [vmem:[%s11732_s4 + $0x1a0] sm:$0xff] }
 0x5a7   :  { %8702 = vmatprep.mubr.msk.f32.mxu1 %vm1671_vm6, %v3540_v52  ;;  %v7922_v52 = vld [vmem:[%s11732_s4 + $0x180] ss:$0 sm:$0xff] }
 0x5a8   :  { %8703 = vmatmul.mubr.msk.f32.vlgmr.msra.gmra.mxu1 %vm1671_vm6, %v3541_v11  ;;  %v2770_v11 = vadd.f32 %v10619_v19, %v7922_v52  ;;  %v4083_v19 = vld [vmem:[%s11732_s4 + $0x290] sm:$0xff] }
 0x5a9   :  { %8706 = vmatpush3.msra.mxu1 %v3630_v15  ;;  %8709 = vmatprep.mubr.msk.f32.mxu1 %vm1671_vm6, %v3433_v7  ;;  %v2610_v7 = vadd.f32 %v10513_v21, %v7921_v29  ;;  %v4076_v21 = vld [vmem:[%s11732_s4 + $0x250] sm:$0xff] }
 0x5aa   :  { %8707 = vmatprep.subr.mxu1 %v3628_v50  ;;  %8749 = vmatprep.subr.mxu0 %v4076_v21 }
 0x5ab   :  { %8708 = vmatpush3.msra.mxu1 %v3628_v50  ;;  %8750 = vmatpush3.msra.mxu0 %v4076_v21  ;;  %v8003_v21 = vld [vmem:[%s11732_s4 + $0x188] ss:$0 sm:$0xff] }
 0x5ac   :  { %8710 = vmatmul.mubr.msk.f32.vlgmr.msra.gmra.mxu1 %vm1671_vm6, %v3440_v4  ;;  %8712 = vmatprep.subr.mxu1 %v1658_v39 }
 0x5ad   :  { %8713 = vmatpush3.msra.mxu1 %v1658_v39  ;;  %8751 = vmatprep.subr.mxu0 %v4075_v54  ;;  %v2769_v39 = vadd.f32 %v7922_v52, %v10621_v45  ;;  %v4082_v45 = vld [vmem:[%s11732_s4 + $0x288] sm:$0xff] }
 0x5ae   :  { %8714 = vmatprep.subr.mxu1 %v1657_v23  ;;  %8752 = vmatpush3.msra.mxu0 %v4075_v54 }
 0x5af   :  { %8715 = vmatpush3.msra.mxu1 %v1657_v23  ;;  %8753 = vmatprep.subr.mxu0 %v4074_v59 }
 0x5b0   :  { %8754 = vmatpush3.msra.mxu0 %v4074_v59  ;;  %8719 = vmatprep.subr.mxu1 %v3843_v28  ;;  %v8004_v59 = vld [vmem:[%s11732_s4 + $0x190] ss:$0 sm:$0xff] }
 0x5b1   :  { %8755 = vmatprep.subr.mxu0 %v4073_v30 }
 0x5b2   :  { %8756 = vmatpush3.msra.mxu0 %v4073_v30 }
 0x5b3   :  { %8771 = vmatprep.subr.mxu0 %v4084_v6 }
 0x668   :  { %v8704_v51 = vpop.f32.mrf.mxu1 }
 0x669   :  { %v3624_v26 = vadd.f32 %v8704_v51, %v2610_v7 }
 0x66a   :  { %v3614_v35 = vpop.f32.mrf.mxu1 }
 0x66b   :  { %v3796_v34 = vadd.f32 %v11948_v27, %v3624_v26  ;;  %v3623_v41 = vadd.f32 %v3614_v35, %v2609_v40  ;;  %v11950_v26 = vld [vmem:[#allocation4_spill] sm:$0xff]  ;;  %v11952_v27 = vld [vmem:[#allocation6_spill] sm:$0xff] }
 0x66c   :  { %v8711_v8 = vpop.f32.mrf.mxu1 }
 0x66d   :  { %v3795_v47 = vadd.f32 %v3623_v41, %v11949_v36  ;;  %v3804_v1 = vsel %vm582_vm5, %v3796_v34, 0.0  ;;  %v3709_v57 = vmul.f32 %v9149_v22, %v8711_v8  ;;  %v3840_v22 = vld [vmem:[%s11732_s4 + $0x198] sm:$0xff]  ;;  %v4081_v41 = vld [vmem:[%s11732_s4 + $0x280] sm:$0xff] }
 0x66e   :  { %3805 = vadd.xlane.f32.xlu0 %v3804_v1  ;;  %v3699_v18 = vpop.f32.mrf.mxu1 }
 0x66f   :  { %v3708_v12 = vmul.f32 %v9147_v44, %v3699_v18  ;;  %v3801_v56 = vsel %vm582_vm5, %v3795_v47, 0.0  ;;  %v3842_v44 = vld [vmem:[%s11732_s4 + $0x1a8] sm:$0xff] }
 0x670   :  { %3802 = vadd.xlane.f32.xlu1 %v3801_v56  ;;  %v3939_v56 = vld [vmem:[%s11732_s4 + $0x1f8] sm:$0xff] }
 0x671   :  { %8716 = vmatprep.mubr.msk.f32.mxu1 %vm1671_vm6, %v3708_v12 }
 0x672   :  { %8717 = vmatmul.mubr.msk.f32.vlgmr.msra.gmra.mxu1 %vm1671_vm6, %v3709_v57 }
 0x673   :  { %8720 = vmatpush3.msra.mxu1 %v3843_v28  ;;  %v3932_v28 = vld [vmem:[%s11732_s4 + $0x1c0] sm:$0xff] }
 0x674   :  { %8721 = vmatprep.subr.mxu1 %v3842_v44 }
 0x675   :  { %8722 = vmatpush3.msra.mxu1 %v3842_v44  ;;  %v8005_v44 = vld [vmem:[%s11732_s4 + $0x1b8] ss:$0 sm:$0xff] }
 0x676   :  { %8723 = vmatprep.subr.mxu1 %v3841_v0 }
 0x677   :  { %8724 = vmatpush3.msra.mxu1 %v3841_v0 }
 0x678   :  { %8725 = vmatprep.subr.mxu1 %v3840_v22 }
 0x679   :  { %8726 = vmatpush3.msra.mxu1 %v3840_v22 }
 0x67a   :  { %8730 = vmatprep.subr.mxu1 %v3939_v56 }
 0x6f7   :  { %v3806_v24 = vpop.xlane.xlu0 %3805 }
 0x6f8   :  { %v3809_v4 = vmul.f32 0.03125, %v3806_v24 }
 0x6f9   :  { %v3803_v3 = vpop.xlane.xlu1 %3802 }
 0x6fa   :  { %v3808_v16 = vmul.f32 0.03125, %v3803_v3  ;;  %v10659_v32 = vsub.f32 %v3796_v34, %v3809_v4 }
 0x6fc   :  { %v3810_v37 = vsub.f32 %v3795_v47, %v3808_v16  ;;  %v3813_v25 = vmul.f32 %v10659_v32, %v10659_v32 }
 0x6fe   :  { %v3812_v15 = vmul.f32 %v3810_v37, %v3810_v37  ;;  %v3817_v46 = vsel %vm582_vm5, %v3813_v25, 0.0  ;;  %v3934_v25 = vld [vmem:[%s11732_s4 + $0x1d0] sm:$0xff] }
 0x700   :  { %v3814_v53 = vsel %vm582_vm5, %v3812_v15, 0.0  ;;  %v3938_v15 = vld [vmem:[%s11732_s4 + $0x1f0] sm:$0xff] }
 0x701   :  { %3815 = vadd.xlane.f32.xlu0 %v3814_v53  ;;  %v3935_v53 = vld [vmem:[%s11732_s4 + $0x1d8] sm:$0xff] }
 0x705   :  { %3818 = vadd.xlane.f32.xlu0 %v3817_v46  ;;  %v3933_v46 = vld [vmem:[%s11732_s4 + $0x1c8] sm:$0xff] }
 0x732   :  { %v8718_v50 = vpop.f32.mrf.mxu1 }
 0x733   :  { %v3792_v23 = vadd.f32 %v8718_v50, %v2770_v11 }
 0x734   :  { %v3782_v29 = vpop.f32.mrf.mxu1 }
 0x735   :  { %v3791_v7 = vadd.f32 %v3782_v29, %v2769_v39  ;;  %9150 = vtanh.f32 %v3792_v23  ;;  %v8008_v23 = vld [vmem:[%s11732_s4 + $0x200] ss:$0 sm:$0xff] }
 0x737   :  { %9152 = vtanh.f32 %v3791_v7 }
 0x742   :  { %v9151_v51 = vpop.eup %9150 }
 0x743   :  { %v10686_v34 = vadd.f32 %v9151_v51, %v11952_v27 }
 0x744   :  { %v9153_v40 = vpop.eup %9152 }
 0x745   :  { %v10683_v35 = vadd.f32 %v9153_v40, %v11950_v26  ;;  %11953 = vst [vmem:[#allocation45_spill] sm:$0xff] %v10686_v34 }
 0x747   :  { %11951 = vst [vmem:[#allocation46_spill] sm:$0xff] %v10683_v35  ;;  %8757 = vmatprep.mubr.msk.f32.mxu0 %vm582_vm5, %v10683_v35 }
 0x748   :  { %8758 = vmatmul.mubr.msk.f32.vlgmr.msra.gmra.mxu0 %vm582_vm5, %v10686_v34 }
 0x749   :  { %8772 = vmatpush3.msra.mxu0 %v4084_v6  ;;  %8779 = vmatprep.mubr.msk.f32.mxu0 %vm582_vm5, %v10683_v35 }
 0x74a   :  { %8773 = vmatprep.subr.mxu0 %v4083_v19 }
 0x74b   :  { %8774 = vmatpush3.msra.mxu0 %v4083_v19 }
 0x74c   :  { %8775 = vmatprep.subr.mxu0 %v4082_v45 }
 0x74d   :  { %8776 = vmatpush3.msra.mxu0 %v4082_v45 }
 0x74e   :  { %8777 = vmatprep.subr.mxu0 %v4081_v41 }
 0x74f   :  { %8778 = vmatpush3.msra.mxu0 %v4081_v41 }
 0x750   :  { %8780 = vmatmul.mubr.msk.f32.vlgmr.msra.gmra.mxu0 %vm582_vm5, %v10686_v34 }
 0x78a   :  { %v3816_v8 = vpop.xlane.xlu0 %3815 }
 0x78b   :  { %v3820_v36 = vmul.f32 0.03125, %v3816_v8 }
 0x78d   :  { %v3822_v47 = vadd.f32 1e-05, %v3820_v36 }
 0x78e   :  { %v3819_v1 = vpop.xlane.xlu0 %3818 }
 0x78f   :  { %9154 = vrsqrt.f32 %v3822_v47  ;;  %v3821_v18 = vmul.f32 0.03125, %v3819_v1 }
 0x791   :  { %v3823_v12 = vadd.f32 1e-05, %v3821_v18 }
 0x793   :  { %9156 = vrsqrt.f32 %v3823_v12 }
 0x79c   :  { %v9155_v57 = vpop.eup %9154 }
 0x79d   :  { %v3826_v54 = vmul.f32 %v9155_v57, %v3810_v37  ;;  %v3937_v37 = vld [vmem:[%s11732_s4 + $0x1e8] sm:$0xff] }
 0x79f   :  { %v3832_v30 = vmul.f32 %v8003_v21, %v3826_v54  ;;  %v4072_v54 = vld [vmem:[%s11732_s4 + $0x230] sm:$0xff] }
 0x7a0   :  { %v9157_v6 = vpop.eup %9156 }
 0x7a1   :  { %v3827_v24 = vmul.f32 %v9157_v6, %v10659_v32  ;;  %v3838_v4 = vadd.f32 %v8004_v59, %v3832_v30  ;;  %v3936_v32 = vld [vmem:[%s11732_s4 + $0x1e0] sm:$0xff]  ;;  %v4071_v30 = vld [vmem:[%s11732_s4 + $0x228] sm:$0xff] }
 0x7a2   :  { %v4413_v6 = vld [vmem:[%s11732_s4 + $0x2e0] sm:$0xff] }
 0x7a3   :  { %v3833_v3 = vmul.f32 %v8003_v21, %v3827_v24  ;;  %8727 = vmatprep.mubr.msk.f32.mxu1 %vm582_vm5, %v3838_v4  ;;  %v4070_v24 = vld [vmem:[%s11732_s4 + $0x220] sm:$0xff] }
 0x7a5   :  { %v3839_v16 = vadd.f32 %v8004_v59, %v3833_v3  ;;  %v4414_v59 = vld [vmem:[%s11732_s4 + $0x2e8] sm:$0xff]  ;;  %v4069_v3 = vld [vmem:[%s11732_s4 + $0x218] sm:$0xff] }
 0x7a6   :  { %8793 = vmatprep.subr.mxu0 %v4414_v59 }
 0x7a7   :  { %8728 = vmatmul.mubr.msk.f32.vlgmr.msra.gmra.mxu1 %vm582_vm5, %v3839_v16  ;;  %8794 = vmatpush3.msra.mxu0 %v4414_v59  ;;  %v11962_v59 = vld [vmem:[#allocation14_spill] sm:$0xff] }
 0x7a8   :  { %8731 = vmatpush3.msra.mxu1 %v3939_v56  ;;  %8795 = vmatprep.subr.mxu0 %v4413_v6 }
 0x7a9   :  { %8732 = vmatprep.subr.mxu1 %v3938_v15  ;;  %8796 = vmatpush3.msra.mxu0 %v4413_v6  ;;  %v11964_v6 = vld [vmem:[#allocation16_spill] sm:$0xff] }
 0x7aa   :  { %8733 = vmatpush3.msra.mxu1 %v3938_v15  ;;  %v4080_v15 = vld [vmem:[%s11732_s4 + $0x278] sm:$0xff] }
 0x7ab   :  { %8734 = vmatprep.subr.mxu1 %v3937_v37 }
 0x7ac   :  { %8735 = vmatpush3.msra.mxu1 %v3937_v37  ;;  %v4582_v37 = vld [vmem:[%s11732_s4 + $0x2c0] sm:$0xff] }
 0x7ad   :  { %8736 = vmatprep.subr.mxu1 %v3936_v32 }
 0x7ae   :  { %8737 = vmatpush3.msra.mxu1 %v3936_v32 }
 0x7af   :  { %8738 = vmatprep.subr.mxu1 %v3935_v53 }
 0x7b0   :  { %8739 = vmatpush3.msra.mxu1 %v3935_v53 }
 0x7b1   :  { %8740 = vmatprep.subr.mxu1 %v3934_v25 }
 0x7b2   :  { %8741 = vmatpush3.msra.mxu1 %v3934_v25 }
 0x7b3   :  { %8742 = vmatprep.subr.mxu1 %v3933_v46 }
 0x7b4   :  { %8743 = vmatpush3.msra.mxu1 %v3933_v46 }
 0x7b5   :  { %8744 = vmatprep.subr.mxu1 %v3932_v28 }
 0x7b6   :  { %8745 = vmatpush3.msra.mxu1 %v3932_v28 }
 0x7b7   :  { %8760 = vmatprep.subr.mxu1 %v4072_v54 }
 0x867   :  { %v8729_v0 = vpop.f32.mrf.mxu1 }
 0x868   :  { %v3927_v22 = vadd.f32 %v8729_v0, %v8005_v44 }
 0x869   :  { %v3921_v52 = vpop.f32.mrf.mxu1 }
 0x86a   :  { %v3922_v11 = vadd.f32 %v8005_v44, %v3921_v52  ;;  %v3931_v39 = vmax.f32 %v3927_v22, 0.0  ;;  %v8011_v22 = vld [vmem:[%s11732_s4 + $0x208] ss:$0 sm:$0xff] }
 0x86c   :  { %v3930_v50 = vmax.f32 %v3922_v11, 0.0 }
 0x86e   :  { %8746 = vmatprep.mubr.msk.f32.mxu1 %vm3945_vm15, %v3930_v50 }
 0x86f   :  { %8747 = vmatmul.mubr.msk.f32.vlgmr.msra.gmra.mxu1 %vm3945_vm15, %v3931_v39 }
 0x870   :  { %8761 = vmatpush3.msra.mxu1 %v4072_v54  ;;  %v11961_v54 = vld [vmem:[#allocation13_spill] sm:$0xff] }
 0x871   :  { %8762 = vmatprep.subr.mxu1 %v4071_v30 }
 0x872   :  { %8763 = vmatpush3.msra.mxu1 %v4071_v30  ;;  %v11963_v30 = vld [vmem:[#allocation15_spill] sm:$0xff] }
 0x873   :  { %8764 = vmatprep.subr.mxu1 %v4070_v24 }
 0x874   :  { %8765 = vmatpush3.msra.mxu1 %v4070_v24  ;;  %v11965_v24 = vld [vmem:[#allocation17_spill] sm:$0xff] }
 0x875   :  { %8766 = vmatprep.subr.mxu1 %v4069_v3 }
 0x876   :  { %8767 = vmatpush3.msra.mxu1 %v4069_v3  ;;  %v11967_v3 = vld [vmem:[#allocation19_spill] sm:$0xff] }
 0x877   :  { %8782 = vmatprep.subr.mxu1 %v4080_v15 }
 0x92f   :  { %v8748_v29 = vpop.f32.mrf.mxu1 }
 0x930   :  { %v4024_v7 = vadd.f32 %v8748_v29, %v8008_v23 }
 0x931   :  { %v4018_v51 = vpop.f32.mrf.mxu1 }
 0x932   :  { %v4028_v40 = vadd.f32 %v4024_v7, %v3839_v16  ;;  %v4019_v26 = vadd.f32 %v8008_v23, %v4018_v51  ;;  %v4411_v16 = vld [vmem:[%s11732_s4 + $0x2d0] sm:$0xff] }
 0x933   :  { %v8012_v23 = vld [vmem:[%s11732_s4 + $0x210] ss:$0 sm:$0xff] }
 0x934   :  { %v4027_v27 = vadd.f32 %v4019_v26, %v3838_v4  ;;  %v4034_v19 = vsel %vm582_vm5, %v4028_v40, 0.0  ;;  %v4412_v4 = vld [vmem:[%s11732_s4 + $0x2d8] sm:$0xff] }
 0x935   :  { %4035 = vadd.xlane.f32.xlu0 %v4034_v19  ;;  %8797 = vmatprep.subr.mxu0 %v4412_v4  ;;  %v4581_v26 = vld [vmem:[%s11732_s4 + $0x2b8] sm:$0xff]  ;;  %v4580_v19 = vld [vmem:[%s11732_s4 + $0x2b0] sm:$0xff] }
 0x936   :  { %v4031_v45 = vsel %vm582_vm5, %v4027_v27, 0.0  ;;  %8798 = vmatpush3.msra.mxu0 %v4412_v4  ;;  %v11966_v4 = vld [vmem:[#allocation18_spill] sm:$0xff] }
 0x937   :  { %4032 = vadd.xlane.f32.xlu1 %v4031_v45  ;;  %8799 = vmatprep.subr.mxu0 %v4411_v16  ;;  %v11956_v45 = vld [vmem:[#allocation8_spill] sm:$0xff] }
 0x938   :  { %8800 = vmatpush3.msra.mxu0 %v4411_v16  ;;  %v11968_v16 = vld [vmem:[#allocation20_spill] sm:$0xff] }
 0x939   :  { %8815 = vmatprep.subr.mxu0 %v4582_v37 }
 0x9be   :  { %v4036_v41 = vpop.xlane.xlu0 %4035 }
 0x9bf   :  { %v4038_v8 = vmul.f32 0.03125, %v4036_v41  ;;  %v4077_v41 = vld [vmem:[%s11732_s4 + $0x260] sm:$0xff] }
 0x9c0   :  { %v4033_v36 = vpop.xlane.xlu1 %4032 }
 0x9c1   :  { %v4040_v47 = vsub.f32 %v4028_v40, %v4038_v8  ;;  %v4037_v1 = vmul.f32 0.03125, %v4033_v36  ;;  %v4079_v40 = vld [vmem:[%s11732_s4 + $0x270] sm:$0xff]  ;;  %v4579_v8 = vld [vmem:[%s11732_s4 + $0x2a8] sm:$0xff] }
 0x9c2   :  { %v4498_v36 = vld [vmem:[%s11732_s4 + $0x310] sm:$0xff] }
 0x9c3   :  { %v4039_v18 = vsub.f32 %v4027_v27, %v4037_v1  ;;  %v4042_v12 = vmul.f32 %v4040_v47, %v4040_v47  ;;  %v4078_v27 = vld [vmem:[%s11732_s4 + $0x268] sm:$0xff]  ;;  %v11957_v1 = vld [vmem:[#allocation10_spill] sm:$0xff] }
 0x9c5   :  { %v4046_v56 = vsel %vm582_vm5, %v4042_v12, 0.0  ;;  %v4041_v57 = vmul.f32 %v4039_v18, %v4039_v18  ;;  %v4496_v12 = vld [vmem:[%s11732_s4 + $0x300] sm:$0xff] }
 0x9c6   :  { %4047 = vadd.xlane.f32.xlu0 %v4046_v56  ;;  %v4495_v56 = vld [vmem:[%s11732_s4 + $0x2f8] sm:$0xff] }
 0x9c7   :  { %v4043_v21 = vsel %vm582_vm5, %v4041_v57, 0.0  ;;  %v11959_v57 = vld [vmem:[#allocation12_spill] sm:$0xff] }
 0x9c8   :  { %4044 = vadd.xlane.f32.xlu1 %v4043_v21  ;;  %v11960_v21 = vld [vmem:[#allocation11_spill] sm:$0xff] }
 0xa4f   :  { %v4048_v32 = vpop.xlane.xlu0 %4047 }
 0xa50   :  { %v4050_v53 = vmul.f32 0.03125, %v4048_v32  ;;  %v11971_v32 = vld [vmem:[#allocation23_spill] sm:$0xff] }
 0xa51   :  { %v4045_v25 = vpop.xlane.xlu1 %4044 }
 0xa52   :  { %v4052_v46 = vadd.f32 1e-05, %v4050_v53  ;;  %v4049_v28 = vmul.f32 0.03125, %v4045_v25  ;;  %v11972_v53 = vld [vmem:[#allocation24_spill] sm:$0xff]  ;;  %v11973_v25 = vld [vmem:[#allocation25_spill] sm:$0xff] }
 0xa54   :  { %9158 = vrsqrt.f32 %v4052_v46  ;;  %v4051_v44 = vadd.f32 1e-05, %v4049_v28  ;;  %v11974_v46 = vld [vmem:[#allocation26_spill] sm:$0xff]  ;;  %v11975_v28 = vld [vmem:[#allocation27_spill] sm:$0xff] }
 0xa56   :  { %9160 = vrsqrt.f32 %v4051_v44  ;;  %v11976_v44 = vld [vmem:[#allocation28_spill] sm:$0xff] }
 0xa61   :  { %v9159_v0 = vpop.eup %9158 }
 0xa62   :  { %v4056_v52 = vmul.f32 %v9159_v0, %v4040_v47  ;;  %v4497_v47 = vld [vmem:[%s11732_s4 + $0x308] sm:$0xff]  ;;  %v11977_v0 = vld [vmem:[#allocation29_spill] sm:$0xff] }
 0xa63   :  { %v9161_v11 = vpop.eup %9160 }
 0xa64   :  { %v4055_v50 = vmul.f32 %v9161_v11, %v4039_v18  ;;  %v4062_v39 = vmul.f32 %v8011_v22, %v4056_v52  ;;  %v11958_v18 = vld [vmem:[#allocation9_spill] sm:$0xff]  ;;  %v11979_v52 = vld [vmem:[#allocation31_spill] sm:$0xff]  ;;  %v11980_v11 = vld [vmem:[#allocation32_spill] sm:$0xff] }
 0xa66   :  { %v4061_v29 = vmul.f32 %v8011_v22, %v4055_v50  ;;  %v10788_v51 = vadd.f32 %v8012_v23, %v4062_v39  ;;  %v11978_v22 = vld [vmem:[#allocation30_spill] sm:$0xff]  ;;  %v11981_v50 = vld [vmem:[#allocation33_spill] sm:$0xff] }
 0xa67   :  { %v11982_v39 = vld [vmem:[#allocation34_spill] sm:$0xff] }
 0xa68   :  { %v10786_v7 = vadd.f32 %v8012_v23, %v4061_v29  ;;  %11955 = vst [vmem:[#allocation53_spill] sm:$0xff] %v10788_v51  ;;  %v11983_v23 = vld [vmem:[#allocation35_spill] sm:$0xff]  ;;  %v11984_v29 = vld [vmem:[#allocation36_spill] sm:$0xff] }
 0xa6a   :  { %11954 = vst [vmem:[#allocation54_spill] sm:$0xff] %v10786_v7  ;;  %8768 = vmatprep.mubr.msk.f32.mxu1 %vm582_vm5, %v10786_v7  ;;  %8801 = vmatprep.mubr.msk.f32.mxu0 %vm582_vm5, %v10786_v7 }
 0xa6b   :  { %8769 = vmatmul.mubr.msk.f32.vlgmr.msra.gmra.mxu1 %vm582_vm5, %v10788_v51  ;;  %8802 = vmatmul.mubr.msk.f32.vlgmr.msra.gmra.mxu0 %vm582_vm5, %v10788_v51 }
 0xa6c   :  { %8783 = vmatpush3.msra.mxu1 %v4080_v15  ;;  %8816 = vmatpush3.msra.mxu0 %v4582_v37  ;;  %v11969_v15 = vld [vmem:[#allocation21_spill] sm:$0xff]  ;;  %v11970_v37 = vld [vmem:[#allocation22_spill] sm:$0xff] }
 0xa6d   :  { %8784 = vmatprep.subr.mxu1 %v4079_v40  ;;  %8790 = vmatprep.mubr.msk.f32.mxu1 %vm582_vm5, %v10786_v7 }
 0xa6e   :  { %8817 = vmatprep.subr.mxu0 %v4581_v26  ;;  %8823 = vmatprep.mubr.msk.f32.mxu0 %vm582_vm5, %v11956_v45 }
 0xa6f   :  { %8785 = vmatpush3.msra.mxu1 %v4079_v40  ;;  %8818 = vmatpush3.msra.mxu0 %v4581_v26  ;;  %v11985_v40 = vld [vmem:[#allocation37_spill] sm:$0xff]  ;;  %v11986_v26 = vld [vmem:[#allocation38_spill] sm:$0xff] }
 0xa70   :  { %8786 = vmatprep.subr.mxu1 %v4078_v27  ;;  %8819 = vmatprep.subr.mxu0 %v4580_v19 }
 0xa71   :  { %8787 = vmatpush3.msra.mxu1 %v4078_v27  ;;  %8820 = vmatpush3.msra.mxu0 %v4580_v19  ;;  %v11987_v27 = vld [vmem:[#allocation39_spill] sm:$0xff]  ;;  %v10900_v19 = vpop.f32.mrf.mxu0 }
 0xa72   :  { %8788 = vmatprep.subr.mxu1 %v4077_v41  ;;  %8821 = vmatprep.subr.mxu0 %v4579_v8 }
 0xa73   :  { %8789 = vmatpush3.msra.mxu1 %v4077_v41  ;;  %8822 = vmatpush3.msra.mxu0 %v4579_v8  ;;  %v4157_v45 = vpop.f32.mrf.mxu0 }
 0xa74   :  { %8791 = vmatmul.mubr.msk.f32.vlgmr.msra.gmra.mxu1 %vm582_vm5, %v10788_v51  ;;  %8804 = vmatprep.subr.mxu1 %v4498_v36 }
 0xa75   :  { %8824 = vmatmul.mubr.msk.f32.vlgmr.msra.gmra.mxu0 %vm582_vm5, %v11957_v1  ;;  %8805 = vmatpush3.msra.mxu1 %v4498_v36  ;;  %v8781_v41 = vpop.f32.mrf.mxu0  ;;  %v8023_v36 = vld [vmem:[%s11732_s4 + $0x2f0] ss:$0 sm:$0xff] }
 0xa76   :  { %8812 = vmatprep.mubr.msk.f32.mxu1 %vm582_vm5, %v10683_v35  ;;  %8826 = vmatprep.mubr.msk.f32.mxu0 %vm582_vm5, %v11958_v18 }
 0xa77   :  { %8806 = vmatprep.subr.mxu1 %v4497_v47  ;;  %v4320_v8 = vpop.f32.mrf.mxu0 }
 0xa78   :  { %8807 = vmatpush3.msra.mxu1 %v4497_v47 }
 0xa79   :  { %8808 = vmatprep.subr.mxu1 %v4496_v12  ;;  %8827 = vmatmul.mubr.msk.f32.gmra.mxu0 %vm582_vm5, %v11959_v57 }
 0xa7a   :  { %8809 = vmatpush3.msra.mxu1 %v4496_v12  ;;  %8829 = vmatprep.mubr.msk.f32.mxu0 %vm582_vm5, %v11960_v21 }
 0xa7b   :  { %8810 = vmatprep.subr.mxu1 %v4495_v56 }
 0xa7c   :  { %8811 = vmatpush3.msra.mxu1 %v4495_v56 }
 0xa7d   :  { %8813 = vmatmul.mubr.msk.f32.vlgmr.msra.gmra.mxu1 %vm582_vm5, %v10686_v34  ;;  %8830 = vmatmul.mubr.msk.f32.gmra.mxu0 %vm582_vm5, %v11961_v54  ;;  %v10915_v54 = vld [vmem:[%s11732_s4 + $0x258] ss:$0 sm:$0xff] }
 0xa7e   :  { %8832 = vmatprep.mubr.msk.f32.mxu0 %vm582_vm5, %v11962_v59 }
 0xa81   :  { %8833 = vmatmul.mubr.msk.f32.gmra.mxu0 %vm582_vm5, %v11963_v30  ;;  %v11990_v30 = vld [vmem:[#allocation42_spill] sm:$0xff] }
 0xa82   :  { %8835 = vmatprep.mubr.msk.f32.mxu0 %vm582_vm5, %v11964_v6 }
 0xa85   :  { %8836 = vmatmul.mubr.msk.f32.gmra.mxu0 %vm582_vm5, %v11965_v24 }
 0xa86   :  { %8838 = vmatprep.mubr.msk.f32.mxu0 %vm582_vm5, %v11966_v4 }
 0xa89   :  { %8839 = vmatmul.mubr.msk.f32.gmra.mxu0 %vm582_vm5, %v11967_v3  ;;  %v8022_v3 = vld [vmem:[%s11732_s4 + $0x2a0] ss:$0 sm:$0xff] }
 0xa8a   :  { %8841 = vmatprep.mubr.msk.f32.mxu0 %vm582_vm5, %v11968_v16 }
 0xa8d   :  { %8842 = vmatmul.mubr.msk.f32.gmra.mxu0 %vm582_vm5, %v11969_v15 }
 0xa8e   :  { %8844 = vmatprep.mubr.msk.f32.mxu0 %vm582_vm5, %v11970_v37 }
 0xa91   :  { %8845 = vmatmul.mubr.msk.f32.gmra.mxu0 %vm582_vm5, %v11971_v32 }
 0xa92   :  { %8847 = vmatprep.mubr.msk.f32.mxu0 %vm582_vm5, %v11972_v53  ;;  %v10929_v53 = vld [vmem:[%s11732_s4 + $0x2c8] ss:$0 sm:$0xff] }
 0xa95   :  { %8848 = vmatmul.mubr.msk.f32.gmra.mxu0 %vm582_vm5, %v11973_v25 }
 0xa96   :  { %8850 = vmatprep.mubr.msk.f32.mxu0 %vm582_vm5, %v11974_v46 }
 0xa99   :  { %8851 = vmatmul.mubr.msk.f32.gmra.mxu0 %vm582_vm5, %v11975_v28  ;;  %v11991_v28 = vld [vmem:[#allocation3_spill] sm:$0xff] }
 0xa9a   :  { %8853 = vmatprep.mubr.msk.f32.mxu0 %vm582_vm5, %v11976_v44 }
 0xa9d   :  { %8854 = vmatmul.mubr.msk.f32.gmra.mxu0 %vm582_vm5, %v11977_v0 }
 0xa9e   :  { %8856 = vmatprep.mubr.msk.f32.mxu0 %vm582_vm5, %v11978_v22 }
 0xaa1   :  { %8857 = vmatmul.mubr.msk.f32.gmra.mxu0 %vm582_vm5, %v11979_v52 }
 0xaa2   :  { %8859 = vmatprep.mubr.msk.f32.mxu0 %vm582_vm5, %v11980_v11 }
 0xaa5   :  { %8860 = vmatmul.mubr.msk.f32.gmra.mxu0 %vm582_vm5, %v11981_v50 }
 0xaa6   :  { %8862 = vmatprep.mubr.msk.f32.mxu0 %vm582_vm5, %v11982_v39 }
 0xaa9   :  { %8863 = vmatmul.mubr.msk.f32.gmra.mxu0 %vm582_vm5, %v11983_v23 }
 0xaaa   :  { %8865 = vmatprep.mubr.msk.f32.mxu0 %vm582_vm5, %v11984_v29 }
 0xaad   :  { %8866 = vmatmul.mubr.msk.f32.gmra.mxu0 %vm582_vm5, %v11985_v40 }
 0xaae   :  { %8868 = vmatprep.mubr.msk.f32.mxu0 %vm582_vm5, %v11986_v26 }
 0xab1   :  { %8869 = vmatmul.mubr.msk.f32.gmra.mxu0 %vm582_vm5, %v11987_v27 }
 0xb2b   :  { %v10905_v47 = vpop.f32.mrf.mxu1  ;;  %v8803_v1 = vpop.f32.mrf.mxu0 }
 0xb2c   :  { %v10907_v18 = vadd.f32 %v8803_v1, %v8023_v36 }
 0xb2d   :  { %v4238_v12 = vpop.f32.mrf.mxu1  ;;  %v4486_v56 = vpop.f32.mrf.mxu0 }
 0xb2e   :  { %11988 = vst [vmem:[#allocation48_spill] sm:$0xff] %v10907_v18  ;;  %v4239_v57 = vadd.f32 %v4238_v12, %v4157_v45  ;;  %v10909_v21 = vadd.f32 %v8023_v36, %v4486_v56  ;;  %8871 = vmatprep.subr.mxu1 %v10907_v18 }
 0xb2f   :  { %8872 = vmatpush3.msra.mxu1 %v10907_v18 }
 0xb30   :  { %11989 = vst [vmem:[#allocation47_spill] sm:$0xff] %v10909_v21  ;;  %v4252_v59 = vadd.f32 %v10915_v54, %v4239_v57  ;;  %8873 = vmatprep.subr.mxu1 %v10909_v21 }
 0xb31   :  { %8874 = vmatpush3.msra.mxu1 %v10909_v21 }
 0xb32   :  { %v4822_v6 = vrot.slane %v4252_v59, %v11990_v30  ;;  %v4815_v24 = vcombine.high %v4252_v59, %v4252_v59 }
 0xb34   :  { %v8792_v4 = vpop.f32.mrf.mxu1  ;;  %v4830_v16 = vcombine.high %v4822_v6, %v4822_v6  ;;  %v4838_v15 = vrot.slane %v4822_v6, %v11990_v30  ;;  %v4829_v11 = vrot.slane %v4815_v24, %v11990_v30 }
 0xb35   :  { %v4401_v37 = vadd.f32 %v8792_v4, %v8781_v41  ;;  %v8825_v32 = vpop.f32.mrf.mxu0 }
 0xb36   :  { %v4395_v25 = vpop.f32.mrf.mxu1  ;;  %v4916_v44 = vrot.slane %v4838_v15, %v11991_v28  ;;  %v4852_v52 = vrot.slane %v4830_v16, %v11990_v30  ;;  %v4860_v50 = vcombine.high %v4838_v15, %v4838_v15  ;;  %v4660_v39 = vadd.f32 %v8825_v32, %v10929_v53 }
 0xb37   :  { %v10931_v46 = vadd.f32 %v8022_v3, %v4401_v37  ;;  %v4396_v0 = vadd.f32 %v4395_v25, %v4320_v8  ;;  %v4654_v22 = vpop.f32.mrf.mxu0  ;;  %v4831_v15 = vcombine.high %v4829_v11, %v4829_v11 }
 0xb38   :  { %v4920_v26 = vrot.slane %v4852_v52, %v11991_v28  ;;  %v4655_v27 = vadd.f32 %v10929_v53, %v4654_v22  ;;  %v4924_v41 = vrot.slane %v4860_v50, %v11991_v28  ;;  %v4862_v8 = vcombine.high %v4852_v52, %v4852_v52 }
 0xb39   :  { %v4994_v23 = vmul.f32 %v4916_v44, %v10931_v46  ;;  %v10938_v29 = vadd.f32 %v8022_v3, %v4396_v0  ;;  %v8828_v40 = vpop.f32.mrf.mxu0  ;;  %v4845_v22 = vrot.slane %v4829_v11, %v11990_v30 }
 0xb3a   :  { %v4670_v45 = vadd.f32 %v8828_v40, %v10929_v53  ;;  %v4996_v12 = vmul.f32 %v4920_v26, %v10931_v46  ;;  %v4998_v3 = vmul.f32 %v4924_v41, %v10931_v46 }
 0xb3b   :  { %v10944_v36 = vmul.f32 %v4994_v23, %v4660_v39  ;;  %v4993_v1 = vmul.f32 %v4916_v44, %v10938_v29  ;;  %v4664_v56 = vpop.f32.mrf.mxu0  ;;  %v4995_v57 = vmul.f32 %v4920_v26, %v10938_v29  ;;  %v4928_v44 = vrot.slane %v4862_v8, %v11991_v28 }
 0xb3c   :  { %v4665_v59 = vadd.f32 %v10929_v53, %v4664_v56  ;;  %v10952_v24 = vmul.f32 %v4996_v12, %v4670_v45  ;;  %v4997_v39 = vmul.f32 %v4924_v41, %v10938_v29  ;;  %v4244_v26 = vadd.f32 %v10905_v47, %v10900_v19 }
 0xb3d   :  { %v10950_v6 = vmul.f32 %v4993_v1, %v4655_v27  ;;  %v8831_v4 = vpop.f32.mrf.mxu0  ;;  %v5080_v16 = vsel %vm1671_vm6, %v10944_v36, 0.0  ;;  %v4859_v45 = vrot.slane %v4831_v15, %v11990_v30  ;;  %v5000_v8 = vmul.f32 %v4928_v44, %v10931_v46 }
 0xb3e   :  { %v4680_v37 = vadd.f32 %v8831_v4, %v10929_v53  ;;  %5081 = vadd.xlane.f32.xlu0 %v5080_v16  ;;  %v10958_v32 = vmul.f32 %v4995_v57, %v4665_v59  ;;  %v5086_v40 = vsel %vm1671_vm6, %v10952_v24, 0.0  ;;  %v4932_v12 = vrot.slane %v4845_v22, %v11991_v28 }
 0xb3f   :  { %v4674_v25 = vpop.f32.mrf.mxu0  ;;  %v5077_v0 = vsel %vm1671_vm6, %v10950_v6, 0.0  ;;  %v4999_v19 = vmul.f32 %v4928_v44, %v10938_v29  ;;  %v10987_v4 = vadd.f32 %v10915_v54, %v4244_v26  ;;  %v4936_v16 = vrot.slane %v4859_v45, %v11991_v28 }
 0xb40   :  { %v4675_v52 = vadd.f32 %v10929_v53, %v4674_v25  ;;  %5078 = vadd.xlane.f32.xlu1 %v5077_v0  ;;  %v10965_v50 = vmul.f32 %v4998_v3, %v4680_v37  ;;  %v5083_v41 = vsel %vm1671_vm6, %v10958_v32, 0.0  ;;  %v5002_v37 = vmul.f32 %v4932_v12, %v10931_v46 }
 0xb41   :  { %v8834_v23 = vpop.f32.mrf.mxu0  ;;  %v4861_v0 = vcombine.high %v4845_v22, %v4845_v22  ;;  %v5001_v54 = vmul.f32 %v4932_v12, %v10938_v29  ;;  %v4871_v26 = vrot.slane %v10987_v4, %v11990_v30 }
 0xb42   :  { %v4690_v27 = vadd.f32 %v8834_v23, %v10929_v53  ;;  %5087 = vadd.xlane.f32.xlu0 %v5086_v40  ;;  %v10974_v11 = vmul.f32 %v4997_v39, %v4675_v52  ;;  %v5092_v59 = vsel %vm1671_vm6, %v10965_v50, 0.0 }
 0xb43   :  { %v4684_v1 = vpop.f32.mrf.mxu0 }
 0xb44   :  { %v4685_v56 = vadd.f32 %v10929_v53, %v4684_v1  ;;  %5084 = vadd.xlane.f32.xlu1 %v5083_v41  ;;  %v10981_v57 = vmul.f32 %v5000_v8, %v4690_v27  ;;  %v5089_v44 = vsel %vm1671_vm6, %v10974_v11, 0.0  ;;  %v5004_v8 = vmul.f32 %v4936_v16, %v10931_v46 }
 0xb45   :  { %v8837_v47 = vpop.f32.mrf.mxu0  ;;  %v4940_v41 = vrot.slane %v4861_v0, %v11991_v28 }
 0xb46   :  { %v4700_v3 = vadd.f32 %v8837_v47, %v10929_v53  ;;  %5093 = vadd.xlane.f32.xlu0 %v5092_v59  ;;  %v10991_v15 = vmul.f32 %v4999_v19, %v4685_v56  ;;  %v5098_v40 = vsel %vm1671_vm6, %v10981_v57, 0.0  ;;  %v4863_v56 = vcombine.high %v4859_v45, %v4859_v45 }
 0xb47   :  { %v4694_v25 = vpop.f32.mrf.mxu0  ;;  %v5003_v59 = vmul.f32 %v4936_v16, %v10938_v29  ;;  %v5006_v45 = vmul.f32 %v4940_v41, %v10931_v46 }
 0xb48   :  { %v4695_v52 = vadd.f32 %v10929_v53, %v4694_v25  ;;  %5090 = vadd.xlane.f32.xlu1 %v5089_v44  ;;  %v10997_v39 = vmul.f32 %v5002_v37, %v4700_v3  ;;  %v5095_v12 = vsel %vm1671_vm6, %v10991_v15, 0.0  ;;  %v4879_v25 = vcombine.high %v4871_v26, %v4871_v26 }
 0xb49   :  { %v8840_v23 = vpop.f32.mrf.mxu0  ;;  %v4887_v44 = vrot.slane %v4871_v26, %v11990_v30  ;;  %v5005_v26 = vmul.f32 %v4940_v41, %v10938_v29 }
 0xb4a   :  { %v4710_v27 = vadd.f32 %v8840_v23, %v10929_v53  ;;  %5099 = vadd.xlane.f32.xlu0 %v5098_v40  ;;  %v11006_v22 = vmul.f32 %v5001_v54, %v4695_v52  ;;  %v5104_v37 = vsel %vm1671_vm6, %v10997_v39, 0.0  ;;  %v4944_v23 = vrot.slane %v4863_v56, %v11991_v28 }
 0xb4b   :  { %v4704_v1 = vpop.f32.mrf.mxu0 }
 0xb4c   :  { %v4705_v19 = vadd.f32 %v10929_v53, %v4704_v1  ;;  %5096 = vadd.xlane.f32.xlu1 %v5095_v12  ;;  %v11012_v47 = vmul.f32 %v5004_v8, %v4710_v27  ;;  %v5101_v16 = vsel %vm1671_vm6, %v11006_v22, 0.0 }
 0xb4d   :  { %v8843_v3 = vpop.f32.mrf.mxu0 }
 0xb4e   :  { %v4720_v0 = vadd.f32 %v8843_v3, %v10929_v53  ;;  %5105 = vadd.xlane.f32.xlu0 %v5104_v37  ;;  %v11019_v52 = vmul.f32 %v5003_v59, %v4705_v19  ;;  %v5110_v1 = vsel %vm1671_vm6, %v11012_v47, 0.0  ;;  %v4948_v19 = vrot.slane %v4887_v44, %v11991_v28 }
 0xb4f   :  { %v4714_v54 = vpop.f32.mrf.mxu0  ;;  %v5008_v59 = vmul.f32 %v4944_v23, %v10931_v46 }
 0xb50   :  { %v4715_v40 = vadd.f32 %v10929_v53, %v4714_v54  ;;  %5102 = vadd.xlane.f32.xlu1 %v5101_v16  ;;  %v11026_v27 = vmul.f32 %v5006_v45, %v4720_v0  ;;  %v5107_v37 = vsel %vm1671_vm6, %v11019_v52, 0.0  ;;  %v4901_v0 = vrot.slane %v4879_v25, %v11990_v30 }
 0xb51   :  { %v8846_v8 = vpop.f32.mrf.mxu0  ;;  %v5007_v54 = vmul.f32 %v4944_v23, %v10938_v29  ;;  %v5010_v25 = vmul.f32 %v4948_v19, %v10931_v46 }
 0xb52   :  { %11992 = vst [vmem:[#allocation2_spill] sm:$0xff] %v11026_v27  ;;  %v4730_v12 = vadd.f32 %v8846_v8, %v10929_v53  ;;  %5111 = vadd.xlane.f32.xlu0 %v5110_v1  ;;  %v11033_v56 = vmul.f32 %v5005_v26, %v4715_v40  ;;  %v5116_v40 = vsel %vm1671_vm6, %v11026_v27, 0.0  ;;  %v4864_v26 = vcombine.high %v10987_v4, %v10987_v4 }
 0xb53   :  { %v4724_v3 = vpop.f32.mrf.mxu0  ;;  %v4909_v1 = vcombine.high %v4887_v44, %v4887_v44  ;;  %v5009_v4 = vmul.f32 %v4948_v19, %v10938_v29  ;;  %v4911_v19 = vcombine.high %v4901_v0, %v4901_v0 }
 0xb54   :  { %11993 = vst [vmem:[#allocation55_spill] sm:$0xff] %v11033_v56  ;;  %v4725_v41 = vadd.f32 %v10929_v53, %v4724_v3  ;;  %5108 = vadd.xlane.f32.xlu1 %v5107_v37  ;;  %v11040_v45 = vmul.f32 %v5008_v59, %v4730_v12  ;;  %v4952_v12 = vrot.slane %v4901_v0, %v11991_v28  ;;  %v5113_v23 = vsel %vm1671_vm6, %v11033_v56, 0.0 }
 0xb55   :  { %v8849_v16 = vpop.f32.mrf.mxu0 }
 0xb56   :  { %11994 = vst [vmem:[#allocation49_spill] sm:$0xff] %v11040_v45  ;;  %v4740_v8 = vadd.f32 %v8849_v16, %v10929_v53  ;;  %5117 = vadd.xlane.f32.xlu0 %v5116_v40  ;;  %v11048_v34 = vmul.f32 %v5007_v54, %v4725_v41  ;;  %v5122_v44 = vsel %vm1671_vm6, %v11040_v45, 0.0  ;;  %v4878_v41 = vrot.slane %v4864_v26, %v11990_v30 }
 0xb57   :  { %v4734_v3 = vpop.f32.mrf.mxu0  ;;  %v4956_v40 = vrot.slane %v4909_v1, %v11991_v28  ;;  %v5011_v26 = vmul.f32 %v4952_v12, %v10938_v29 }
 0xb58   :  { %11995 = vst [vmem:[#allocation57_spill] sm:$0xff] %v11048_v34  ;;  %v4735_v59 = vadd.f32 %v10929_v53, %v4734_v3  ;;  %5114 = vadd.xlane.f32.xlu1 %v5113_v23  ;;  %v11055_v37 = vmul.f32 %v5010_v25, %v4740_v8  ;;  %v5012_v3 = vmul.f32 %v4952_v12, %v10931_v46  ;;  %v5119_v8 = vsel %vm1671_vm6, %v11048_v34, 0.0 }
 0xb59   :  { %v8852_v16 = vpop.f32.mrf.mxu0  ;;  %v4894_v12 = vrot.slane %v4878_v41, %v11990_v30 }
 0xb5a   :  { %v4750_v54 = vadd.f32 %v8852_v16, %v10929_v53  ;;  %5123 = vadd.xlane.f32.xlu0 %v5122_v44  ;;  %v11063_v35 = vmul.f32 %v5009_v4, %v4735_v59  ;;  %v5128_v1 = vsel %vm1671_vm6, %v11055_v37, 0.0  ;;  %v4880_v59 = vcombine.high %v4878_v41, %v4878_v41 }
 0xb5b   :  { %v4744_v23 = vpop.f32.mrf.mxu0  ;;  %v5014_v44 = vmul.f32 %v4956_v40, %v10931_v46 }
 0xb5c   :  { %v4745_v25 = vadd.f32 %v10929_v53, %v4744_v23  ;;  %5120 = vadd.xlane.f32.xlu1 %v5119_v8  ;;  %v11069_v7 = vmul.f32 %v5012_v3, %v4750_v54  ;;  %v4960_v23 = vrot.slane %v4911_v19, %v11991_v28  ;;  %v5125_v54 = vsel %vm1671_vm6, %v11063_v35, 0.0 }
 0xb5d   :  { %v8855_v16 = vpop.f32.mrf.mxu0  ;;  %v4908_v19 = vrot.slane %v4880_v59, %v11990_v30 }
 0xb5e   :  { %v4760_v4 = vadd.f32 %v8855_v16, %v10929_v53  ;;  %5129 = vadd.xlane.f32.xlu0 %v5128_v1  ;;  %v11076_v51 = vmul.f32 %v5011_v26, %v4745_v25  ;;  %v5013_v16 = vmul.f32 %v4956_v40, %v10938_v29  ;;  %v5134_v25 = vsel %vm1671_vm6, %v11069_v7, 0.0 }
 0xb5f   :  { %v4754_v0 = vpop.f32.mrf.mxu0  ;;  %v5016_v41 = vmul.f32 %v4960_v23, %v10931_v46 }
 0xb60   :  { %v4755_v3 = vadd.f32 %v10929_v53, %v4754_v0  ;;  %5126 = vadd.xlane.f32.xlu1 %v5125_v54  ;;  %v11083_v8 = vmul.f32 %v5014_v44, %v4760_v4  ;;  %v4964_v0 = vrot.slane %v4894_v12, %v11991_v28  ;;  %v5131_v4 = vsel %vm1671_vm6, %v11076_v51, 0.0 }
 0xb61   :  { %v8858_v21 = vpop.f32.mrf.mxu0 }
 0xb62   :  { %v4770_v26 = vadd.f32 %v8858_v21, %v10929_v53  ;;  %5135 = vadd.xlane.f32.xlu0 %v5134_v25  ;;  %v11090_v1 = vmul.f32 %v5013_v16, %v4755_v3  ;;  %v5015_v21 = vmul.f32 %v4960_v23, %v10938_v29  ;;  %v5140_v30 = vsel %vm1671_vm6, %v11083_v8, 0.0 }
 0xb63   :  { %v4764_v18 = vpop.f32.mrf.mxu0  ;;  %v4968_v3 = vrot.slane %v4908_v19, %v11991_v28  ;;  %v5018_v25 = vmul.f32 %v4964_v0, %v10931_v46 }
 0xb64   :  { %v4765_v40 = vadd.f32 %v10929_v53, %v4764_v18  ;;  %5132 = vadd.xlane.f32.xlu1 %v5131_v4  ;;  %v11097_v44 = vmul.f32 %v5016_v41, %v4770_v26  ;;  %v5137_v18 = vsel %vm1671_vm6, %v11090_v1, 0.0  ;;  %v4910_v26 = vcombine.high %v4894_v12, %v4894_v12 }
 0xb65   :  { %v8861_v54 = vpop.f32.mrf.mxu0  ;;  %v5017_v4 = vmul.f32 %v4964_v0, %v10938_v29  ;;  %v5020_v34 = vmul.f32 %v4968_v3, %v10931_v46 }
 0xb66   :  { %v4780_v59 = vadd.f32 %v8861_v54, %v10929_v53  ;;  %5141 = vadd.xlane.f32.xlu0 %v5140_v30  ;;  %v11104_v16 = vmul.f32 %v5015_v21, %v4765_v40  ;;  %v5146_v30 = vsel %vm1671_vm6, %v11097_v44, 0.0  ;;  %v4912_v21 = vcombine.high %v4908_v19, %v4908_v19 }
 0xb67   :  { %v4774_v45 = vpop.f32.mrf.mxu0 }
 0xb68   :  { %v4775_v23 = vadd.f32 %v10929_v53, %v4774_v45  ;;  %5138 = vadd.xlane.f32.xlu1 %v5137_v18  ;;  %v11110_v41 = vmul.f32 %v5018_v25, %v4780_v59  ;;  %v4972_v45 = vrot.slane %v4910_v26, %v11991_v28  ;;  %v5143_v59 = vsel %vm1671_vm6, %v11104_v16, 0.0 }
 0xb69   :  { %v8864_v54 = vpop.f32.mrf.mxu0  ;;  %v5019_v18 = vmul.f32 %v4968_v3, %v10938_v29  ;;  %v4976_v56 = vrot.slane %v4912_v21, %v11991_v28 }
 0xb6a   :  { %11996 = vst [vmem:[#allocation51_spill] sm:$0xff] %v11110_v41  ;;  %v4790_v40 = vadd.f32 %v8864_v54, %v10929_v53  ;;  %5147 = vadd.xlane.f32.xlu0 %v5146_v30  ;;  %v11116_v27 = vmul.f32 %v5017_v4, %v4775_v23  ;;  %v5152_v19 = vsel %vm1671_vm6, %v11110_v41, 0.0  ;;  %v5022_v26 = vmul.f32 %v4972_v45, %v10931_v46 }
 0xb6b   :  { %v4784_v12 = vpop.f32.mrf.mxu0  ;;  %v5024_v28 = vmul.f32 %v4976_v56, %v10931_v46 }
 0xb6c   :  { %v4785_v0 = vadd.f32 %v10929_v53, %v4784_v12  ;;  %5144 = vadd.xlane.f32.xlu1 %v5143_v59  ;;  %v11123_v25 = vmul.f32 %v5020_v34, %v4790_v40  ;;  %v5149_v34 = vsel %vm1671_vm6, %v11116_v27, 0.0  ;;  %v5021_v12 = vmul.f32 %v4972_v45, %v10938_v29 }
 0xb6d   :  { %v8867_v54 = vpop.f32.mrf.mxu0  ;;  %v5023_v45 = vmul.f32 %v4976_v56, %v10938_v29 }
 0xb6e   :  { %11997 = vst [vmem:[#allocation43_spill] sm:$0xff] %v11123_v25  ;;  %v4800_v23 = vadd.f32 %v8867_v54, %v10929_v53  ;;  %5153 = vadd.xlane.f32.xlu0 %v5152_v19  ;;  %v11129_v4 = vmul.f32 %v5019_v18, %v4785_v0  ;;  %v5158_v0 = vsel %vm1671_vm6, %v11123_v25, 0.0 }
 0xb6f   :  { %v4794_v30 = vpop.f32.mrf.mxu0 }
 0xb70   :  { %v4795_v40 = vadd.f32 %v10929_v53, %v4794_v30  ;;  %5150 = vadd.xlane.f32.xlu1 %v5149_v34  ;;  %v11136_v3 = vmul.f32 %v5022_v26, %v4800_v23  ;;  %v5155_v19 = vsel %vm1671_vm6, %v11129_v4, 0.0 }
 0xb71   :  { %v8870_v59 = vpop.f32.mrf.mxu0 }
 0xb72   :  { %11998 = vst [vmem:[#allocation59_spill] sm:$0xff] %v11136_v3  ;;  %v4810_v18 = vadd.f32 %v8870_v59, %v10929_v53  ;;  %5159 = vadd.xlane.f32.xlu0 %v5158_v0  ;;  %v11142_v54 = vmul.f32 %v5021_v12, %v4795_v40  ;;  %v5164_v30 = vsel %vm1671_vm6, %v11136_v3, 0.0 }
 0xb73   :  { %v4804_v21 = vpop.f32.mrf.mxu0 }
 0xb74   :  { %v4805_v23 = vadd.f32 %v10929_v53, %v4804_v21  ;;  %5156 = vadd.xlane.f32.xlu1 %v5155_v19  ;;  %v11148_v26 = vmul.f32 %v5024_v28, %v4810_v18  ;;  %v5161_v46 = vsel %vm1671_vm6, %v11142_v54, 0.0 }
 0xb76   :  { %11999 = vst [vmem:[#allocation62_spill] sm:$0xff] %v11148_v26  ;;  %5165 = vadd.xlane.f32.xlu0 %v5164_v30  ;;  %v11153_v34 = vmul.f32 %v5023_v45, %v4805_v23  ;;  %v5170_v40 = vsel %vm1671_vm6, %v11148_v26, 0.0 }
 0xb78   :  { %5162 = vadd.xlane.f32.xlu1 %v5161_v46  ;;  %v5167_v53 = vsel %vm1671_vm6, %v11153_v34, 0.0 }
 0xb7a   :  { %5171 = vadd.xlane.f32.xlu0 %v5170_v40 }
 0xb7c   :  { %5168 = vadd.xlane.f32.xlu1 %v5167_v53 }
 0xbc7   :  { %v5082_v12 = vpop.xlane.xlu0 %5081 }
 0xbc8   :  { %v8065_v29 = vclamps-f32 %v5082_v12, 5.0 }
 0xbc9   :  { %v5079_v56 = vpop.xlane.xlu1 %5078 }
 0xbca   :  { %v5239_v59 = vmul.f32 1.442695, %v8065_v29  ;;  %v8064_v0 = vclamps-f32 %v5079_v56, 5.0 }
 0xbcb   :  { %v5088_v18 = vpop.xlane.xlu0 %5087 }
 0xbcc   :  { %9162 = vpow2.f32 %v5239_v59  ;;  %v5237_v28 = vmul.f32 1.442695, %v8064_v0  ;;  %v8067_v21 = vclamps-f32 %v5088_v18, 5.0 }
 0xbcd   :  { %v5085_v19 = vpop.xlane.xlu1 %5084 }
 0xbce   :  { %9164 = vpow2.f32 %v5237_v28  ;;  %v8066_v23 = vclamps-f32 %v5085_v19, 5.0  ;;  %v5243_v45 = vmul.f32 1.442695, %v8067_v21 }
 0xbcf   :  { %v5094_v30 = vpop.xlane.xlu0 %5093 }
 0xbd0   :  { %v5241_v46 = vmul.f32 1.442695, %v8066_v23  ;;  %v8069_v40 = vclamps-f32 %v5094_v30, 5.0 }
 0xbd1   :  { %v5091_v26 = vpop.xlane.xlu1 %5090 }
 0xbd2   :  { %9166 = vpow2.f32 %v5241_v46  ;;  %v5247_v3 = vmul.f32 1.442695, %v8069_v40  ;;  %v8068_v53 = vclamps-f32 %v5091_v26, 5.0 }
 0xbd3   :  { %9168 = vpow2.f32 %v5243_v45  ;;  %v5100_v12 = vpop.xlane.xlu0 %5099 }
 0xbd4   :  { %9170 = vpow2.f32 %v5247_v3  ;;  %v5245_v29 = vmul.f32 1.442695, %v8068_v53  ;;  %v8071_v56 = vclamps-f32 %v5100_v12, 5.0 }
 0xbd5   :  { %v5097_v25 = vpop.xlane.xlu1 %5096 }
 0xbd6   :  { %v5251_v59 = vmul.f32 1.442695, %v8071_v56  ;;  %v8070_v0 = vclamps-f32 %v5097_v25, 5.0  ;;  %9172 = vpow2.f32 %v5245_v29 }
 0xbd7   :  { %v5106_v18 = vpop.xlane.xlu0 %5105 }
 0xbd8   :  { %9174 = vpow2.f32 %v5251_v59  ;;  %v5249_v28 = vmul.f32 1.442695, %v8070_v0  ;;  %v8073_v21 = vclamps-f32 %v5106_v18, 5.0 }
 0xbd9   :  { %v9163_v19 = vpop.eup %9162  ;;  %v5103_v23 = vpop.xlane.xlu1 %5102 }
 0xbda   :  { %v5255_v30 = vmul.f32 1.442695, %v8073_v21  ;;  %v8072_v41 = vclamps-f32 %v5103_v23, 5.0  ;;  %v5302_v46 = vmul.f32 %v9163_v19, %v10090_v14  ;;  %9176 = vpow2.f32 %v5249_v28 }
 0xbdb   :  { %v9165_v26 = vpop.eup %9164  ;;  %v5112_v45 = vpop.xlane.xlu0 %5111 }
 0xbdc   :  { %9178 = vpow2.f32 %v5255_v30  ;;  %v5253_v3 = vmul.f32 1.442695, %v8072_v41  ;;  %v8075_v40 = vclamps-f32 %v5112_v45, 5.0  ;;  %5369 = vperm.xlu0 %9013, %v5302_v46   ;;  %v5301_v25 = vmul.f32 %v9165_v26, %v10121_v20 }
 0xbdd   :  { %v5109_v53 = vpop.xlane.xlu1 %5108 }
 0xbde   :  { %v5259_v12 = vmul.f32 1.442695, %v8075_v40  ;;  %v8074_v29 = vclamps-f32 %v5109_v53, 5.0  ;;  %5366 = vperm.xlu1 %9012, %v5301_v25   ;;  %9180 = vpow2.f32 %v5253_v3 }
 0xbdf   :  { %v9167_v56 = vpop.eup %9166  ;;  %v5118_v59 = vpop.xlane.xlu0 %5117 }
 0xbe0   :  { %v9169_v0 = vpop.eup %9168  ;;  %9182 = vpow2.f32 %v5259_v12  ;;  %v5257_v18 = vmul.f32 1.442695, %v8074_v29  ;;  %v8077_v21 = vclamps-f32 %v5118_v59, 5.0  ;;  %v5303_v28 = vmul.f32 %v9167_v56, %v10112_v58 }
 0xbe1   :  { %v9171_v19 = vpop.eup %9170  ;;  %v5115_v23 = vpop.xlane.xlu1 %5114  ;;  %v5304_v25 = vmul.f32 %v9169_v0, %v10137_v2 }
 0xbe2   :  { %v5263_v41 = vmul.f32 1.442695, %v8077_v21  ;;  %v8076_v30 = vclamps-f32 %v5115_v23, 5.0  ;;  %5372 = vperm.xlu1 %9012, %v5303_v28   ;;  %v5306_v46 = vmul.f32 %v9171_v19, %v10160_v62  ;;  %9184 = vpow2.f32 %v5257_v18 }
 0xbe3   :  { %v5124_v26 = vpop.xlane.xlu0 %5123  ;;  %v9173_v45 = vpop.eup %9172 }
 0xbe4   :  { %9186 = vpow2.f32 %v5263_v41  ;;  %v5261_v40 = vmul.f32 1.442695, %v8076_v30  ;;  %v8079_v3 = vclamps-f32 %v5124_v26, 5.0  ;;  %5381 = vperm.xlu0 %9013, %v5306_v46   ;;  %v5305_v23 = vmul.f32 %v9173_v45, %v10145_v33 }
 0xbe5   :  { %v9175_v53 = vpop.eup %9174  ;;  %v5121_v12 = vpop.xlane.xlu1 %5120 }
 0xbe6   :  { %v5267_v29 = vmul.f32 1.442695, %v8079_v3  ;;  %v8078_v56 = vclamps-f32 %v5121_v12, 5.0  ;;  %5375 = vperm.xlu1 %9012, %v5304_v25   ;;  %v5308_v59 = vmul.f32 %v9175_v53, %v10180_v48  ;;  %9188 = vpow2.f32 %v5261_v40 }
 0xbe7   :  { %v5130_v21 = vpop.xlane.xlu0 %5129  ;;  %v9177_v28 = vpop.eup %9176 }
 0xbe8   :  { %9190 = vpow2.f32 %v5267_v29  ;;  %v5265_v18 = vmul.f32 1.442695, %v8078_v56  ;;  %v8081_v19 = vclamps-f32 %v5130_v21, 5.0  ;;  %5387 = vperm.xlu0 %9013, %v5308_v59   ;;  %v5307_v12 = vmul.f32 %v9177_v28, %v10178_v17 }
 0xbe9   :  { %v9179_v41 = vpop.eup %9178  ;;  %v5127_v30 = vpop.xlane.xlu1 %5126 }
 0xbea   :  { %v5271_v46 = vmul.f32 1.442695, %v8081_v19  ;;  %v8080_v0 = vclamps-f32 %v5127_v30, 5.0  ;;  %5378 = vperm.xlu1 %9012, %v5305_v23   ;;  %v5310_v26 = vmul.f32 %v9179_v41, %v10188_v13  ;;  %9192 = vpow2.f32 %v5265_v18 }
 0xbeb   :  { %v5136_v3 = vpop.xlane.xlu0 %5135  ;;  %v9181_v25 = vpop.eup %9180 }
 0xbec   :  { %9194 = vpow2.f32 %v5271_v46  ;;  %v5269_v40 = vmul.f32 1.442695, %v8080_v0  ;;  %v8083_v53 = vclamps-f32 %v5136_v3, 5.0  ;;  %5393 = vperm.xlu0 %9013, %v5310_v26   ;;  %v5309_v30 = vmul.f32 %v9181_v25, %v10186_v9 }
 0xbed   :  { %v9183_v29 = vpop.eup %9182  ;;  %v5133_v56 = vpop.xlane.xlu1 %5132 }
 0xbee   :  { %v5275_v59 = vmul.f32 1.442695, %v8083_v53  ;;  %v8082_v45 = vclamps-f32 %v5133_v56, 5.0  ;;  %5384 = vperm.xlu1 %9012, %v5307_v12   ;;  %v5312_v21 = vmul.f32 %v9183_v29, %v10196_v63  ;;  %9196 = vpow2.f32 %v5269_v40 }
 0xbef   :  { %v5142_v19 = vpop.xlane.xlu0 %5141  ;;  %v9185_v23 = vpop.eup %9184 }
 0xbf0   :  { %9198 = vpow2.f32 %v5275_v59  ;;  %v5273_v18 = vmul.f32 1.442695, %v8082_v45  ;;  %v8085_v41 = vclamps-f32 %v5142_v19, 5.0  ;;  %5399 = vperm.xlu0 %9013, %v5312_v21   ;;  %v5311_v56 = vmul.f32 %v9185_v23, %v10194_v10 }
 0xbf1   :  { %v9187_v46 = vpop.eup %9186  ;;  %v5139_v0 = vpop.xlane.xlu1 %5138 }
 0xbf2   :  { %v5279_v26 = vmul.f32 1.442695, %v8085_v41  ;;  %v8084_v28 = vclamps-f32 %v5139_v0, 5.0  ;;  %5390 = vperm.xlu1 %9012, %v5309_v30   ;;  %v5314_v3 = vmul.f32 %v9187_v46, %v10204_v61  ;;  %9200 = vpow2.f32 %v5273_v18  ;;  %v12002_v61 = vld [vmem:[#allocation67_spill] sm:$0xff] }
 0xbf3   :  { %v5148_v53 = vpop.xlane.xlu0 %5147  ;;  %v9189_v12 = vpop.eup %9188 }
 0xbf4   :  { %9202 = vpow2.f32 %v5279_v26  ;;  %v5277_v40 = vmul.f32 1.442695, %v8084_v28  ;;  %v8087_v29 = vclamps-f32 %v5148_v53, 5.0  ;;  %5405 = vperm.xlu0 %9013, %v5314_v3   ;;  %v5313_v0 = vmul.f32 %v9189_v12, %v10202_v49 }
 0xbf5   :  { %v9191_v59 = vpop.eup %9190  ;;  %v5145_v45 = vpop.xlane.xlu1 %5144 }
 0xbf6   :  { %v5283_v21 = vmul.f32 1.442695, %v8087_v29  ;;  %v8086_v25 = vclamps-f32 %v5145_v45, 5.0  ;;  %5396 = vperm.xlu1 %9012, %v5311_v56   ;;  %v5316_v19 = vmul.f32 %v9191_v59, %v10212_v31  ;;  %9204 = vpow2.f32 %v5277_v40 }
 0xbf7   :  { %v5154_v41 = vpop.xlane.xlu0 %5153  ;;  %v9193_v30 = vpop.eup %9192 }
 0xbf8   :  { %9206 = vpow2.f32 %v5283_v21  ;;  %v5281_v18 = vmul.f32 1.442695, %v8086_v25  ;;  %v8089_v46 = vclamps-f32 %v5154_v41, 5.0  ;;  %5411 = vperm.xlu0 %9013, %v5316_v19   ;;  %v5315_v45 = vmul.f32 %v9193_v30, %v10210_v60 }
 0xbf9   :  { %v9195_v26 = vpop.eup %9194  ;;  %v5151_v28 = vpop.xlane.xlu1 %5150 }
 0xbfa   :  { %v5287_v3 = vmul.f32 1.442695, %v8089_v46  ;;  %v8088_v23 = vclamps-f32 %v5151_v28, 5.0  ;;  %5402 = vperm.xlu1 %9012, %v5313_v0   ;;  %v5318_v53 = vmul.f32 %v9195_v26, %v10172_v43  ;;  %9208 = vpow2.f32 %v5281_v18 }
 0xbfb   :  { %v5160_v29 = vpop.xlane.xlu0 %5159  ;;  %v9197_v56 = vpop.eup %9196 }
 0xbfc   :  { %9210 = vpow2.f32 %v5287_v3  ;;  %v5285_v40 = vmul.f32 1.442695, %v8088_v23  ;;  %v8091_v59 = vclamps-f32 %v5160_v29, 5.0  ;;  %5417 = vperm.xlu0 %9013, %v5318_v53   ;;  %v5317_v28 = vmul.f32 %v9197_v56, %v10166_v38  ;;  %v12000_v29 = vld [vmem:[#allocation65_spill] sm:$0xff] }
 0xbfd   :  { %v9199_v21 = vpop.eup %9198  ;;  %v5157_v25 = vpop.xlane.xlu1 %5156 }
 0xbfe   :  { %v5291_v19 = vmul.f32 1.442695, %v8091_v59  ;;  %v8090_v12 = vclamps-f32 %v5157_v25, 5.0  ;;  %5408 = vperm.xlu1 %9012, %v5315_v45   ;;  %v5320_v41 = vmul.f32 %v9199_v21, %v10176_v5  ;;  %9212 = vpow2.f32 %v5285_v40 }
 0xbff   :  { %v5166_v46 = vpop.xlane.xlu0 %5165  ;;  %v9201_v0 = vpop.eup %9200 }
 0xc00   :  { %9214 = vpow2.f32 %v5291_v19  ;;  %v5289_v18 = vmul.f32 1.442695, %v8090_v12  ;;  %v8093_v26 = vclamps-f32 %v5166_v46, 5.0  ;;  %5423 = vperm.xlu0 %9013, %v5320_v41   ;;  %v12001_v19 = vld [vmem:[#allocation63_spill] sm:$0xff] }
 0xc01   :  { %v9203_v3 = vpop.eup %9202  ;;  %v5163_v23 = vpop.xlane.xlu1 %5162  ;;  %v5319_v12 = vmul.f32 %v9201_v0, %v12001_v19  ;;  %v12005_v0 = vld [vmem:[#allocation66_spill] sm:$0xff] }
 0xc02   :  { %v5295_v53 = vmul.f32 1.442695, %v8093_v26  ;;  %v8092_v30 = vclamps-f32 %v5163_v23, 5.0  ;;  %5414 = vperm.xlu1 %9012, %v5317_v28   ;;  %v5322_v59 = vmul.f32 %v9203_v3, %v12000_v29  ;;  %9216 = vpow2.f32 %v5289_v18  ;;  %v12003_v18 = vld [vmem:[#allocation64_spill] sm:$0xff] }
 0xc03   :  { %v5172_v45 = vpop.xlane.xlu0 %5171  ;;  %v9205_v25 = vpop.eup %9204 }
 0xc04   :  { %9218 = vpow2.f32 %v5295_v53  ;;  %v5293_v40 = vmul.f32 1.442695, %v8092_v30  ;;  %v8095_v21 = vclamps-f32 %v5172_v45, 5.0  ;;  %5429 = vperm.xlu0 %9013, %v5322_v59   ;;  %v5321_v23 = vmul.f32 %v9205_v25, %v12003_v18  ;;  %v12004_v30 = vld [vmem:[#allocation69_spill] sm:$0xff] }
 0xc05   :  { %v9207_v46 = vpop.eup %9206  ;;  %v5169_v41 = vpop.xlane.xlu1 %5168  ;;  %v12008_v25 = vld [vmem:[#allocation77_spill] sm:$0xff] }
 0xc06   :  { %v5299_v31 = vmul.f32 1.442695, %v8095_v21  ;;  %v8094_v56 = vclamps-f32 %v5169_v41, 5.0  ;;  %5420 = vperm.xlu1 %9012, %v5319_v12   ;;  %v5324_v26 = vmul.f32 %v9207_v46, %v12002_v61  ;;  %9220 = vpow2.f32 %v5293_v40  ;;  %v12006_v12 = vld [vmem:[#allocation73_spill] sm:$0xff] }
 0xc07   :  { %v9209_v28 = vpop.eup %9208 }
 0xc08   :  { %9222 = vpow2.f32 %v5299_v31  ;;  %v5297_v3 = vmul.f32 1.442695, %v8094_v56  ;;  %5435 = vperm.xlu0 %9013, %v5324_v26   ;;  %v5323_v21 = vmul.f32 %v9209_v28, %v12005_v0  ;;  %v12007_v31 = vld [vmem:[#allocation68_spill] sm:$0xff] }
 0xc09   :  { %v9211_v53 = vpop.eup %9210 }
 0xc0a   :  { %5426 = vperm.xlu1 %9012, %v5321_v23   ;;  %v5326_v59 = vmul.f32 %v9211_v53, %v12004_v30  ;;  %9224 = vpow2.f32 %v5297_v3  ;;  %v12009_v53 = vld [vmem:[#allocation72_spill] sm:$0xff] }
 0xc0b   :  { %v9213_v45 = vpop.eup %9212 }
 0xc0c   :  { %5441 = vperm.xlu0 %9013, %v5326_v59   ;;  %v5325_v56 = vmul.f32 %v9213_v45, %v12007_v31  ;;  %v12010_v59 = vld [vmem:[#allocation79_spill] sm:$0xff]  ;;  %v12012_v45 = vld [vmem:[#allocation78_spill] sm:$0xff] }
 0xc0d   :  { %v9215_v41 = vpop.eup %9214 }
 0xc0e   :  { %5432 = vperm.xlu1 %9012, %v5323_v21   ;;  %v5328_v46 = vmul.f32 %v9215_v41, %v12006_v12  ;;  %v12011_v21 = vld [vmem:[#allocation76_spill] sm:$0xff] }
 0xc0f   :  { %v9217_v40 = vpop.eup %9216 }
 0xc10   :  { %5447 = vperm.xlu0 %9013, %v5328_v46   ;;  %v5327_v30 = vmul.f32 %v9217_v40, %v12009_v53 }
 0xc11   :  { %v9219_v26 = vpop.eup %9218 }
 0xc12   :  { %5438 = vperm.xlu1 %9012, %v5325_v56   ;;  %v5330_v60 = vmul.f32 %v9219_v26, %v12008_v25 }
 0xc13   :  { %v9221_v23 = vpop.eup %9220 }
 0xc14   :  { %5453 = vperm.xlu0 %9013, %v5330_v60   ;;  %v5329_v49 = vmul.f32 %v9221_v23, %v12011_v21  ;;  %v11198_v60 = vld [vmem:[%s11732_s4 + $0x328] sm:$0xff] }
 0xc15   :  { %v9223_v3 = vpop.eup %9222  ;;  %8878 = vmatprep.subr.mxu1 %v11198_v60 }
 0xc16   :  { %5444 = vperm.xlu1 %9012, %v5327_v30   ;;  %v5332_v28 = vmul.f32 %v9223_v3, %v12010_v59 }
 0xc17   :  { %v9225_v41 = vpop.eup %9224 }
 0xc18   :  { %5459 = vperm.xlu0 %9013, %v5332_v28   ;;  %v5331_v46 = vmul.f32 %v9225_v41, %v12012_v45 }
 0xc1a   :  { %5450 = vperm.xlu1 %9012, %v5329_v49  }
 0xc1c   :  { %5987 = vrot.lane.b32.xlu0 %v10950_v6, %s9315_s7 }
 0xc1e   :  { %5456 = vperm.xlu1 %9012, %v5331_v46  }
 0xc20   :  { %5993 = vrot.lane.b32.xlu0 %v10952_v24, %s9315_s7 }
 0xc22   :  { %5989 = vrot.lane.b32.xlu1 %v10944_v36, %s9315_s7 }
 0xc24   :  { %5997 = vrot.lane.b32.xlu0 %v10965_v50, %s9315_s7 }
 0xc26   :  { %5991 = vrot.lane.b32.xlu1 %v10958_v32, %s9315_s7 }
 0xc28   :  { %6021 = vrot.lane.b32.xlu0 %v11055_v37, %s9315_s7 }
 0xc2a   :  { %5995 = vrot.lane.b32.xlu1 %v10974_v11, %s9315_s7 }
 0xc2c   :  { %6025 = vrot.lane.b32.xlu0 %v11069_v7, %s9315_s7 }
 0xc2e   :  { %6019 = vrot.lane.b32.xlu1 %v11063_v35, %s9315_s7 }
 0xc30   :  { %6001 = vrot.lane.b32.xlu0 %v10981_v57, %s9315_s7 }
 0xc32   :  { %6023 = vrot.lane.b32.xlu1 %v11076_v51, %s9315_s7 }
 0xc34   :  { %6029 = vrot.lane.b32.xlu0 %v11083_v8, %s9315_s7 }
 0xc36   :  { %5999 = vrot.lane.b32.xlu1 %v10991_v15, %s9315_s7 }
 0xc38   :  { %6005 = vrot.lane.b32.xlu0 %v10997_v39, %s9315_s7 }
 0xc3a   :  { %6027 = vrot.lane.b32.xlu1 %v11090_v1, %s9315_s7 }
 0xc3c   :  { %6033 = vrot.lane.b32.xlu0 %v11097_v44, %s9315_s7 }
 0xc3e   :  { %6003 = vrot.lane.b32.xlu1 %v11006_v22, %s9315_s7 }
 0xc40   :  { %6009 = vrot.lane.b32.xlu0 %v11012_v47, %s9315_s7 }
 0xc42   :  { %6031 = vrot.lane.b32.xlu1 %v11104_v16, %s9315_s7 }
 0xc46   :  { %6007 = vrot.lane.b32.xlu1 %v11019_v52, %s9315_s7 }
 0xc57   :  { %v5370_v35 = vpop.permute.xlu0 %5369 }
 0xc58   :  { %v5468_v37 = vrot.slane %v5370_v35, %v10305_v55 }
 0xc59   :  { %v5367_v49 = vpop.permute.xlu1 %5366 }
 0xc5a   :  { %v5464_v52 = vrot.slane %v5367_v49, %v10302_v42 }
 0xc5c   :  { %v5469_v41 = vsel %vm2277_vm7, %v5468_v37, %v5464_v52 }
 0xc5d   :  { %v5373_v7 = vpop.permute.xlu1 %5372 }
 0xc5e   :  { %v5473_v8 = vrot.slane %v5373_v7, %v10302_v42 }
 0xc5f   :  { %v5382_v51 = vpop.permute.xlu0 %5381 }
 0xc60   :  { %v5486_v44 = vrot.slane %v5382_v51, %v10305_v55 }
 0xc61   :  { %v5376_v36 = vpop.permute.xlu1 %5375 }
 0xc62   :  { %v5477_v39 = vrot.slane %v5376_v36, %v10305_v55 }
 0xc63   :  { %v5388_v6 = vpop.permute.xlu0 %5387 }
 0xc64   :  { %v5478_v40 = vsel %vm2277_vm7, %v5477_v39, %v5473_v8  ;;  %v5495_v56 = vrot.slane %v5388_v6, %v10305_v55 }
 0xc65   :  { %v5379_v24 = vpop.permute.xlu1 %5378  ;;  %v5605_v7 = vsel %vm2414_vm8, %v5478_v40, %v5469_v41 }
 0xc66   :  { %v5482_v22 = vrot.slane %v5379_v24, %v10302_v42 }
 0xc67   :  { %v5394_v32 = vpop.permute.xlu0 %5393 }
 0xc68   :  { %v5487_v23 = vsel %vm2277_vm7, %v5486_v44, %v5482_v22  ;;  %v5504_v3 = vrot.slane %v5394_v32, %v10305_v55 }
 0xc69   :  { %v5385_v50 = vpop.permute.xlu1 %5384  ;;  %v5606_v24 = vsel %vm2416_vm9, %v5487_v23, %v5605_v7 }
 0xc6a   :  { %v5491_v1 = vrot.slane %v5385_v50, %v10302_v42 }
 0xc6b   :  { %v5400_v11 = vpop.permute.xlu0 %5399 }
 0xc6c   :  { %v5496_v46 = vsel %vm2277_vm7, %v5495_v56, %v5491_v1  ;;  %v5513_v49 = vrot.slane %v5400_v11, %v10305_v55 }
 0xc6d   :  { %v5391_v57 = vpop.permute.xlu1 %5390  ;;  %v5607_v50 = vsel %vm2418_vm10, %v5496_v46, %v5606_v24 }
 0xc6e   :  { %v5500_v16 = vrot.slane %v5391_v57, %v10302_v42 }
 0xc6f   :  { %v5406_v15 = vpop.permute.xlu0 %5405 }
 0xc70   :  { %v5505_v51 = vsel %vm2277_vm7, %v5504_v3, %v5500_v16  ;;  %v5522_v36 = vrot.slane %v5406_v15, %v10305_v55 }
 0xc71   :  { %v5397_v47 = vpop.permute.xlu1 %5396  ;;  %v5608_v11 = vsel %vm2420_vm11, %v5505_v51, %v5607_v50 }
 0xc72   :  { %v5509_v26 = vrot.slane %v5397_v47, %v10302_v42 }
 0xc73   :  { %v5412_v30 = vpop.permute.xlu0 %5411 }
 0xc74   :  { %v5514_v32 = vsel %vm2277_vm7, %v5513_v49, %v5509_v26  ;;  %v5531_v22 = vrot.slane %v5412_v30, %v10305_v55 }
 0xc75   :  { %v5403_v28 = vpop.permute.xlu1 %5402  ;;  %v5609_v52 = vsel %vm2422_vm12, %v5514_v32, %v5608_v11 }
 0xc76   :  { %v5518_v35 = vrot.slane %v5403_v28, %v10302_v42 }
 0xc77   :  { %v5418_v6 = vpop.permute.xlu0 %5417 }
 0xc78   :  { %v5523_v57 = vsel %vm2277_vm7, %v5522_v36, %v5518_v35 }
 0xc79   :  { %v5409_v39 = vpop.permute.xlu1 %5408  ;;  %v5610_v8 = vsel %vm2424_vm13, %v5523_v57, %v5609_v52  ;;  %v5540_v57 = vrot.slane %v5418_v6, %v10305_v55 }
 0xc7a   :  { %v5527_v47 = vrot.slane %v5409_v39, %v10302_v42 }
 0xc7b   :  { %v5424_v37 = vpop.permute.xlu0 %5423 }
 0xc7c   :  { %v5532_v15 = vsel %vm2277_vm7, %v5531_v22, %v5527_v47  ;;  %v5549_v51 = vrot.slane %v5424_v37, %v10305_v55  ;;  %v12013_v22 = vld [vmem:[#allocation55_spill] sm:$0xff] }
 0xc7d   :  { %v5415_v1 = vpop.permute.xlu1 %5414  ;;  %v11270_v44 = vsel %vm2426_vm14, %v5532_v15, %v5610_v8 }
 0xc7e   :  { %8875 = vmatprep.mubr.msk.f32.mxu1 %vm1671_vm6, %v11270_v44  ;;  %v5621_v16 = vsel %vm1671_vm6, %v11270_v44, 0.0  ;;  %v5536_v36 = vrot.slane %v5415_v1, %v10302_v42 }
 0xc7f   :  { %5622 = vadd.xlane.f32.xlu1 %v5621_v16  ;;  %v5430_v30 = vpop.permute.xlu0 %5429 }
 0xc80   :  { %v5558_v32 = vrot.slane %v5430_v30, %v10305_v55  ;;  %v5541_v15 = vsel %vm2277_vm7, %v5540_v57, %v5536_v36  ;;  %v12014_v36 = vld [vmem:[#allocation57_spill] sm:$0xff]  ;;  %v5057_v57 = vld [vmem:[%s11732_s4 + $0x320] sm:$0xff] }
 0xc81   :  { %v5421_v40 = vpop.permute.xlu1 %5420 }
 0xc82   :  { %v5545_v46 = vrot.slane %v5421_v40, %v10302_v42 }
 0xc83   :  { %v5436_v56 = vpop.permute.xlu0 %5435 }
 0xc84   :  { %v5550_v39 = vsel %vm2277_vm7, %v5549_v51, %v5545_v46 }
 0xc85   :  { %v5427_v26 = vpop.permute.xlu1 %5426  ;;  %v5612_v16 = vsel %vm2414_vm8, %v5550_v39, %v5541_v15 }
 0xc86   :  { %v5554_v49 = vrot.slane %v5427_v26, %v10302_v42 }
 0xc87   :  { %v5442_v23 = vpop.permute.xlu0 %5441 }
 0xc88   :  { %v5559_v47 = vsel %vm2277_vm7, %v5558_v32, %v5554_v49  ;;  %v5576_v37 = vrot.slane %v5442_v23, %v10305_v55  ;;  %v11317_v32 = vld [vmem:[%s11732_s4 + $0x318] ss:$0 sm:$0xff] }
 0xc89   :  { %v5433_v3 = vpop.permute.xlu1 %5432  ;;  %v5613_v26 = vsel %vm2416_vm9, %v5559_v47, %v5612_v16  ;;  %v12015_v47 = vld [vmem:[#allocation51_spill] sm:$0xff]  ;;  %v12020_v16 = vld [vmem:[#allocation62_spill] sm:$0xff] }
 0xc8a   :  { %v5563_v24 = vrot.slane %v5433_v3, %v10302_v42 }
 0xc8b   :  { %v5448_v28 = vpop.permute.xlu0 %5447 }
 0xc8c   :  { %v5585_v6 = vrot.slane %v5448_v28, %v10305_v55 }
 0xc8d   :  { %v5439_v41 = vpop.permute.xlu1 %5438 }
 0xc8e   :  { %v5572_v50 = vrot.slane %v5439_v41, %v10302_v42 }
 0xc8f   :  { %v5454_v35 = vpop.permute.xlu0 %5453 }
 0xc90   :  { %6035 = vrot.lane.b32.xlu1 %v11116_v27, %s9315_s7  ;;  %v5567_v27 = vrot.slane %v5436_v56, %v10305_v55  ;;  %v5577_v30 = vsel %vm2277_vm7, %v5576_v37, %v5572_v50  ;;  %v5594_v40 = vrot.slane %v5454_v35, %v10305_v55 }
 0xc91   :  { %v5445_v7 = vpop.permute.xlu1 %5444 }
 0xc92   :  { %v5581_v11 = vrot.slane %v5445_v7, %v10302_v42  ;;  %v5568_v8 = vsel %vm2277_vm7, %v5567_v27, %v5563_v24  ;;  %v8814_v24 = vpop.f32.mrf.mxu1 }
 0xc93   :  { %v5460_v56 = vpop.permute.xlu0 %5459  ;;  %v5614_v3 = vsel %vm2418_vm10, %v5568_v8, %v5613_v26  ;;  %v11331_v27 = vadd.f32 %v8814_v24, %v11317_v32 }
 0xc94   :  { %6011 = vrot.lane.b32.xlu1 %v12013_v22, %s9315_s7  ;;  %v5586_v23 = vsel %vm2277_vm7, %v5585_v6, %v5581_v11  ;;  %v5615_v46 = vsel %vm2420_vm11, %v5577_v30, %v5614_v3  ;;  %v5603_v49 = vrot.slane %v5460_v56, %v10305_v55  ;;  %v12019_v6 = vld [vmem:[#allocation59_spill] sm:$0xff] }
 0xc95   :  { %v5451_v52 = vpop.permute.xlu1 %5450  ;;  %v5616_v35 = vsel %vm2422_vm12, %v5586_v23, %v5615_v46 }
 0xc96   :  { %v5590_v1 = vrot.slane %v5451_v52, %v10302_v42  ;;  %v12017_v52 = vld [vmem:[#allocation43_spill] sm:$0xff] }
 0xc97   :  { %v5988_v8 = vpop.permute.xlu0 %5987 }
 0xc98   :  { %6039 = vrot.lane.b32.xlu1 %v11129_v4, %s9315_s7  ;;  %v5595_v28 = vsel %vm2277_vm7, %v5594_v40, %v5590_v1  ;;  %v6083_v1 = vsel %vm1671_vm6, %v5988_v8, 0.0 }
 0xc99   :  { %v5457_v41 = vpop.permute.xlu1 %5456  ;;  %v5617_v4 = vsel %vm2424_vm13, %v5595_v28, %v5616_v35 }
 0xc9a   :  { %v5599_v7 = vrot.slane %v5457_v41, %v10302_v42 }
 0xc9b   :  { %v5994_v46 = vpop.permute.xlu0 %5993 }
 0xc9c   :  { %v5604_v51 = vsel %vm2277_vm7, %v5603_v49, %v5599_v7  ;;  %6015 = vrot.lane.b32.xlu1 %v12014_v36, %s9315_s7 }
 0xc9d   :  { %v11320_v50 = vsel %vm2426_vm14, %v5604_v51, %v5617_v4  ;;  %v5990_v11 = vpop.permute.xlu1 %5989 }
 0xc9e   :  { %8876 = vmatmul.mubr.msk.f32.vlgmr.msra.gmra.mxu1 %vm1671_vm6, %v11320_v50  ;;  %v5624_v39 = vsel %vm1671_vm6, %v11320_v50, 0.0  ;;  %v6086_v24 = vsel %vm1671_vm6, %v5990_v11, 0.0 }
 0xc9f   :  { %8879 = vmatpush3.msra.mxu1 %v11198_v60  ;;  %5625 = vadd.xlane.f32.xlu0 %v5624_v39  ;;  %v12016_v60 = vld [vmem:[#allocation2_spill] sm:$0xff]  ;;  %v5998_v35 = vpop.permute.xlu0 %5997 }
 0xca0   :  { %8880 = vmatprep.subr.mxu1 %v5057_v57  ;;  %6043 = vrot.lane.b32.xlu1 %v11142_v54, %s9315_s7  ;;  %v12018_v54 = vld [vmem:[#allocation49_spill] sm:$0xff] }
 0xca1   :  { %8881 = vmatpush3.msra.mxu1 %v5057_v57  ;;  %v5992_v22 = vpop.permute.xlu1 %5991 }
 0xca2   :  { %8885 = vmatprep.subr.mxu1 %v11331_v27  ;;  %v6089_v39 = vsel %vm1671_vm6, %v5992_v22, 0.0 }
 0xca3   :  { %v6022_v57 = vpop.permute.xlu0 %6021 }
 0xca4   :  { %6047 = vrot.lane.b32.xlu1 %v11153_v34, %s9315_s7 }
 0xca5   :  { %v5996_v37 = vpop.permute.xlu1 %5995 }
 0xca6   :  { %v6095_v30 = vsel %vm1671_vm6, %v5996_v37, 0.0  ;;  %v6098_v37 = vsel %vm1671_vm6, %v5998_v35, 0.0 }
 0xca9   :  { %v6020_v15 = vpop.permute.xlu1 %6019 }
 0xcaa   :  { %v6131_v56 = vsel %vm1671_vm6, %v6020_v15, 0.0  ;;  %v6134_v15 = vsel %vm1671_vm6, %v6022_v57, 0.0 }
 0xcad   :  { %v6024_v34 = vpop.permute.xlu1 %6023 }
 0xcae   :  { %v6137_v23 = vsel %vm1671_vm6, %v6024_v34, 0.0 }
 0xcb1   :  { %v6000_v40 = vpop.permute.xlu1 %5999 }
 0xcb2   :  { %v6101_v3 = vsel %vm1671_vm6, %v6000_v40, 0.0 }
 0xcb5   :  { %6037 = vrot.lane.b32.xlu0 %v12015_v47, %s9315_s7  ;;  %v6028_v26 = vpop.permute.xlu1 %6027  ;;  %v6026_v47 = vpop.permute.xlu0 %6025 }
 0xcb6   :  { %v6143_v41 = vsel %vm1671_vm6, %v6028_v26, 0.0  ;;  %v6140_v11 = vsel %vm1671_vm6, %v6026_v47, 0.0 }
 0xcb9   :  { %6013 = vrot.lane.b32.xlu0 %v12016_v60, %s9315_s7  ;;  %v6004_v28 = vpop.permute.xlu1 %6003  ;;  %v6092_v60 = vsel %vm1671_vm6, %v5994_v46, 0.0 }
 0xcba   :  { %v6107_v7 = vsel %vm1671_vm6, %v6004_v28, 0.0 }
 0xcbd   :  { %6041 = vrot.lane.b32.xlu0 %v12017_v52, %s9315_s7  ;;  %v6032_v49 = vpop.permute.xlu1 %6031  ;;  %v6002_v52 = vpop.permute.xlu0 %6001 }
 0xcbe   :  { %v6149_v51 = vsel %vm1671_vm6, %v6032_v49, 0.0  ;;  %v6104_v8 = vsel %vm1671_vm6, %v6002_v52, 0.0 }
 0xcc1   :  { %6017 = vrot.lane.b32.xlu0 %v12018_v54, %s9315_s7  ;;  %v6008_v36 = vpop.permute.xlu1 %6007  ;;  %v6030_v54 = vpop.permute.xlu0 %6029 }
 0xcc2   :  { %v6113_v4 = vsel %vm1671_vm6, %v6008_v36, 0.0  ;;  %v6146_v22 = vsel %vm1671_vm6, %v6030_v54, 0.0 }
 0xcc5   :  { %6045 = vrot.lane.b32.xlu0 %v12019_v6, %s9315_s7  ;;  %v6006_v6 = vpop.permute.xlu0 %6005 }
 0xcc8   :  { %6084 = vadd.xlane.f32.xlu1 %v6083_v1  ;;  %v6110_v1 = vsel %vm1671_vm6, %v6006_v6, 0.0 }
 0xcc9   :  { %6049 = vrot.lane.b32.xlu0 %v12020_v16, %s9315_s7  ;;  %v6034_v34 = vpop.permute.xlu0 %6033 }
 0xccc   :  { %6096 = vadd.xlane.f32.xlu1 %v6095_v30  ;;  %v6152_v30 = vsel %vm1671_vm6, %v6034_v34, 0.0 }
 0xccd   :  { %v6010_v40 = vpop.permute.xlu0 %6009 }
 0xcd0   :  { %6132 = vadd.xlane.f32.xlu1 %v6131_v56 }
 0xcd4   :  { %6138 = vadd.xlane.f32.xlu1 %v6137_v23  ;;  %v6116_v23 = vsel %vm1671_vm6, %v6010_v40, 0.0 }
 0xcd8   :  { %6102 = vadd.xlane.f32.xlu1 %v6101_v3 }
 0xcdc   :  { %6144 = vadd.xlane.f32.xlu1 %v6143_v41 }
 0xce0   :  { %6108 = vadd.xlane.f32.xlu1 %v6107_v7 }
 0xce4   :  { %6150 = vadd.xlane.f32.xlu1 %v6149_v51 }
 0xce8   :  { %6087 = vadd.xlane.f32.xlu0 %v6086_v24  ;;  %6114 = vadd.xlane.f32.xlu1 %v6113_v4 }
 0xcec   :  { %6090 = vadd.xlane.f32.xlu0 %v6089_v39 }
 0xcf0   :  { %6093 = vadd.xlane.f32.xlu0 %v6092_v60 }
 0xcf4   :  { %6099 = vadd.xlane.f32.xlu0 %v6098_v37 }
 0xcf8   :  { %6135 = vadd.xlane.f32.xlu0 %v6134_v15 }
 0xcfc   :  { %6141 = vadd.xlane.f32.xlu0 %v6140_v11 }
 0xd00   :  { %6105 = vadd.xlane.f32.xlu0 %v6104_v8 }
 0xd04   :  { %6147 = vadd.xlane.f32.xlu0 %v6146_v22 }
 0xd08   :  { %6111 = vadd.xlane.f32.xlu0 %v6110_v1  ;;  %v5623_v16 = vpop.xlane.xlu1 %5622 }
 0xd09   :  { %v5627_v34 = vadd.f32 1e-06, %v5623_v16 }
 0xd0b   :  { %9226 = vrcp.f32 %v5627_v34 }
 0xd0c   :  { %6153 = vadd.xlane.f32.xlu0 %v6152_v30  ;;  %v6036_v56 = vpop.permute.xlu1 %6035 }
 0xd0d   :  { %v6155_v26 = vsel %vm1671_vm6, %v6036_v56, 0.0 }
 0xd0e   :  { %6156 = vadd.xlane.f32.xlu1 %v6155_v26  ;;  %v4570_v26 = vpop.f32.mrf.mxu1 }
 0xd0f   :  { %v11390_v16 = vadd.f32 %v11317_v32, %v4570_v26 }
 0xd10   :  { %6117 = vadd.xlane.f32.xlu0 %v6116_v23  ;;  %v6012_v3 = vpop.permute.xlu1 %6011 }
 0xd11   :  { %v6119_v28 = vsel %vm1671_vm6, %v6012_v3, 0.0 }
 0xd12   :  { %6120 = vadd.xlane.f32.xlu1 %v6119_v28 }
 0xd14   :  { %v6040_v41 = vpop.permute.xlu1 %6039 }
 0xd15   :  { %v6161_v46 = vsel %vm1671_vm6, %v6040_v41, 0.0 }
 0xd16   :  { %6162 = vadd.xlane.f32.xlu1 %v6161_v46 }
 0xd18   :  { %v6016_v49 = vpop.permute.xlu1 %6015  ;;  %v11382_v3 = vpop.eup %9226 }
 0xd19   :  { %v6125_v7 = vsel %vm1671_vm6, %v6016_v49, 0.0 }
 0xd1a   :  { %6126 = vadd.xlane.f32.xlu1 %v6125_v7 }
 0xd1c   :  { %v6044_v35 = vpop.permute.xlu1 %6043 }
 0xd1d   :  { %v6167_v51 = vsel %vm1671_vm6, %v6044_v35, 0.0 }
 0xd1e   :  { %6168 = vadd.xlane.f32.xlu1 %v6167_v51 }
 0xd20   :  { %v6048_v36 = vpop.permute.xlu1 %6047 }
 0xd21   :  { %v6173_v4 = vsel %vm1671_vm6, %v6048_v36, 0.0 }
 0xd22   :  { %6174 = vadd.xlane.f32.xlu1 %v6173_v4 }
 0xd28   :  { %v5626_v24 = vpop.xlane.xlu0 %5625 }
 0xd29   :  { %v5628_v1 = vadd.f32 1e-06, %v5626_v24 }
 0xd2b   :  { %9228 = vrcp.f32 %v5628_v1 }
 0xd2c   :  { %v6038_v57 = vpop.permute.xlu0 %6037 }
 0xd2d   :  { %v6158_v39 = vsel %vm1671_vm6, %v6038_v57, 0.0 }
 0xd2e   :  { %6159 = vadd.xlane.f32.xlu0 %v6158_v39 }
 0xd30   :  { %v6014_v47 = vpop.permute.xlu0 %6013 }
 0xd31   :  { %v6122_v60 = vsel %vm1671_vm6, %v6014_v47, 0.0 }
 0xd32   :  { %6123 = vadd.xlane.f32.xlu0 %v6122_v60 }
 0xd34   :  { %v6042_v37 = vpop.permute.xlu0 %6041 }
 0xd35   :  { %v6164_v52 = vsel %vm1671_vm6, %v6042_v37, 0.0 }
 0xd36   :  { %6165 = vadd.xlane.f32.xlu0 %v6164_v52 }
 0xd38   :  { %v6018_v15 = vpop.permute.xlu0 %6017  ;;  %v11384_v41 = vpop.eup %9228 }
 0xd39   :  { %v6128_v54 = vsel %vm1671_vm6, %v6018_v15, 0.0 }
 0xd3a   :  { %6129 = vadd.xlane.f32.xlu0 %v6128_v54 }
 0xd3c   :  { %v6046_v11 = vpop.permute.xlu0 %6045 }
 0xd3d   :  { %v6170_v8 = vsel %vm1671_vm6, %v6046_v11, 0.0 }
 0xd3e   :  { %6171 = vadd.xlane.f32.xlu0 %v6170_v8 }
 0xd40   :  { %v6050_v6 = vpop.permute.xlu0 %6049 }
 0xd41   :  { %v6176_v22 = vsel %vm1671_vm6, %v6050_v6, 0.0 }
 0xd42   :  { %6177 = vadd.xlane.f32.xlu0 %v6176_v22 }
 0xd51   :  { %v6085_v30 = vpop.xlane.xlu1 %6084 }
 0xd52   :  { %v8104_v40 = vclamps-f32 %v6085_v30, 5.0 }
 0xd54   :  { %v6243_v56 = vmul.f32 1.442695, %v8104_v40 }
 0xd55   :  { %v6097_v51 = vpop.xlane.xlu1 %6096 }
 0xd56   :  { %9230 = vpow2.f32 %v6243_v56  ;;  %v8108_v47 = vclamps-f32 %v6097_v51, 5.0 }
 0xd58   :  { %v6251_v15 = vmul.f32 1.442695, %v8108_v47 }
 0xd59   :  { %v6133_v32 = vpop.xlane.xlu1 %6132 }
 0xd5a   :  { %v8120_v54 = vclamps-f32 %v6133_v32, 5.0 }
 0xd5c   :  { %v6275_v22 = vmul.f32 1.442695, %v8120_v54 }
 0xd5d   :  { %v6139_v4 = vpop.xlane.xlu1 %6138 }
 0xd5e   :  { %v8877_v23 = vpop.f32.mrf.mxu1  ;;  %v8122_v34 = vclamps-f32 %v6139_v4, 5.0 }
 0xd5f   :  { %v5711_v49 = vmul.f32 %v11384_v41, %v8877_v23 }
 0xd60   :  { %v5701_v28 = vpop.f32.mrf.mxu1  ;;  %v6279_v23 = vmul.f32 1.442695, %v8122_v34 }
 0xd61   :  { %v5710_v46 = vmul.f32 %v11382_v3, %v5701_v28  ;;  %v6103_v60 = vpop.xlane.xlu1 %6102 }
 0xd62   :  { %v8110_v26 = vclamps-f32 %v6103_v60, 5.0 }
 0xd63   :  { %v9231_v7 = vpop.eup %9230  ;;  %8882 = vmatprep.mubr.msk.f32.mxu1 %vm1671_vm6, %v5710_v46 }
 0xd64   :  { %8883 = vmatmul.mubr.msk.f32.vlgmr.msra.gmra.mxu1 %vm1671_vm6, %v5711_v49  ;;  %v6307_v35 = vmul.f32 %v9231_v7, %v10121_v20  ;;  %v6255_v32 = vmul.f32 1.442695, %v8110_v26 }
 0xd65   :  { %8886 = vmatpush3.msra.mxu1 %v11331_v27  ;;  %8889 = vmatprep.mubr.msk.f32.mxu1 %vm1671_vm6, %v11270_v44  ;;  %v6145_v6 = vpop.xlane.xlu1 %6144 }
 0xd66   :  { %8887 = vmatprep.subr.mxu1 %v11390_v16  ;;  %6372 = vperm.xlu1 %9012, %v6307_v35  }
 0xd67   :  { %8888 = vmatpush3.msra.mxu1 %v11390_v16 }
 0xd68   :  { %8890 = vmatmul.mubr.msk.f32.vlgmr.msra.gmra.mxu1 %vm1671_vm6, %v11320_v50 }
 0xd69   :  { %v6109_v28 = vpop.xlane.xlu1 %6108 }
 0xd71   :  { %v6088_v36 = vpop.xlane.xlu0 %6087 }
 0xd72   :  { %v8105_v24 = vclamps-f32 %v6088_v36, 5.0  ;;  %v8124_v36 = vclamps-f32 %v6145_v6, 5.0 }
 0xd74   :  { %v6245_v57 = vmul.f32 1.442695, %v8105_v24  ;;  %v6283_v60 = vmul.f32 1.442695, %v8124_v36 }
 0xd75   :  { %v6091_v20 = vpop.xlane.xlu0 %6090 }
 0xd76   :  { %9232 = vpow2.f32 %v6245_v57  ;;  %v8106_v39 = vclamps-f32 %v6091_v20, 5.0  ;;  %v6151_v20 = vpop.xlane.xlu1 %6150 }
 0xd78   :  { %v6247_v44 = vmul.f32 1.442695, %v8106_v39 }
 0xd79   :  { %v6094_v37 = vpop.xlane.xlu0 %6093 }
 0xd7a   :  { %9234 = vpow2.f32 %v6247_v44  ;;  %v8107_v52 = vclamps-f32 %v6094_v37, 5.0  ;;  %v6115_v6 = vpop.xlane.xlu1 %6114 }
 0xd7b   :  { %v8114_v26 = vclamps-f32 %v6115_v6, 5.0 }
 0xd7c   :  { %v6249_v11 = vmul.f32 1.442695, %v8107_v52 }
 0xd7d   :  { %v6100_v8 = vpop.xlane.xlu0 %6099 }
 0xd7e   :  { %9236 = vpow2.f32 %v6249_v11  ;;  %v8109_v50 = vclamps-f32 %v6100_v8, 5.0  ;;  %v8126_v8 = vclamps-f32 %v6151_v20, 5.0 }
 0xd7f   :  { %9238 = vpow2.f32 %v6251_v15 }
 0xd80   :  { %v6253_v1 = vmul.f32 1.442695, %v8109_v50 }
 0xd81   :  { %v6136_v30 = vpop.xlane.xlu0 %6135 }
 0xd82   :  { %9240 = vpow2.f32 %v6253_v1  ;;  %v8121_v40 = vclamps-f32 %v6136_v30, 5.0 }
 0xd83   :  { %v9233_v56 = vpop.eup %9232  ;;  %9242 = vpow2.f32 %v6275_v22 }
 0xd84   :  { %v6277_v46 = vmul.f32 1.442695, %v8121_v40  ;;  %v6308_v49 = vmul.f32 %v9233_v56, %v10090_v14  ;;  %v8112_v14 = vclamps-f32 %v6109_v28, 5.0  ;;  %v6287_v56 = vmul.f32 1.442695, %v8126_v8 }
 0xd85   :  { %v6142_v7 = vpop.xlane.xlu0 %6141 }
 0xd86   :  { %9244 = vpow2.f32 %v6277_v46  ;;  %v8123_v35 = vclamps-f32 %v6142_v7, 5.0  ;;  %6375 = vperm.xlu0 %9013, %v6308_v49  }
 0xd87   :  { %v9235_v51 = vpop.eup %9234  ;;  %9246 = vpow2.f32 %v6279_v23 }
 0xd88   :  { %v6281_v4 = vmul.f32 1.442695, %v8123_v35  ;;  %v6309_v24 = vmul.f32 %v9235_v51, %v10112_v58  ;;  %v6259_v58 = vmul.f32 1.442695, %v8112_v14  ;;  %v6263_v35 = vmul.f32 1.442695, %v8114_v26 }
 0xd89   :  { %v6106_v57 = vpop.xlane.xlu0 %6105 }
 0xd8a   :  { %9248 = vpow2.f32 %v6281_v4  ;;  %v8111_v39 = vclamps-f32 %v6106_v57, 5.0  ;;  %6378 = vperm.xlu1 %9012, %v6309_v24  }
 0xd8b   :  { %v9237_v47 = vpop.eup %9236  ;;  %9250 = vpow2.f32 %v6255_v32 }
 0xd8c   :  { %v6257_v44 = vmul.f32 1.442695, %v8111_v39  ;;  %v6310_v37 = vmul.f32 %v9237_v47, %v10137_v2  ;;  %v9239_v52 = vpop.eup %9238 }
 0xd8d   :  { %v6148_v15 = vpop.xlane.xlu0 %6147  ;;  %v6311_v34 = vmul.f32 %v9239_v52, %v10145_v33 }
 0xd8e   :  { %9252 = vpow2.f32 %v6257_v44  ;;  %v8125_v54 = vclamps-f32 %v6148_v15, 5.0  ;;  %6381 = vperm.xlu1 %9012, %v6310_v37  }
 0xd8f   :  { %v9241_v11 = vpop.eup %9240  ;;  %9254 = vpow2.f32 %v6283_v60 }
 0xd90   :  { %v6285_v50 = vmul.f32 1.442695, %v8125_v54  ;;  %v6312_v22 = vmul.f32 %v9241_v11, %v10160_v62  ;;  %v9243_v1 = vpop.eup %9242 }
 0xd91   :  { %v6112_v30 = vpop.xlane.xlu0 %6111  ;;  %v6323_v46 = vmul.f32 %v9243_v1, %v10166_v38 }
 0xd92   :  { %9256 = vpow2.f32 %v6285_v50  ;;  %v8113_v40 = vclamps-f32 %v6112_v30, 5.0  ;;  %6387 = vperm.xlu0 %9013, %v6312_v22   ;;  %6384 = vperm.xlu1 %9012, %v6311_v34  }
 0xd93   :  { %v9245_v2 = vpop.eup %9244  ;;  %9258 = vpow2.f32 %v6259_v58 }
 0xd94   :  { %v6261_v23 = vmul.f32 1.442695, %v8113_v40  ;;  %v6324_v28 = vmul.f32 %v9245_v2, %v10172_v43  ;;  %v9247_v49 = vpop.eup %9246 }
 0xd95   :  { %v6154_v7 = vpop.xlane.xlu0 %6153  ;;  %v6325_v57 = vmul.f32 %v9247_v49, %v12001_v19 }
 0xd96   :  { %9260 = vpow2.f32 %v6261_v23  ;;  %v8127_v62 = vclamps-f32 %v6154_v7, 5.0  ;;  %6423 = vperm.xlu0 %9013, %v6324_v28   ;;  %6420 = vperm.xlu1 %9012, %v6323_v46  }
 0xd97   :  { %v9249_v33 = vpop.eup %9248  ;;  %9262 = vpow2.f32 %v6287_v56  ;;  %v6157_v51 = vpop.xlane.xlu1 %6156 }
 0xd98   :  { %v9251_v32 = vpop.eup %9250  ;;  %v6289_v36 = vmul.f32 1.442695, %v8127_v62  ;;  %v8128_v4 = vclamps-f32 %v6157_v51, 5.0  ;;  %v6326_v24 = vmul.f32 %v9249_v33, %v10176_v5 }
 0xd99   :  { %v6118_v43 = vpop.xlane.xlu0 %6117  ;;  %v6313_v47 = vmul.f32 %v9251_v32, %v10178_v17 }
 0xd9a   :  { %9264 = vpow2.f32 %v6289_v36  ;;  %v8115_v38 = vclamps-f32 %v6118_v43, 5.0  ;;  %6429 = vperm.xlu0 %9013, %v6326_v24   ;;  %6426 = vperm.xlu1 %9012, %v6325_v57   ;;  %v6291_v14 = vmul.f32 1.442695, %v8128_v4 }
 0xd9b   :  { %v9253_v20 = vpop.eup %9252  ;;  %9266 = vpow2.f32 %v6263_v35  ;;  %v6121_v39 = vpop.xlane.xlu1 %6120 }
 0xd9c   :  { %v9255_v60 = vpop.eup %9254  ;;  %v6265_v44 = vmul.f32 1.442695, %v8115_v38  ;;  %v8116_v37 = vclamps-f32 %v6121_v39, 5.0  ;;  %v6314_v52 = vmul.f32 %v9253_v20, %v10180_v48  ;;  %v12022_v38 = vld [vmem:[#allocation74_spill] sm:$0xff] }
 0xd9d   :  { %v6327_v15 = vmul.f32 %v9255_v60, %v12003_v18 }
 0xd9e   :  { %9268 = vpow2.f32 %v6265_v44  ;;  %6393 = vperm.xlu0 %9013, %v6314_v52   ;;  %6390 = vperm.xlu1 %9012, %v6313_v47   ;;  %v6267_v11 = vmul.f32 1.442695, %v8116_v37 }
 0xd9f   :  { %v9257_v5 = vpop.eup %9256  ;;  %v6163_v19 = vpop.xlane.xlu1 %6162  ;;  %9270 = vpow2.f32 %v6291_v14 }
 0xda0   :  { %v9259_v54 = vpop.eup %9258  ;;  %v8130_v58 = vclamps-f32 %v6163_v19, 5.0  ;;  %v6328_v8 = vmul.f32 %v9257_v5, %v12000_v29  ;;  %9272 = vpow2.f32 %v6267_v11 }
 0xda1   :  { %v6315_v50 = vmul.f32 %v9259_v54, %v10186_v9 }
 0xda2   :  { %6435 = vperm.xlu0 %9013, %v6328_v8   ;;  %6432 = vperm.xlu1 %9012, %v6327_v15   ;;  %v6295_v22 = vmul.f32 1.442695, %v8130_v58 }
 0xda3   :  { %v9261_v17 = vpop.eup %9260  ;;  %v6127_v6 = vpop.xlane.xlu1 %6126 }
 0xda4   :  { %v9263_v48 = vpop.eup %9262  ;;  %v8118_v34 = vclamps-f32 %v6127_v6, 5.0  ;;  %v6316_v1 = vmul.f32 %v9261_v17, %v10188_v13  ;;  %9274 = vpow2.f32 %v6295_v22  ;;  %v12023_v17 = vld [vmem:[#allocation48_spill] sm:$0xff]  ;;  %v12024_v6 = vld [vmem:[#allocation69_spill] sm:$0xff] }
 0xda5   :  { %v6329_v40 = vmul.f32 %v9263_v48, %v12005_v0  ;;  %v5062_v0 = vld [vmem:[%s11732_s4 + $0x350] sm:$0xff] }
 0xda6   :  { %6399 = vperm.xlu0 %9013, %v6316_v1   ;;  %6396 = vperm.xlu1 %9012, %v6315_v50   ;;  %v6271_v29 = vmul.f32 1.442695, %v8118_v34  ;;  %v12025_v1 = vld [vmem:[#allocation71_spill] sm:$0xff] }
 0xda7   :  { %v9265_v18 = vpop.eup %9264  ;;  %v6169_v30 = vpop.xlane.xlu1 %6168  ;;  %8892 = vmatprep.subr.mxu1 %v5062_v0 }
 0xda8   :  { %v9267_v2 = vpop.eup %9266  ;;  %v8132_v56 = vclamps-f32 %v6169_v30, 5.0  ;;  %v6330_v26 = vmul.f32 %v9265_v18, %v12002_v61  ;;  %9276 = vpow2.f32 %v6271_v29  ;;  %v5061_v61 = vld [vmem:[%s11732_s4 + $0x348] sm:$0xff]  ;;  %8893 = vmatpush3.msra.mxu1 %v5062_v0 }
 0xda9   :  { %v6317_v28 = vmul.f32 %v9267_v2, %v10194_v10  ;;  %8894 = vmatprep.subr.mxu1 %v5061_v61  ;;  %v12026_v2 = vld [vmem:[#allocation75_spill] sm:$0xff] }
 0xdaa   :  { %6441 = vperm.xlu0 %9013, %v6330_v26   ;;  %6438 = vperm.xlu1 %9012, %v6329_v40   ;;  %v6299_v13 = vmul.f32 1.442695, %v8132_v56 }
 0xdab   :  { %v9269_v9 = vpop.eup %9268  ;;  %v6175_v23 = vpop.xlane.xlu1 %6174  ;;  %8895 = vmatpush3.msra.mxu1 %v5061_v61 }
 0xdac   :  { %v8134_v46 = vclamps-f32 %v6175_v23, 5.0  ;;  %v6318_v49 = vmul.f32 %v9269_v9, %v10196_v63  ;;  %v9271_v7 = vpop.eup %9270  ;;  %9278 = vpow2.f32 %v6299_v13  ;;  %v12021_v63 = vld [vmem:[#allocation70_spill] sm:$0xff] }
 0xdad   :  { %v6331_v10 = vmul.f32 %v9271_v7, %v12007_v31  ;;  %v9273_v33 = vpop.eup %9272 }
 0xdae   :  { %6405 = vperm.xlu0 %9013, %v6318_v49   ;;  %6402 = vperm.xlu1 %9012, %v6317_v28   ;;  %v6303_v62 = vmul.f32 1.442695, %v8134_v46  ;;  %v6319_v35 = vmul.f32 %v9273_v33, %v12021_v63  ;;  %v12027_v28 = vld [vmem:[#allocation47_spill] sm:$0xff] }
 0xdb0   :  { %9280 = vpow2.f32 %v6303_v62 }
 0xdb1   :  { %v9275_v51 = vpop.eup %9274 }
 0xdb2   :  { %6444 = vperm.xlu1 %9012, %v6331_v10   ;;  %v6333_v4 = vmul.f32 %v9275_v51, %v12009_v53 }
 0xdb5   :  { %v9277_v24 = vpop.eup %9276 }
 0xdb6   :  { %6408 = vperm.xlu1 %9012, %v6319_v35   ;;  %v6321_v20 = vmul.f32 %v9277_v24, %v12022_v38 }
 0xdb7   :  { %v6160_v32 = vpop.xlane.xlu0 %6159 }
 0xdb8   :  { %v8129_v36 = vclamps-f32 %v6160_v32, 5.0 }
 0xdb9   :  { %v9279_v39 = vpop.eup %9278 }
 0xdba   :  { %v6293_v57 = vmul.f32 1.442695, %v8129_v36  ;;  %6450 = vperm.xlu1 %9012, %v6333_v4   ;;  %v6335_v44 = vmul.f32 %v9279_v39, %v12011_v21 }
 0xdbb   :  { %v6124_v43 = vpop.xlane.xlu0 %6123 }
 0xdbc   :  { %9282 = vpow2.f32 %v6293_v57  ;;  %v8117_v31 = vclamps-f32 %v6124_v43, 5.0 }
 0xdbd   :  { %v9281_v37 = vpop.eup %9280 }
 0xdbe   :  { %v6269_v47 = vmul.f32 1.442695, %v8117_v31  ;;  %6414 = vperm.xlu1 %9012, %v6321_v20   ;;  %v6337_v19 = vmul.f32 %v9281_v37, %v12012_v45 }
 0xdbf   :  { %v6166_v60 = vpop.xlane.xlu0 %6165 }
 0xdc0   :  { %9284 = vpow2.f32 %v6269_v47  ;;  %v8131_v14 = vclamps-f32 %v6166_v60, 5.0 }
 0xdc2   :  { %v6297_v52 = vmul.f32 1.442695, %v8131_v14  ;;  %6456 = vperm.xlu1 %9012, %v6335_v44  }
 0xdc3   :  { %v6130_v53 = vpop.xlane.xlu0 %6129 }
 0xdc4   :  { %9286 = vpow2.f32 %v6297_v52  ;;  %v8119_v5 = vclamps-f32 %v6130_v53, 5.0 }
 0xdc6   :  { %v6273_v15 = vmul.f32 1.442695, %v8119_v5  ;;  %6462 = vperm.xlu1 %9012, %v6337_v19  }
 0xdc7   :  { %v6172_v54 = vpop.xlane.xlu0 %6171 }
 0xdc8   :  { %9288 = vpow2.f32 %v6273_v15  ;;  %v8133_v11 = vclamps-f32 %v6172_v54, 5.0 }
 0xdc9   :  { %v9283_v58 = vpop.eup %9282 }
 0xdca   :  { %v6301_v8 = vmul.f32 1.442695, %v8133_v11  ;;  %6641 = vrot.lane.b32.xlu1 %v12023_v17, %s9315_s7  ;;  %v6332_v21 = vmul.f32 %v9283_v58, %v12024_v6 }
 0xdcb   :  { %v6178_v50 = vpop.xlane.xlu0 %6177 }
 0xdcc   :  { %9290 = vpow2.f32 %v6301_v8  ;;  %v8135_v48 = vclamps-f32 %v6178_v50, 5.0  ;;  %6447 = vperm.xlu0 %9013, %v6332_v21  }
 0xdcd   :  { %v9285_v22 = vpop.eup %9284 }
 0xdce   :  { %v6305_v34 = vmul.f32 1.442695, %v8135_v48  ;;  %v6320_v45 = vmul.f32 %v9285_v22, %v12025_v1 }
 0xdd0   :  { %9292 = vpow2.f32 %v6305_v34  ;;  %6411 = vperm.xlu0 %9013, %v6320_v45  }
 0xdd1   :  { %v9287_v18 = vpop.eup %9286 }
 0xdd2   :  { %v6334_v30 = vmul.f32 %v9287_v18, %v12006_v12 }
 0xdd4   :  { %6453 = vperm.xlu0 %9013, %v6334_v30  }
 0xdd5   :  { %v9289_v40 = vpop.eup %9288 }
 0xdd6   :  { %v6322_v29 = vmul.f32 %v9289_v40, %v12026_v2 }
 0xdd8   :  { %6417 = vperm.xlu0 %9013, %v6322_v29  }
 0xdd9   :  { %v9291_v56 = vpop.eup %9290 }
 0xdda   :  { %v6336_v26 = vmul.f32 %v9291_v56, %v12008_v25 }
 0xddc   :  { %6459 = vperm.xlu0 %9013, %v6336_v26  }
 0xddd   :  { %v9293_v9 = vpop.eup %9292 }
 0xdde   :  { %v6338_v23 = vmul.f32 %v9293_v9, %v12010_v59 }
 0xde0   :  { %6465 = vperm.xlu0 %9013, %v6338_v23  }
 0xde1   :  { %v6373_v13 = vpop.permute.xlu1 %6372 }
 0xde2   :  { %v6470_v0 = vrot.slane %v6373_v13, %v10302_v42 }
 0xde4   :  { %6639 = vrot.lane.b32.xlu0 %v12027_v28, %s9315_s7 }
 0xe01   :  { %v6376_v46 = vpop.permute.xlu0 %6375 }
 0xe02   :  { %v6474_v12 = vrot.slane %v6376_v46, %v10305_v55 }
 0xe04   :  { %v6475_v62 = vsel %vm2277_vm7, %v6474_v12, %v6470_v0 }
 0xe05   :  { %v6379_v49 = vpop.permute.xlu1 %6378 }
 0xe06   :  { %v6479_v61 = vrot.slane %v6379_v49, %v10302_v42 }
 0xe09   :  { %v6382_v7 = vpop.permute.xlu1 %6381 }
 0xe0a   :  { %v6483_v25 = vrot.slane %v6382_v7, %v10305_v55 }
 0xe0c   :  { %v6484_v59 = vsel %vm2277_vm7, %v6483_v25, %v6479_v61 }
 0xe0d   :  { %v6611_v10 = vsel %vm2414_vm8, %v6484_v59, %v6475_v62  ;;  %v6388_v33 = vpop.permute.xlu0 %6387  ;;  %v6385_v63 = vpop.permute.xlu1 %6384 }
 0xe0e   :  { %v6492_v35 = vrot.slane %v6388_v33, %v10305_v55  ;;  %v6488_v51 = vrot.slane %v6385_v63, %v10302_v42 }
 0xe10   :  { %v6493_v32 = vsel %vm2277_vm7, %v6492_v35, %v6488_v51 }
 0xe11   :  { %v6612_v36 = vsel %vm2416_vm9, %v6493_v32, %v6611_v10  ;;  %v6424_v4 = vpop.permute.xlu0 %6423  ;;  %v6421_v24 = vpop.permute.xlu1 %6420 }
 0xe12   :  { %v6546_v57 = vrot.slane %v6424_v4, %v10305_v55  ;;  %v6542_v43 = vrot.slane %v6421_v24, %v10302_v42 }
 0xe14   :  { %v6547_v47 = vsel %vm2277_vm7, %v6546_v57, %v6542_v43 }
 0xe15   :  { %v6430_v31 = vpop.permute.xlu0 %6429  ;;  %v6427_v38 = vpop.permute.xlu1 %6426 }
 0xe16   :  { %v6555_v20 = vrot.slane %v6430_v31, %v10305_v55  ;;  %v6551_v39 = vrot.slane %v6427_v38, %v10302_v42 }
 0xe18   :  { %v6556_v60 = vsel %vm2277_vm7, %v6555_v20, %v6551_v39 }
 0xe19   :  { %v11460_v14 = vsel %vm2414_vm8, %v6556_v60, %v6547_v47  ;;  %v6391_v44 = vpop.permute.xlu1 %6390  ;;  %v6394_v58 = vpop.permute.xlu0 %6393 }
 0xe1d   :  { %v6433_v37 = vpop.permute.xlu1 %6432  ;;  %v6436_v21 = vpop.permute.xlu0 %6435 }
 0xe1e   :  { %v6564_v61 = vrot.slane %v6436_v21, %v10305_v55  ;;  %v6560_v25 = vrot.slane %v6433_v37, %v10302_v42 }
 0xe20   :  { %v6565_v43 = vsel %vm2277_vm7, %v6564_v61, %v6560_v25  ;;  %v12028_v61 = vld [vmem:[#allocation53_spill] sm:$0xff] }
 0xe21   :  { %v6397_v52 = vpop.permute.xlu1 %6396  ;;  %v6400_v22 = vpop.permute.xlu0 %6399 }
 0xe22   :  { %v6510_v56 = vrot.slane %v6400_v22, %v10305_v55  ;;  %v6506_v26 = vrot.slane %v6397_v52, %v10302_v42 }
 0xe24   :  { %v11462_v53 = vpop.f32.mrf.mxu1  ;;  %v6511_v49 = vsel %vm2277_vm7, %v6510_v56, %v6506_v26 }
 0xe25   :  { %v6439_v5 = vpop.permute.xlu1 %6438  ;;  %v6442_v1 = vpop.permute.xlu0 %6441 }
 0xe26   :  { %v11464_v19 = vpop.f32.mrf.mxu1  ;;  %v6573_v33 = vrot.slane %v6442_v1, %v10305_v55  ;;  %v6569_v63 = vrot.slane %v6439_v5, %v10302_v42  ;;  %v6619_v5 = vsel %vm2416_vm9, %v6565_v43, %v11460_v14 }
 0xe28   :  { %v8891_v15 = vpop.f32.mrf.mxu1  ;;  %v6574_v39 = vsel %vm2277_vm7, %v6573_v33, %v6569_v63 }
 0xe29   :  { %v6403_v54 = vpop.permute.xlu1 %6402  ;;  %v5871_v17 = vmul.f32 %v11384_v41, %v8891_v15  ;;  %v6406_v30 = vpop.permute.xlu0 %6405  ;;  %v6497_v41 = vrot.slane %v6391_v44, %v10302_v42 }
 0xe2a   :  { %v5861_v11 = vpop.f32.mrf.mxu1  ;;  %v6519_v9 = vrot.slane %v6406_v30, %v10305_v55  ;;  %v6515_v23 = vrot.slane %v6403_v54, %v10302_v42  ;;  %v6620_v54 = vsel %vm2418_vm10, %v6574_v39, %v6619_v5 }
 0xe2b   :  { %v5870_v8 = vmul.f32 %v11382_v3, %v5861_v11  ;;  %v6501_v3 = vrot.slane %v6394_v58, %v10305_v55 }
 0xe2c   :  { %v6520_v0 = vsel %vm2277_vm7, %v6519_v9, %v6515_v23  ;;  %v5064_v23 = vld [vmem:[%s11732_s4 + $0x360] sm:$0xff] }
 0xe2d   :  { %8896 = vmatprep.mubr.msk.f32.mxu1 %vm1671_vm6, %v5870_v8  ;;  %v6445_v6 = vpop.permute.xlu1 %6444  ;;  %v6502_v28 = vsel %vm2277_vm7, %v6501_v3, %v6497_v41 }
 0xe2e   :  { %8897 = vmatmul.mubr.msk.f32.vlgmr.msra.gmra.mxu1 %vm1671_vm6, %v5871_v17  ;;  %v6613_v7 = vsel %vm2418_vm10, %v6502_v28, %v6612_v36  ;;  %v6578_v31 = vrot.slane %v6445_v6, %v10302_v42  ;;  %v5063_v28 = vld [vmem:[%s11732_s4 + $0x358] sm:$0xff] }
 0xe2f   :  { %v6614_v62 = vsel %vm2420_vm11, %v6511_v49, %v6613_v7 }
 0xe30   :  { %v6615_v32 = vsel %vm2422_vm12, %v6520_v0, %v6614_v62 }
 0xe31   :  { %v6409_v50 = vpop.permute.xlu1 %6408 }
 0xe32   :  { %v6524_v12 = vrot.slane %v6409_v50, %v10302_v42 }
 0xe35   :  { %v6451_v48 = vpop.permute.xlu1 %6450 }
 0xe36   :  { %v6587_v47 = vrot.slane %v6451_v48, %v10302_v42 }
 0xe39   :  { %v6415_v34 = vpop.permute.xlu1 %6414 }
 0xe3a   :  { %v6533_v35 = vrot.slane %v6415_v34, %v10302_v42 }
 0xe3d   :  { %v6457_v45 = vpop.permute.xlu1 %6456 }
 0xe3e   :  { %v6596_v37 = vrot.slane %v6457_v45, %v10302_v42 }
 0xe41   :  { %v6463_v18 = vpop.permute.xlu1 %6462 }
 0xe42   :  { %v6605_v8 = vrot.slane %v6463_v18, %v10302_v42  ;;  %v5060_v42 = vld [vmem:[%s11732_s4 + $0x338] sm:$0xff] }
 0xe45   :  { %v6642_v40 = vpop.permute.xlu1 %6641 }
 0xe46   :  { %8899 = vmatprep.subr.mxu1 %v6642_v40 }
 0xe47   :  { %v6448_v2 = vpop.permute.xlu0 %6447  ;;  %8900 = vmatpush3.msra.mxu1 %v6642_v40 }
 0xe48   :  { %v6582_v36 = vrot.slane %v6448_v2, %v10305_v55 }
 0xe4a   :  { %v6583_v52 = vsel %vm2277_vm7, %v6582_v36, %v6578_v31 }
 0xe4b   :  { %v6412_v29 = vpop.permute.xlu0 %6411  ;;  %v6621_v17 = vsel %vm2420_vm11, %v6583_v52, %v6620_v54  ;;  %v7122_v52 = vld [vmem:[%s11732_s4 + $0x3e0] sm:$0xff] }
 0xe4c   :  { %v6528_v13 = vrot.slane %v6412_v29, %v10305_v55 }
 0xe4e   :  { %v6529_v59 = vsel %vm2277_vm7, %v6528_v13, %v6524_v12  ;;  %v8062_v13 = vld [vmem:[%s11732_s4 + $0x340] ss:$0 sm:$0xff] }
 0xe4f   :  { %v6454_v46 = vpop.permute.xlu0 %6453  ;;  %v6616_v57 = vsel %vm2424_vm13, %v6529_v59, %v6615_v32  ;;  %v5793_v12 = vadd.f32 %v8062_v13, %v11464_v19 }
 0xe50   :  { %v6591_v4 = vrot.slane %v6454_v46, %v10305_v55  ;;  %v5794_v46 = vadd.f32 %v11462_v53, %v8062_v13 }
 0xe52   :  { %v6592_v15 = vsel %vm2277_vm7, %v6591_v4, %v6587_v47  ;;  %v7026_v47 = vld [vmem:[%s11732_s4 + $0x398] sm:$0xff] }
 0xe53   :  { %v6418_v10 = vpop.permute.xlu0 %6417  ;;  %v6622_v21 = vsel %vm2422_vm12, %v6592_v15, %v6621_v17 }
 0xe54   :  { %v6537_v51 = vrot.slane %v6418_v10, %v10305_v55  ;;  %v12029_v10 = vld [vmem:[#allocation54_spill] sm:$0xff] }
 0xe56   :  { %v6538_v24 = vsel %vm2277_vm7, %v6537_v51, %v6533_v35 }
 0xe57   :  { %v6460_v38 = vpop.permute.xlu0 %6459  ;;  %v6617_v20 = vsel %vm2426_vm14, %v6538_v24, %v6616_v57 }
 0xe58   :  { %v6600_v60 = vrot.slane %v6460_v38, %v10305_v55  ;;  %8903 = vmatprep.mubr.msk.f32.mxu1 %vm1671_vm6, %v6617_v20  ;;  %v6627_v44 = vsel %vm1671_vm6, %v6617_v20, 0.0 }
 0xe59   :  { %6628 = vadd.xlane.f32.xlu1 %v6627_v44  ;;  %v7024_v44 = vld [vmem:[%s11732_s4 + $0x388] sm:$0xff] }
 0xe5a   :  { %v6601_v11 = vsel %vm2277_vm7, %v6600_v60, %v6596_v37  ;;  %v7025_v60 = vld [vmem:[%s11732_s4 + $0x390] sm:$0xff]  ;;  %v7023_v37 = vld [vmem:[%s11732_s4 + $0x380] sm:$0xff] }
 0xe5b   :  { %v6466_v58 = vpop.permute.xlu0 %6465  ;;  %v6623_v48 = vsel %vm2424_vm13, %v6601_v11, %v6622_v21 }
 0xe5c   :  { %v6609_v6 = vrot.slane %v6466_v58, %v10305_v55  ;;  %v5059_v55 = vld [vmem:[%s11732_s4 + $0x330] sm:$0xff] }
 0xe5e   :  { %v6610_v50 = vsel %vm2277_vm7, %v6609_v6, %v6605_v8  ;;  %v8144_v6 = vld [vmem:[%s11732_s4 + $0x370] ss:$0 sm:$0xff] }
 0xe5f   :  { %v6640_v14 = vpop.permute.xlu0 %6639  ;;  %v6624_v22 = vsel %vm2426_vm14, %v6610_v50, %v6623_v48  ;;  %v8145_v50 = vld [vmem:[%s11732_s4 + $0x378] ss:$0 sm:$0xff] }
 0xe60   :  { %8901 = vmatprep.subr.mxu1 %v6640_v14  ;;  %v6630_v34 = vsel %vm1671_vm6, %v6624_v22, 0.0 }
 0xe61   :  { %6631 = vadd.xlane.f32.xlu0 %v6630_v34  ;;  %8902 = vmatpush3.msra.mxu1 %v6640_v14 }
 0xe62   :  { %8904 = vmatmul.mubr.msk.f32.vlgmr.msra.gmra.mxu1 %vm1671_vm6, %v6624_v22  ;;  %8906 = vmatprep.subr.mxu1 %v5060_v42 }
 0xe63   :  { %8907 = vmatpush3.msra.mxu1 %v5060_v42 }
 0xe64   :  { %8908 = vmatprep.subr.mxu1 %v5059_v55 }
 0xe65   :  { %8909 = vmatpush3.msra.mxu1 %v5059_v55 }
 0xe6a   :  { %6811 = vrot.lane.b32.xlu1 %v11390_v16, %s9315_s7 }
 0xe77   :  { %6813 = vrot.lane.b32.xlu0 %v11331_v27, %s9315_s7 }
 0xee2   :  { %v6629_v18 = vpop.xlane.xlu1 %6628 }
 0xee3   :  { %v6633_v16 = vadd.f32 1e-06, %v6629_v18  ;;  %v7119_v18 = vld [vmem:[%s11732_s4 + $0x3c8] sm:$0xff] }
 0xee5   :  { %9294 = vrcp.f32 %v6633_v16  ;;  %v7118_v16 = vld [vmem:[%s11732_s4 + $0x3c0] sm:$0xff] }
 0xee6   :  { %v6812_v27 = vpop.permute.xlu1 %6811 }
 0xeea   :  { %v6632_v1 = vpop.xlane.xlu0 %6631 }
 0xeeb   :  { %v6634_v30 = vadd.f32 1e-06, %v6632_v1  ;;  %v7121_v1 = vld [vmem:[%s11732_s4 + $0x3d8] sm:$0xff] }
 0xeed   :  { %9296 = vrcp.f32 %v6634_v30  ;;  %v7117_v30 = vld [vmem:[%s11732_s4 + $0x3b8] sm:$0xff] }
 0xeee   :  { %v6814_v45 = vpop.permute.xlu0 %6813  ;;  %v11529_v40 = vpop.f32.mrf.mxu1 }
 0xeef   :  { %8913 = vmatprep.subr.mxu1 %v6814_v45 }
 0xef0   :  { %v11531_v2 = vpop.f32.mrf.mxu1 }
 0xef2   :  { %v9295_v41 = vpop.eup %9294 }
 0xefa   :  { %v9297_v56 = vpop.eup %9296 }
 0xf22   :  { %v8905_v3 = vpop.f32.mrf.mxu1 }
 0xf23   :  { %v6725_v9 = vmul.f32 %v9297_v56, %v8905_v3  ;;  %v7116_v3 = vld [vmem:[%s11732_s4 + $0x3b0] sm:$0xff] }
 0xf24   :  { %v6715_v29 = vpop.f32.mrf.mxu1 }
 0xf25   :  { %v6724_v26 = vmul.f32 %v9295_v41, %v6715_v29  ;;  %v7254_v29 = vld [vmem:[%s11732_s4 + $0x418] sm:$0xff] }
 0xf27   :  { %8910 = vmatprep.mubr.msk.f32.mxu1 %vm1671_vm6, %v6724_v26  ;;  %v8063_v26 = vld [vmem:[%s11732_s4 + $0x368] ss:$0 sm:$0xff] }
 0xf28   :  { %8911 = vmatmul.mubr.msk.f32.vlgmr.msra.gmra.mxu1 %vm1671_vm6, %v6725_v9 }
 0xf29   :  { %8914 = vmatpush3.msra.mxu1 %v6814_v45  ;;  %8917 = vmatprep.mubr.msk.f32.mxu1 %vm1671_vm6, %v6617_v20  ;;  %v7120_v45 = vld [vmem:[%s11732_s4 + $0x3d0] sm:$0xff] }
 0xf2a   :  { %8915 = vmatprep.subr.mxu1 %v6812_v27 }
 0xf2b   :  { %8916 = vmatpush3.msra.mxu1 %v6812_v27  ;;  %v5953_v27 = vadd.f32 %v8063_v26, %v11531_v2  ;;  %v7253_v2 = vld [vmem:[%s11732_s4 + $0x410] sm:$0xff] }
 0xf2c   :  { %8918 = vmatmul.mubr.msk.f32.vlgmr.msra.gmra.mxu1 %vm1671_vm6, %v6624_v22  ;;  %8920 = vmatprep.subr.mxu1 %v5064_v23 }
 0xf2d   :  { %8921 = vmatpush3.msra.mxu1 %v5064_v23 }
 0xf2e   :  { %8922 = vmatprep.subr.mxu1 %v5063_v28 }
 0xf2f   :  { %8923 = vmatpush3.msra.mxu1 %v5063_v28  ;;  %v5954_v28 = vadd.f32 %v11529_v40, %v8063_v26  ;;  %v12030_v40 = vld [vmem:[#allocation46_spill] sm:$0xff] }
 0xf30   :  { %8927 = vmatprep.subr.mxu1 %v7026_v47 }
 0xfe8   :  { %v8912_v49 = vpop.f32.mrf.mxu1 }
 0xfe9   :  { %v6808_v7 = vadd.f32 %v8912_v49, %v5794_v46  ;;  %v8146_v46 = vld [vmem:[%s11732_s4 + $0x3a0] ss:$0 sm:$0xff] }
 0xfea   :  { %v6798_v0 = vpop.f32.mrf.mxu1 }
 0xfeb   :  { %v6980_v25 = vadd.f32 %v6808_v7, %v12028_v61  ;;  %v6807_v62 = vadd.f32 %v6798_v0, %v5793_v12 }
 0xfec   :  { %v8919_v59 = vpop.f32.mrf.mxu1 }
 0xfed   :  { %v6979_v33 = vadd.f32 %v6807_v62, %v12029_v10  ;;  %v6988_v63 = vsel %vm582_vm5, %v6980_v25, 0.0  ;;  %v6893_v36 = vmul.f32 %v9297_v56, %v8919_v59  ;;  %v7252_v10 = vld [vmem:[%s11732_s4 + $0x408] sm:$0xff] }
 0xfee   :  { %6989 = vadd.xlane.f32.xlu0 %v6988_v63  ;;  %v6883_v35 = vpop.f32.mrf.mxu1  ;;  %v7251_v63 = vld [vmem:[%s11732_s4 + $0x400] sm:$0xff] }
 0xfef   :  { %v6892_v51 = vmul.f32 %v9295_v41, %v6883_v35  ;;  %v6985_v32 = vsel %vm582_vm5, %v6979_v33, 0.0  ;;  %v7115_v41 = vld [vmem:[%s11732_s4 + $0x3a8] sm:$0xff]  ;;  %v12031_v35 = vld [vmem:[#allocation45_spill] sm:$0xff] }
 0xff0   :  { %6986 = vadd.xlane.f32.xlu1 %v6985_v32  ;;  %v7373_v32 = vld [vmem:[%s11732_s4 + $0x448] sm:$0xff] }
 0xff1   :  { %8924 = vmatprep.mubr.msk.f32.mxu1 %vm1671_vm6, %v6892_v51  ;;  %8968 = vmatprep.subr.mxu0 %v7373_v32 }
 0xff2   :  { %8925 = vmatmul.mubr.msk.f32.vlgmr.msra.gmra.mxu1 %vm1671_vm6, %v6893_v36  ;;  %8969 = vmatpush3.msra.mxu0 %v7373_v32  ;;  %v8149_v36 = vld [vmem:[%s11732_s4 + $0x3e8] ss:$0 sm:$0xff] }
 0xff3   :  { %8928 = vmatpush3.msra.mxu1 %v7026_v47 }
 0xff4   :  { %8929 = vmatprep.subr.mxu1 %v7025_v60 }
 0xff5   :  { %8930 = vmatpush3.msra.mxu1 %v7025_v60 }
 0xff6   :  { %8931 = vmatprep.subr.mxu1 %v7024_v44 }
 0xff7   :  { %8932 = vmatpush3.msra.mxu1 %v7024_v44 }
 0xff8   :  { %8933 = vmatprep.subr.mxu1 %v7023_v37 }
 0xff9   :  { %8934 = vmatpush3.msra.mxu1 %v7023_v37 }
 0xffa   :  { %8938 = vmatprep.subr.mxu1 %v7122_v52 }
0x1077   :  { %v6990_v53 = vpop.xlane.xlu0 %6989 }
0x1078   :  { %v6992_v19 = vmul.f32 0.03125, %v6990_v53 }
0x1079   :  { %v6987_v4 = vpop.xlane.xlu1 %6986 }
0x107a   :  { %v6991_v24 = vmul.f32 0.03125, %v6987_v4  ;;  %v6994_v57 = vsub.f32 %v6980_v25, %v6992_v19 }
0x107c   :  { %v6993_v43 = vsub.f32 %v6979_v33, %v6991_v24  ;;  %v6996_v20 = vmul.f32 %v6994_v57, %v6994_v57 }
0x107e   :  { %v6995_v31 = vmul.f32 %v6993_v43, %v6993_v43  ;;  %v7000_v39 = vsel %vm582_vm5, %v6996_v20, 0.0 }
0x1080   :  { %v6997_v38 = vsel %vm582_vm5, %v6995_v31, 0.0 }
0x1081   :  { %6998 = vadd.xlane.f32.xlu0 %v6997_v38  ;;  %v8154_v38 = vld [vmem:[%s11732_s4 + $0x420] ss:$0 sm:$0xff] }
0x1085   :  { %7001 = vadd.xlane.f32.xlu0 %v7000_v39 }
0x10b2   :  { %v8926_v56 = vpop.f32.mrf.mxu1 }
0x10b3   :  { %v6976_v13 = vadd.f32 %v8926_v56, %v5954_v28 }
0x10b4   :  { %v6966_v9 = vpop.f32.mrf.mxu1 }
0x10b5   :  { %v6975_v23 = vadd.f32 %v6966_v9, %v5953_v27 }
0x110a   :  { %v6999_v5 = vpop.xlane.xlu0 %6998 }
0x110b   :  { %v7003_v15 = vmul.f32 0.03125, %v6999_v5 }
0x110d   :  { %v7005_v54 = vadd.f32 1e-05, %v7003_v15 }
0x110e   :  { %v7002_v11 = vpop.xlane.xlu0 %7001 }
0x110f   :  { %9298 = vrsqrt.f32 %v7005_v54  ;;  %v7004_v58 = vmul.f32 0.03125, %v7002_v11 }
0x1111   :  { %v7006_v8 = vadd.f32 1e-05, %v7004_v58 }
0x1113   :  { %9300 = vrsqrt.f32 %v7006_v8 }
0x1114   :  { %9302 = vtanh.f32 %v6975_v23 }
0x1115   :  { %9304 = vtanh.f32 %v6976_v13 }
0x111c   :  { %v9299_v17 = vpop.eup %9298 }
0x111d   :  { %v7009_v21 = vmul.f32 %v9299_v17, %v6993_v43 }
0x111f   :  { %v7015_v48 = vmul.f32 %v8144_v6, %v7009_v21 }
0x1120   :  { %v9301_v14 = vpop.eup %9300 }
0x1121   :  { %v7010_v22 = vmul.f32 %v9301_v14, %v6994_v57  ;;  %v11577_v34 = vadd.f32 %v8145_v50, %v7015_v48  ;;  %v9303_v61 = vpop.eup %9302 }
0x1122   :  { %v6981_v59 = vadd.f32 %v9303_v61, %v12030_v40  ;;  %v9305_v33 = vpop.eup %9304  ;;  %v7546_v61 = vld [vmem:[%s11732_s4 + $0x470] sm:$0xff]  ;;  %v7544_v40 = vld [vmem:[%s11732_s4 + $0x460] sm:$0xff] }
0x1123   :  { %v7016_v42 = vmul.f32 %v8144_v6, %v7010_v22  ;;  %8935 = vmatprep.mubr.msk.f32.mxu1 %vm582_vm5, %v11577_v34  ;;  %v6982_v51 = vadd.f32 %v9305_v33, %v12031_v35  ;;  %8984 = vmatprep.subr.mxu0 %v7546_v61 }
0x1125   :  { %v11581_v55 = vadd.f32 %v8145_v50, %v7016_v42 }
0x1127   :  { %8936 = vmatmul.mubr.msk.f32.vlgmr.msra.gmra.mxu1 %vm582_vm5, %v11581_v55 }
0x1128   :  { %8939 = vmatpush3.msra.mxu1 %v7122_v52 }
0x1129   :  { %8940 = vmatprep.subr.mxu1 %v7121_v1 }
0x112a   :  { %8941 = vmatpush3.msra.mxu1 %v7121_v1 }
0x112b   :  { %8942 = vmatprep.subr.mxu1 %v7120_v45 }
0x112c   :  { %8943 = vmatpush3.msra.mxu1 %v7120_v45 }
0x112d   :  { %8944 = vmatprep.subr.mxu1 %v7119_v18 }
0x112e   :  { %8945 = vmatpush3.msra.mxu1 %v7119_v18 }
0x112f   :  { %8946 = vmatprep.subr.mxu1 %v7118_v16 }
0x1130   :  { %8947 = vmatpush3.msra.mxu1 %v7118_v16 }
0x1131   :  { %8948 = vmatprep.subr.mxu1 %v7117_v30 }
0x1132   :  { %8949 = vmatpush3.msra.mxu1 %v7117_v30 }
0x1133   :  { %8950 = vmatprep.subr.mxu1 %v7116_v3 }
0x1134   :  { %8951 = vmatpush3.msra.mxu1 %v7116_v3 }
0x1135   :  { %8952 = vmatprep.subr.mxu1 %v7115_v41 }
0x1136   :  { %8953 = vmatpush3.msra.mxu1 %v7115_v41 }
0x1137   :  { %8957 = vmatprep.subr.mxu1 %v7254_v29 }
0x11e7   :  { %v8937_v49 = vpop.f32.mrf.mxu1 }
0x11e8   :  { %v7110_v12 = vadd.f32 %v8937_v49, %v8146_v46 }
0x11e9   :  { %v7104_v7 = vpop.f32.mrf.mxu1 }
0x11ea   :  { %v7105_v0 = vadd.f32 %v8146_v46, %v7104_v7  ;;  %v7114_v62 = vmax.f32 %v7110_v12, 0.0 }
0x11ec   :  { %v7113_v25 = vmax.f32 %v7105_v0, 0.0  ;;  %v7372_v0 = vld [vmem:[%s11732_s4 + $0x440] sm:$0xff] }
0x11ee   :  { %8954 = vmatprep.mubr.msk.f32.mxu1 %vm3945_vm15, %v7113_v25  ;;  %v7371_v25 = vld [vmem:[%s11732_s4 + $0x438] sm:$0xff] }
0x11ef   :  { %8955 = vmatmul.mubr.msk.f32.vlgmr.msra.gmra.mxu1 %vm3945_vm15, %v7114_v62  ;;  %v7545_v62 = vld [vmem:[%s11732_s4 + $0x468] sm:$0xff] }
0x11f0   :  { %8958 = vmatpush3.msra.mxu1 %v7254_v29  ;;  %8965 = vmatprep.mubr.msk.f32.mxu1 %vm582_vm5, %v6981_v59  ;;  %v7369_v59 = vld [vmem:[%s11732_s4 + $0x428] sm:$0xff] }
0x11f1   :  { %8959 = vmatprep.subr.mxu1 %v7253_v2 }
0x11f2   :  { %8960 = vmatpush3.msra.mxu1 %v7253_v2  ;;  %v7370_v2 = vld [vmem:[%s11732_s4 + $0x430] sm:$0xff] }
0x11f3   :  { %8961 = vmatprep.subr.mxu1 %v7252_v10 }
0x11f4   :  { %8962 = vmatpush3.msra.mxu1 %v7252_v10  ;;  %v7543_v10 = vld [vmem:[%s11732_s4 + $0x458] sm:$0xff] }
0x11f5   :  { %8963 = vmatprep.subr.mxu1 %v7251_v63 }
0x11f6   :  { %8964 = vmatpush3.msra.mxu1 %v7251_v63 }
0x11f7   :  { %8966 = vmatmul.mubr.msk.f32.vlgmr.msra.gmra.mxu1 %vm582_vm5, %v6982_v51  ;;  %8973 = vmatprep.subr.mxu1 %v7372_v0 }
0x11f8   :  { %8974 = vmatpush3.msra.mxu1 %v7372_v0 }
0x11f9   :  { %8975 = vmatprep.subr.mxu1 %v7371_v25 }
0x11fa   :  { %8976 = vmatpush3.msra.mxu1 %v7371_v25 }
0x11fb   :  { %8977 = vmatprep.subr.mxu1 %v7370_v2 }
0x11fc   :  { %8978 = vmatpush3.msra.mxu1 %v7370_v2 }
0x11fd   :  { %8979 = vmatprep.subr.mxu1 %v7369_v59 }
0x11fe   :  { %8980 = vmatpush3.msra.mxu1 %v7369_v59 }
0x12af   :  { %v8956_v53 = vpop.f32.mrf.mxu1 }
0x12b0   :  { %v7206_v19 = vadd.f32 %v8956_v53, %v8149_v36 }
0x12b1   :  { %v7200_v4 = vpop.f32.mrf.mxu1 }
0x12b2   :  { %v7210_v24 = vadd.f32 %v7206_v19, %v11581_v55  ;;  %v7201_v57 = vadd.f32 %v8149_v36, %v7200_v4  ;;  %v8152_v19 = vld [vmem:[%s11732_s4 + $0x3f0] ss:$0 sm:$0xff] }
0x12b4   :  { %v7209_v43 = vadd.f32 %v7201_v57, %v11577_v34  ;;  %v7216_v31 = vsel %vm582_vm5, %v7210_v24, 0.0 }
0x12b5   :  { %7217 = vadd.xlane.f32.xlu0 %v7216_v31  ;;  %v8153_v31 = vld [vmem:[%s11732_s4 + $0x3f8] ss:$0 sm:$0xff] }
0x12b6   :  { %v7213_v20 = vsel %vm582_vm5, %v7209_v43, 0.0 }
0x12b7   :  { %v8967_v39 = vpop.f32.mrf.mxu1  ;;  %7214 = vadd.xlane.f32.xlu1 %v7213_v20 }
0x12b8   :  { %v7338_v47 = vadd.f32 %v8967_v39, %v8154_v38 }
0x12b9   :  { %v7332_v60 = vpop.f32.mrf.mxu1 }
0x12ba   :  { %v7333_v44 = vadd.f32 %v8154_v38, %v7332_v60  ;;  %v7342_v37 = vsel %vm120_vm0, %v7338_v47, 0.0  ;;  %v7629_v60 = vld [vmem:[%s11732_s4 + $0x480] sm:$0xff] }
0x12bc   :  { %v7341_v52 = vsel %vm120_vm0, %v7333_v44, 0.0 }
0x12bd   :  { %v7343_v5 = vadd.f32 %v7342_v37, %v7341_v52  ;;  %v8162_v52 = vld [vmem:[%s11732_s4 + $0x478] ss:$0 sm:$0xff] }
0x12bf   :  { %v7344_v15 = vrot.slane %v7343_v5, 4 }
0x12c1   :  { %v7345_v54 = vadd.f32 %v7344_v15, %v7343_v5  ;;  %v8161_v15 = vld [vmem:[%s11732_s4 + $0x450] ss:$0 sm:$0xff] }
0x12c3   :  { %v7346_v11 = vrot.slane %v7345_v54, 2 }
0x12c5   :  { %v7347_v58 = vadd.f32 %v7346_v11, %v7345_v54 }
0x12c7   :  { %v7348_v8 = vrot.slane %v7347_v58, 1 }
0x12c9   :  { %v7349_v17 = vadd.f32 %v7348_v8, %v7347_v58 }
0x12cb   :  { %v7351_v6 = vmul.f32 0.0625, %v7349_v17 }
0x12cd   :  { %v7352_v21 = vsub.f32 %v7333_v44, %v7351_v6  ;;  %v7353_v50 = vsub.f32 %v7338_v47, %v7351_v6  ;;  %v7630_v47 = vld [vmem:[%s11732_s4 + $0x488] sm:$0xff] }
0x12ce   :  { %8995 = vmatprep.subr.mxu1 %v7630_v47 }
0x12cf   :  { %v7354_v48 = vmul.f32 %v7352_v21, %v7352_v21  ;;  %v7355_v14 = vmul.f32 %v7353_v50, %v7353_v50 }
0x12d1   :  { %v7356_v22 = vsel %vm120_vm0, %v7354_v48, 0.0  ;;  %v7357_v34 = vsel %vm120_vm0, %v7355_v14, 0.0 }
0x12d2   :  { %v7358_v42 = vadd.f32 %v7357_v34, %v7356_v22 }
0x12d4   :  { %v7359_v55 = vrot.slane %v7358_v42, 4 }
0x12d6   :  { %v7360_v1 = vadd.f32 %v7359_v55, %v7358_v42  ;;  %v7719_v55 = vld [vmem:[%s11732_s4 + $0x498] sm:$0xff] }
0x12d8   :  { %v7361_v45 = vrot.slane %v7360_v1, 2 }
0x12da   :  { %v7362_v18 = vadd.f32 %v7361_v45, %v7360_v1  ;;  %v8165_v1 = vld [vmem:[%s11732_s4 + $0x490] ss:$0 sm:$0xff] }
0x12dc   :  { %v7363_v16 = vrot.slane %v7362_v18, 1 }
0x12de   :  { %v7364_v30 = vadd.f32 %v7363_v16, %v7362_v18 }
0x12e0   :  { %v7365_v3 = vadd.f32 1e-06, %v7364_v30 }
0x12e2   :  { %9306 = vrsqrt.f32 %v7365_v3 }
0x12ef   :  { %v9307_v41 = vpop.eup %9306 }
0x12f0   :  { %v7367_v29 = vmul.f32 %v9307_v41, %v7352_v21  ;;  %v7368_v56 = vmul.f32 %v9307_v41, %v7353_v50 }
0x12f2   :  { %8970 = vmatprep.mubr.msk.f32.mxu0 %vm120_vm0, %v7367_v29 }
0x12f3   :  { %8971 = vmatmul.mubr.msk.f32.vlgmr.msra.gmra.mxu0 %vm120_vm0, %v7368_v56 }
0x12f4   :  { %8985 = vmatpush3.msra.mxu0 %v7546_v61 }
0x12f5   :  { %8986 = vmatprep.subr.mxu0 %v7545_v62 }
0x12f6   :  { %8987 = vmatpush3.msra.mxu0 %v7545_v62 }
0x12f7   :  { %8988 = vmatprep.subr.mxu0 %v7544_v40 }
0x12f8   :  { %8989 = vmatpush3.msra.mxu0 %v7544_v40 }
0x12f9   :  { %8990 = vmatprep.subr.mxu0 %v7543_v10 }
0x12fa   :  { %8991 = vmatpush3.msra.mxu0 %v7543_v10 }
0x12fb   :  { %9002 = vmatprep.subr.mxu0 %v7719_v55 }
0x133e   :  { %v7218_v26 = vpop.xlane.xlu0 %7217 }
0x133f   :  { %v7220_v9 = vmul.f32 0.03125, %v7218_v26 }
0x1340   :  { %v7215_v27 = vpop.xlane.xlu1 %7214 }
0x1341   :  { %v7222_v23 = vsub.f32 %v7210_v24, %v7220_v9  ;;  %v7219_v28 = vmul.f32 0.03125, %v7215_v27 }
0x1343   :  { %v7221_v13 = vsub.f32 %v7209_v43, %v7219_v28  ;;  %v7224_v46 = vmul.f32 %v7222_v23, %v7222_v23 }
0x1345   :  { %v7228_v49 = vsel %vm582_vm5, %v7224_v46, 0.0  ;;  %v7223_v12 = vmul.f32 %v7221_v13, %v7221_v13 }
0x1346   :  { %7229 = vadd.xlane.f32.xlu0 %v7228_v49 }
0x1347   :  { %v7225_v7 = vsel %vm582_vm5, %v7223_v12, 0.0 }
0x1348   :  { %7226 = vadd.xlane.f32.xlu1 %v7225_v7 }
0x1359   :  { %7808 = vrot.lane.b32.xlu1 %v7367_v29, %s9316_s30 }
0x135c   :  { %7810 = vrot.lane.b32.xlu0 %v7368_v56, %s9316_s30  ;;  %v8168_v56 = vld [vmem:[%s11732_s4 + $0x4a0] ss:$0 sm:$0xff] }
0x13b3   :  { %v8972_v44 = vpop.f32.mrf.mxu0 }
0x13b5   :  { %v7446_v37 = vpop.f32.mrf.mxu0 }
0x13cf   :  { %v7230_v33 = vpop.xlane.xlu0 %7229 }
0x13d0   :  { %v7232_v63 = vmul.f32 0.03125, %v7230_v33 }
0x13d1   :  { %v7227_v35 = vpop.xlane.xlu1 %7226 }
0x13d2   :  { %v7234_v51 = vadd.f32 1e-05, %v7232_v63  ;;  %v7231_v32 = vmul.f32 0.03125, %v7227_v35 }
0x13d3   :  { %v7811_v48 = vpop.permute.xlu0 %7810 }
0x13d4   :  { %9308 = vrsqrt.f32 %v7234_v51  ;;  %v7233_v36 = vadd.f32 1e-05, %v7231_v32 }
0x13d5   :  { %v7809_v42 = vpop.permute.xlu1 %7808 }
0x13d6   :  { %9310 = vrsqrt.f32 %v7233_v36 }
0x13e1   :  { %v9309_v53 = vpop.eup %9308 }
0x13e2   :  { %v7238_v4 = vmul.f32 %v9309_v53, %v7222_v23 }
0x13e3   :  { %v9311_v24 = vpop.eup %9310 }
0x13e4   :  { %v7237_v57 = vmul.f32 %v9311_v24, %v7221_v13  ;;  %v7244_v43 = vmul.f32 %v8152_v19, %v7238_v4 }
0x13e6   :  { %v7243_v38 = vmul.f32 %v8152_v19, %v7237_v57  ;;  %v7250_v39 = vadd.f32 %v8153_v31, %v7244_v43 }
0x13e8   :  { %v7249_v20 = vadd.f32 %v8153_v31, %v7243_v38 }
0x13ea   :  { %8981 = vmatprep.mubr.msk.f32.mxu1 %vm582_vm5, %v7249_v20  ;;  %8992 = vmatprep.mubr.msk.f32.mxu0 %vm582_vm5, %v7249_v20 }
0x13eb   :  { %8982 = vmatmul.mubr.msk.f32.vlgmr.msra.gmra.mxu1 %vm582_vm5, %v7250_v39  ;;  %8993 = vmatmul.mubr.msk.f32.vlgmr.msra.gmra.mxu0 %vm582_vm5, %v7250_v39 }
0x13ec   :  { %8996 = vmatpush3.msra.mxu1 %v7630_v47  ;;  %9003 = vmatpush3.msra.mxu0 %v7719_v55 }
0x13ed   :  { %8997 = vmatprep.subr.mxu1 %v7629_v60 }
0x13ee   :  { %8998 = vmatpush3.msra.mxu1 %v7629_v60 }
0x14ab   :  { %v8983_v5 = vpop.f32.mrf.mxu1  ;;  %v8994_v54 = vpop.f32.mrf.mxu0 }
0x14ac   :  { %v7533_v11 = vadd.f32 %v8983_v5, %v8972_v44  ;;  %v7624_v58 = vadd.f32 %v8994_v54, %v8162_v52 }
0x14ad   :  { %v7527_v8 = vpop.f32.mrf.mxu1  ;;  %v7618_v17 = vpop.f32.mrf.mxu0 }
0x14ae   :  { %v7542_v6 = vadd.f32 %v8161_v15, %v7533_v11  ;;  %v7528_v21 = vadd.f32 %v7527_v8, %v7446_v37  ;;  %v7619_v50 = vadd.f32 %v8162_v52, %v7618_v17  ;;  %v7628_v34 = vmax.f32 %v7624_v58, 0.0 }
0x14b0   :  { %7807 = vst.msk [vmem:[%s11737_s5 + $0x8] sm:$0xff] %vm582_vm5, %v7542_v6  ;;  %v7541_v14 = vadd.f32 %v8161_v15, %v7528_v21  ;;  %v7627_v22 = vmax.f32 %v7619_v50, 0.0 }
0x14b1   :  { %7816 = vst.msk [vmem:[%s11737_s5 + $0x8] sm:$0xff] %vm7814_vm1, %v7811_v48 }
0x14b2   :  { %7806 = vst.msk [vmem:[%s11737_s5] sm:$0xff] %vm582_vm5, %v7541_v14  ;;  %8999 = vmatprep.mubr.msk.f32.mxu1 %vm1671_vm6, %v7627_v22 }
0x14b3   :  { %9000 = vmatmul.mubr.msk.f32.vlgmr.msra.gmra.mxu1 %vm1671_vm6, %v7628_v34  ;;  %7815 = vst.msk [vmem:[%s11737_s5] sm:$0xff] %vm7814_vm1, %v7809_v42 }
0x1573   :  { %v9001_v45 = vpop.f32.mrf.mxu1 }
0x1574   :  { %v7714_v18 = vadd.f32 %v9001_v45, %v8165_v1 }
0x1575   :  { %v7708_v16 = vpop.f32.mrf.mxu1 }
0x1576   :  { %v7709_v30 = vadd.f32 %v8165_v1, %v7708_v16  ;;  %v7718_v41 = vmax.f32 %v7714_v18, 0.0 }
0x1578   :  { %v7717_v3 = vmax.f32 %v7709_v30, 0.0 }
0x157a   :  { %9004 = vmatprep.mubr.msk.f32.mxu0 %vm120_vm0, %v7717_v3 }
0x157b   :  { %9005 = vmatmul.mubr.msk.f32.vlgmr.msra.gmra.mxu0 %vm120_vm0, %v7718_v41 }
0x163b   :  { %v9006_v29 = vpop.f32.mrf.mxu0 }
0x163c   :  { %v7803_v27 = vadd.f32 %v9006_v29, %v8168_v56 }
0x163d   :  { %v7797_v26 = vpop.f32.mrf.mxu0 }
0x163e   :  { %v7798_v9 = vadd.f32 %v8168_v56, %v7797_v26 }
0x1640   :  { %7819 = vrot.lane.b32.xlu1 %v7798_v9, %s9317_s9 }
0x1644   :  { %7821 = vrot.lane.b32.xlu1 %v7803_v27, %s9317_s9 }
0x16b2   :  { %v7820_v23 = vpop.permute.xlu1 %7819 }
0x16b3   :  { %7826 = vst.msk [vmem:[%s11737_s5] sm:$0xff] %vm7825_vm2, %v7820_v23 }
0x16b6   :  { %v7822_v28 = vpop.permute.xlu1 %7821 }
0x16b7   :  { %7827 = vst.msk [vmem:[%s11737_s5 + $0x8] sm:$0xff] %vm7825_vm2, %v7822_v28 }

</bundles_post_ra>
